<compile_context>
chip_gen: v5e
topology: v5e:2x2
jax: 0.10.0
libtpu: 0.0.40
codegen_flags: <defaults>
</compile_context>

<pallas_src>
import functools

import jax
import jax.numpy as jnp
from jax import lax
from jax.experimental import pallas as pl
from jax.experimental.pallas import tpu as pltpu

EPS = 1e-5


def _resblock_kernel(xpad_ref, w1_ref, sc1_ref, sh1_ref,
                     w2_ref, sc2_ref, sh2_ref,
                     ws_ref, scs_ref, shs_ref,
                     o_ref, x32_ref, h1pad_ref, *, H, W):
    # xpad_ref : (H+2, W+2, Cin)   halo-padded input (one batch element), compute dtype
    # o_ref    : (H*W, Cout)       f32 output block
    # x32_ref  : (H+2, W+2, Cin)   f32 staging copy of the input (scratch)
    # h1pad_ref: (H+2, W+2, Cout)  f32 halo-padded conv1 output (scratch)
    Cin = xpad_ref.shape[-1]
    Cout = o_ref.shape[-1]
    HW = H * W
    cdt = w1_ref.dtype                      # MXU operand dtype (bf16 by default)

    # Stage the tiny halo'd input once in f32; taps are cast back to `cdt`
    # right before each dot so the matmuls stay bf16 and HBM traffic stays bf16.
    x32_ref[...] = xpad_ref[...].astype(jnp.float32)

    # ---- conv1: 9 accumulated (HW, Cin) @ (Cin, Cout) matmuls (no im2col buffer) ----
    acc1 = jnp.zeros((HW, Cout), jnp.float32)
    x_center = None
    for kh in range(3):
        for kw in range(3):
            tap = x32_ref[kh:kh + H, kw:kw + W, :].reshape(HW, Cin).astype(cdt)
            if kh == 1 and kw == 1:
                x_center = tap              # reused by the 1x1 projection shortcut
            acc1 = acc1 + jnp.dot(tap, w1_ref[kh * 3 + kw],
                                  preferred_element_type=jnp.float32)
    h1 = jnp.maximum(acc1 * sc1_ref[...] + sh1_ref[...], 0.0)   # bias+BN1 folded, ReLU

    # ---- shortcut: 1x1 conv + BN on the un-shifted input (centre tap) ----
    sc = jnp.dot(x_center, ws_ref[...], preferred_element_type=jnp.float32)
    sc = sc * scs_ref[...] + shs_ref[...]

    # ---- tiny halo'd intermediate for conv2: full zero + interior store ----
    h1pad_ref[...] = jnp.zeros_like(h1pad_ref)
    h1pad_ref[1:1 + H, 1:1 + W, :] = h1.reshape(H, W, Cout)

    # ---- conv2: same 9-tap accumulation, then BN2 + residual add + final ReLU ----
    acc2 = jnp.zeros((HW, Cout), jnp.float32)
    for kh in range(3):
        for kw in range(3):
            tap = h1pad_ref[kh:kh + H, kw:kw + W, :].reshape(HW, Cout).astype(cdt)
            acc2 = acc2 + jnp.dot(tap, w2_ref[kh * 3 + kw],
                                  preferred_element_type=jnp.float32)
    h2 = acc2 * sc2_ref[...] + sh2_ref[...]                     # bias+BN2 folded

    o_ref[...] = jnp.maximum(h2 + sc, 0.0).astype(o_ref.dtype)


def residual_block_pallas(x_nchw, fp, compute_dtype=jnp.bfloat16):
    """x_nchw: (N, Cin, H, W) float32.  fp: folded params dict.  Returns NCHW f32.

    compute_dtype: MXU operand dtype (default bfloat16 -> ~2x MXU rate on
    v6e/v7x and half the HBM bytes).  Accumulation and BN/ReLU epilogues stay
    float32; pass jnp.float32 for bit-for-bit f32 operands.
    """
    N, Cin, H, W = x_nchw.shape
    Cout = fp["w1"].shape[-1]
    Hp, Wp = H + 2, W + 2
    HW = H * W

    # NCHW -> NHWC, cast to the MXU operand dtype first, then a 1-px spatial halo.
    # No channel padding: only real channels travel to/from HBM.
    x = jnp.transpose(x_nchw.astype(compute_dtype), (0, 2, 3, 1))
    xpad = jnp.pad(x, ((0, 0), (1, 1), (1, 1), (0, 0)))

    # per-tap weights: (3,3,Ci,Co) -> (9, Ci, Co); tap index t = kh*3 + kw
    w1 = fp["w1"].reshape(9, Cin, Cout).astype(compute_dtype)
    w2 = fp["w2"].reshape(9, Cout, Cout).astype(compute_dtype)
    ws = fp["ws"].astype(compute_dtype)

    sc1, sh1 = fp["sc1"].astype(jnp.float32), fp["sh1"].astype(jnp.float32)
    sc2, sh2 = fp["sc2"].astype(jnp.float32), fp["sh2"].astype(jnp.float32)
    scs, shs = fp["scs"].astype(jnp.float32), fp["shs"].astype(jnp.float32)

    def const(arr):                          # whole-array block, fetched once
        nd = arr.ndim
        return pl.BlockSpec(arr.shape, lambda n, _nd=nd: (0,) * _nd)

    # VMEM budget from actual buffer sizes (double-buffered blocks + scratch),
    # instead of a hardcoded 32 MiB.
    isz = jnp.dtype(compute_dtype).itemsize
    block_bytes = (Hp * Wp * Cin * isz
                   + (9 * Cin * Cout + 9 * Cout * Cout + Cin * Cout) * isz
                   + 6 * Cout * 4            # folded scales / shifts (f32)
                   + HW * Cout * 4)          # output block (f32)
    scratch_bytes = Hp * Wp * (Cin + Cout) * 4
    vmem_limit = int(min(max(2 * block_bytes + scratch_bytes + (2 << 20), 4 << 20),
                         100 << 20))

    kernel = functools.partial(_resblock_kernel, H=H, W=W)

    out = pl.pallas_call(
        kernel,
        out_shape=jax.ShapeDtypeStruct((N, HW, Cout), jnp.float32),
        grid_spec=pltpu.PrefetchScalarGridSpec(
            num_scalar_prefetch=0,
            grid=(N,),
            in_specs=[
                pl.BlockSpec((None, Hp, Wp, Cin), lambda n: (n, 0, 0, 0)),
                const(w1), const(sc1), const(sh1),
                const(w2), const(sc2), const(sh2),
                const(ws), const(scs), const(shs),
            ],
            out_specs=pl.BlockSpec((None, HW, Cout), lambda n: (n, 0, 0)),
            scratch_shapes=[
                pltpu.VMEM((Hp, Wp, Cin), jnp.float32),    # f32 staging of the input
                pltpu.VMEM((Hp, Wp, Cout), jnp.float32),   # halo'd conv1 output
            ],
        ),
        compiler_params=pltpu.CompilerParams(
            dimension_semantics=("parallel",),   # batch more elements per call on v7x
            vmem_limit_bytes=vmem_limit,
        ),
    )(xpad, w1, sc1, sh1, w2, sc2, sh2, ws, scs, shs)

    out = out.reshape(N, H, W, Cout)
    return jnp.transpose(out, (0, 3, 1, 2))                  # -> NCHW


# ----------------------- parameter setup (deterministic) -----------------------
def make_params(key, in_c, out_c):
    ks = jax.random.split(key, 18)

    def uniform(k, shape, fan_in):
        bound = 1.0 / (fan_in ** 0.5)
        return jax.random.uniform(k, shape, jnp.float32, -bound, bound)

    def bn_params(k4):
        kg, kb, km, kv = jax.random.split(k4, 4)
        gamma = 1.0 + 0.1 * jax.random.normal(kg, (out_c,), jnp.float32)
        beta = 0.1 * jax.random.normal(kb, (out_c,), jnp.float32)
        mean = 0.1 * jax.random.normal(km, (out_c,), jnp.float32)
        var = jnp.abs(jax.random.normal(kv, (out_c,), jnp.float32)) + 0.5
        return gamma, beta, mean, var

    raw = {
        "w1": uniform(ks[0], (3, 3, in_c, out_c), 9 * in_c),   # HWIO
        "b1": uniform(ks[1], (out_c,), 9 * in_c),
        "bn1": bn_params(ks[2]),
        "w2": uniform(ks[3], (3, 3, out_c, out_c), 9 * out_c),
        "b2": uniform(ks[4], (out_c,), 9 * out_c),
        "bn2": bn_params(ks[5]),
        "ws": uniform(ks[6], (in_c, out_c), in_c),             # 1x1 conv as matmul
        "bs": uniform(ks[7], (out_c,), in_c),
        "bns": bn_params(ks[8]),
    }

    def fold(b, bn):
        gamma, beta, mean, var = bn
        scale = gamma / jnp.sqrt(var + EPS)
        shift = (b - mean) * scale + beta
        return scale.reshape(1, out_c), shift.reshape(1, out_c)

    sc1, sh1 = fold(raw["b1"], raw["bn1"])
    sc2, sh2 = fold(raw["b2"], raw["bn2"])
    scs, shs = fold(raw["bs"], raw["bns"])
    folded = {"w1": raw["w1"], "sc1": sc1, "sh1": sh1,
              "w2": raw["w2"], "sc2": sc2, "sh2": sh2,
              "ws": raw["ws"], "scs": scs, "shs": shs}
    return raw, folded


# ----------------------------- pure-JAX reference ------------------------------
def ref_forward(x_nchw, raw):
    x = jnp.transpose(x_nchw, (0, 2, 3, 1))

    def conv(inp, w, b):
        return lax.conv_general_dilated(
            inp, w, (1, 1), "SAME",
            dimension_numbers=("NHWC", "HWIO", "NHWC"),
            precision=lax.Precision.HIGHEST) + b

    def bn(inp, params):
        gamma, beta, mean, var = params
        return (inp - mean) / jnp.sqrt(var + EPS) * gamma + beta

    h = jax.nn.relu(bn(conv(x, raw["w1"], raw["b1"]), raw["bn1"]))
    h = bn(conv(h, raw["w2"], raw["b2"]), raw["bn2"])
    sc = bn(jnp.einsum("nhwc,co->nhwo", x, raw["ws"],
                       precision=lax.Precision.HIGHEST) + raw["bs"], raw["bns"])
    return jnp.transpose(jax.nn.relu(h + sc), (0, 3, 1, 2))


if __name__ == "__main__":
    N, IN_C, OUT_C, HW = 2, 4, 8, 16
    key = jax.random.PRNGKey(0)
    kx, kp = jax.random.split(key)
    x = jax.random.normal(kx, (N, IN_C, HW, HW), jnp.float32)   # NCHW, like PyTorch

    raw, folded = make_params(kp, IN_C, OUT_C)
    y_ref = jax.block_until_ready(ref_forward(x, raw))

    # f32 MXU operands: check against the HIGHEST-precision reference.
    y_f32 = jax.block_until_ready(
        residual_block_pallas(x, folded, compute_dtype=jnp.float32))
    assert y_f32.shape == (N, OUT_C, HW, HW), y_f32.shape
    assert jnp.allclose(y_f32, y_ref, rtol=1e-2, atol=1e-2), (
        float(jnp.max(jnp.abs(y_f32 - y_ref))))

    # Default path: bf16 MXU operands (f32 accumulation) -> looser tolerance
    # (operand quantization of a two-conv chain; not a kernel bug).
    y = jax.block_until_ready(residual_block_pallas(x, folded))
    assert y.shape == (N, OUT_C, HW, HW), y.shape
    assert jnp.allclose(y, y_ref, rtol=2e-2, atol=2e-2), (
        float(jnp.max(jnp.abs(y - y_ref))))

    print("KERNEL_OK")
</pallas_src>

<mosaic_0001>
module attributes {stable_mosaic.version = 11 : i64} {
  func.func @_resblock_kernel(%arg0: i32, %arg1: memref<1x18x18x4xf32, #tpu.memory_space<vmem>>, %arg2: memref<9x4x8xf32, #tpu.memory_space<vmem>>, %arg3: memref<1x8xf32, #tpu.memory_space<vmem>>, %arg4: memref<1x8xf32, #tpu.memory_space<vmem>>, %arg5: memref<9x8x8xf32, #tpu.memory_space<vmem>>, %arg6: memref<1x8xf32, #tpu.memory_space<vmem>>, %arg7: memref<1x8xf32, #tpu.memory_space<vmem>>, %arg8: memref<4x8xf32, #tpu.memory_space<vmem>>, %arg9: memref<1x8xf32, #tpu.memory_space<vmem>>, %arg10: memref<1x8xf32, #tpu.memory_space<vmem>>, %arg11: memref<1x256x8xf32, #tpu.memory_space<vmem>>, %arg12: memref<18x18x4xf32, #tpu.memory_space<vmem>>, %arg13: memref<18x18x8xf32, #tpu.memory_space<vmem>>) attributes {dimension_semantics = [#tpu.dimension_semantics<parallel>], iteration_bounds = array<i64: 2>, scalar_prefetch = 0 : i64, scratch_operands = 2 : i64, tpu.core_type = #tpu.core_type<tc>, window_params = [{transform_indices = @transform_0, window_bounds = array<i64: 1, 18, 18, 4>}, {pipeline_mode = #tpu.pipeline_mode<synchronous>, transform_indices = @transform_1, window_bounds = array<i64: 9, 4, 8>}, {pipeline_mode = #tpu.pipeline_mode<synchronous>, transform_indices = @transform_2, window_bounds = array<i64: 1, 8>}, {pipeline_mode = #tpu.pipeline_mode<synchronous>, transform_indices = @transform_3, window_bounds = array<i64: 1, 8>}, {pipeline_mode = #tpu.pipeline_mode<synchronous>, transform_indices = @transform_4, window_bounds = array<i64: 9, 8, 8>}, {pipeline_mode = #tpu.pipeline_mode<synchronous>, transform_indices = @transform_5, window_bounds = array<i64: 1, 8>}, {pipeline_mode = #tpu.pipeline_mode<synchronous>, transform_indices = @transform_6, window_bounds = array<i64: 1, 8>}, {pipeline_mode = #tpu.pipeline_mode<synchronous>, transform_indices = @transform_7, window_bounds = array<i64: 4, 8>}, {pipeline_mode = #tpu.pipeline_mode<synchronous>, transform_indices = @transform_8, window_bounds = array<i64: 1, 8>}, {pipeline_mode = #tpu.pipeline_mode<synchronous>, transform_indices = @transform_9, window_bounds = array<i64: 1, 8>}, {transform_indices = @transform_10, window_bounds = array<i64: 1, 256, 8>}]} {
    %c0 = arith.constant 0 : index
    %c0_0 = arith.constant 0 : index
    %c0_1 = arith.constant 0 : index
    %c0_2 = arith.constant 0 : index
    %0 = vector.load %arg1[%c0, %c0_0, %c0_1, %c0_2] : memref<1x18x18x4xf32, #tpu.memory_space<vmem>>, vector<1x18x18x4xf32>
    %1 = vector.shape_cast %0 : vector<1x18x18x4xf32> to vector<18x18x4xf32>
    %c0_3 = arith.constant 0 : index
    %c0_4 = arith.constant 0 : index
    %c0_5 = arith.constant 0 : index
    %2 = vector.load %arg12[%c0_3, %c0_4, %c0_5] : memref<18x18x4xf32, #tpu.memory_space<vmem>>, vector<18x18x4xf32>
    tpu.vector_store %arg12[%c0_3, %c0_4, %c0_5], %1 {strides = array<i32>} : memref<18x18x4xf32, #tpu.memory_space<vmem>>, vector<18x18x4xf32>,
    %cst = arith.constant 0.000000e+00 : f32
    %3 = vector.broadcast %cst : f32 to vector<256x8xf32>
    %c0_6 = arith.constant 0 : index
    %c0_7 = arith.constant 0 : index
    %c0_8 = arith.constant 0 : index
    %4 = vector.load %arg12[%c0_6, %c0_7, %c0_8] : memref<18x18x4xf32, #tpu.memory_space<vmem>>, vector<16x16x4xf32>
    %5 = vector.shape_cast %4 : vector<16x16x4xf32> to vector<256x4xf32>
    %c0_9 = arith.constant 0 : index
    %c0_10 = arith.constant 0 : index
    %c0_11 = arith.constant 0 : index
    %6 = vector.load %arg2[%c0_9, %c0_10, %c0_11] : memref<9x4x8xf32, #tpu.memory_space<vmem>>, vector<1x4x8xf32>
    %7 = vector.shape_cast %6 : vector<1x4x8xf32> to vector<4x8xf32>
    %cst_12 = arith.constant dense<0.000000e+00> : vector<256x8xf32>
    %8 = tpu.matmul %5, %7, %cst_12 {dimension_numbers = #tpu.dot_dimension_numbers<[1], [0], [0], [1], [0, 0, 1, 1], [], []>} : vector<256x4xf32>, vector<4x8xf32>, vector<256x8xf32> -> vector<256x8xf32>
    %9 = arith.addf %3, %8 : vector<256x8xf32>
    %c0_13 = arith.constant 0 : index
    %c1 = arith.constant 1 : index
    %c0_14 = arith.constant 0 : index
    %10 = vector.load %arg12[%c0_13, %c1, %c0_14] : memref<18x18x4xf32, #tpu.memory_space<vmem>>, vector<16x16x4xf32>
    %11 = vector.shape_cast %10 : vector<16x16x4xf32> to vector<256x4xf32>
    %c1_15 = arith.constant 1 : index
    %c0_16 = arith.constant 0 : index
    %c0_17 = arith.constant 0 : index
    %12 = vector.load %arg2[%c1_15, %c0_16, %c0_17] : memref<9x4x8xf32, #tpu.memory_space<vmem>>, vector<1x4x8xf32>
    %13 = vector.shape_cast %12 : vector<1x4x8xf32> to vector<4x8xf32>
    %cst_18 = arith.constant dense<0.000000e+00> : vector<256x8xf32>
    %14 = tpu.matmul %11, %13, %cst_18 {dimension_numbers = #tpu.dot_dimension_numbers<[1], [0], [0], [1], [0, 0, 1, 1], [], []>} : vector<256x4xf32>, vector<4x8xf32>, vector<256x8xf32> -> vector<256x8xf32>
    %15 = arith.addf %9, %14 : vector<256x8xf32>
    %c0_19 = arith.constant 0 : index
    %c2 = arith.constant 2 : index
    %c0_20 = arith.constant 0 : index
    %16 = vector.load %arg12[%c0_19, %c2, %c0_20] : memref<18x18x4xf32, #tpu.memory_space<vmem>>, vector<16x16x4xf32>
    %17 = vector.shape_cast %16 : vector<16x16x4xf32> to vector<256x4xf32>
    %c2_21 = arith.constant 2 : index
    %c0_22 = arith.constant 0 : index
    %c0_23 = arith.constant 0 : index
    %18 = vector.load %arg2[%c2_21, %c0_22, %c0_23] : memref<9x4x8xf32, #tpu.memory_space<vmem>>, vector<1x4x8xf32>
    %19 = vector.shape_cast %18 : vector<1x4x8xf32> to vector<4x8xf32>
    %cst_24 = arith.constant dense<0.000000e+00> : vector<256x8xf32>
    %20 = tpu.matmul %17, %19, %cst_24 {dimension_numbers = #tpu.dot_dimension_numbers<[1], [0], [0], [1], [0, 0, 1, 1], [], []>} : vector<256x4xf32>, vector<4x8xf32>, vector<256x8xf32> -> vector<256x8xf32>
    %21 = arith.addf %15, %20 : vector<256x8xf32>
    %c1_25 = arith.constant 1 : index
    %c0_26 = arith.constant 0 : index
    %c0_27 = arith.constant 0 : index
    %22 = vector.load %arg12[%c1_25, %c0_26, %c0_27] : memref<18x18x4xf32, #tpu.memory_space<vmem>>, vector<16x16x4xf32>
    %23 = vector.shape_cast %22 : vector<16x16x4xf32> to vector<256x4xf32>
    %c3 = arith.constant 3 : index
    %c0_28 = arith.constant 0 : index
    %c0_29 = arith.constant 0 : index
    %24 = vector.load %arg2[%c3, %c0_28, %c0_29] : memref<9x4x8xf32, #tpu.memory_space<vmem>>, vector<1x4x8xf32>
    %25 = vector.shape_cast %24 : vector<1x4x8xf32> to vector<4x8xf32>
    %cst_30 = arith.constant dense<0.000000e+00> : vector<256x8xf32>
    %26 = tpu.matmul %23, %25, %cst_30 {dimension_numbers = #tpu.dot_dimension_numbers<[1], [0], [0], [1], [0, 0, 1, 1], [], []>} : vector<256x4xf32>, vector<4x8xf32>, vector<256x8xf32> -> vector<256x8xf32>
    %27 = arith.addf %21, %26 : vector<256x8xf32>
    %c1_31 = arith.constant 1 : index
    %c1_32 = arith.constant 1 : index
    %c0_33 = arith.constant 0 : index
    %28 = vector.load %arg12[%c1_31, %c1_32, %c0_33] : memref<18x18x4xf32, #tpu.memory_space<vmem>>, vector<16x16x4xf32>
    %29 = vector.shape_cast %28 : vector<16x16x4xf32> to vector<256x4xf32>
    %c4 = arith.constant 4 : index
    %c0_34 = arith.constant 0 : index
    %c0_35 = arith.constant 0 : index
    %30 = vector.load %arg2[%c4, %c0_34, %c0_35] : memref<9x4x8xf32, #tpu.memory_space<vmem>>, vector<1x4x8xf32>
    %31 = vector.shape_cast %30 : vector<1x4x8xf32> to vector<4x8xf32>
    %cst_36 = arith.constant dense<0.000000e+00> : vector<256x8xf32>
    %32 = tpu.matmul %29, %31, %cst_36 {dimension_numbers = #tpu.dot_dimension_numbers<[1], [0], [0], [1], [0, 0, 1, 1], [], []>} : vector<256x4xf32>, vector<4x8xf32>, vector<256x8xf32> -> vector<256x8xf32>
    %33 = arith.addf %27, %32 : vector<256x8xf32>
    %c1_37 = arith.constant 1 : index
    %c2_38 = arith.constant 2 : index
    %c0_39 = arith.constant 0 : index
    %34 = vector.load %arg12[%c1_37, %c2_38, %c0_39] : memref<18x18x4xf32, #tpu.memory_space<vmem>>, vector<16x16x4xf32>
    %35 = vector.shape_cast %34 : vector<16x16x4xf32> to vector<256x4xf32>
    %c5 = arith.constant 5 : index
    %c0_40 = arith.constant 0 : index
    %c0_41 = arith.constant 0 : index
    %36 = vector.load %arg2[%c5, %c0_40, %c0_41] : memref<9x4x8xf32, #tpu.memory_space<vmem>>, vector<1x4x8xf32>
    %37 = vector.shape_cast %36 : vector<1x4x8xf32> to vector<4x8xf32>
    %cst_42 = arith.constant dense<0.000000e+00> : vector<256x8xf32>
    %38 = tpu.matmul %35, %37, %cst_42 {dimension_numbers = #tpu.dot_dimension_numbers<[1], [0], [0], [1], [0, 0, 1, 1], [], []>} : vector<256x4xf32>, vector<4x8xf32>, vector<256x8xf32> -> vector<256x8xf32>
    %39 = arith.addf %33, %38 : vector<256x8xf32>
    %c2_43 = arith.constant 2 : index
    %c0_44 = arith.constant 0 : index
    %c0_45 = arith.constant 0 : index
    %40 = vector.load %arg12[%c2_43, %c0_44, %c0_45] : memref<18x18x4xf32, #tpu.memory_space<vmem>>, vector<16x16x4xf32>
    %41 = vector.shape_cast %40 : vector<16x16x4xf32> to vector<256x4xf32>
    %c6 = arith.constant 6 : index
    %c0_46 = arith.constant 0 : index
    %c0_47 = arith.constant 0 : index
    %42 = vector.load %arg2[%c6, %c0_46, %c0_47] : memref<9x4x8xf32, #tpu.memory_space<vmem>>, vector<1x4x8xf32>
    %43 = vector.shape_cast %42 : vector<1x4x8xf32> to vector<4x8xf32>
    %cst_48 = arith.constant dense<0.000000e+00> : vector<256x8xf32>
    %44 = tpu.matmul %41, %43, %cst_48 {dimension_numbers = #tpu.dot_dimension_numbers<[1], [0], [0], [1], [0, 0, 1, 1], [], []>} : vector<256x4xf32>, vector<4x8xf32>, vector<256x8xf32> -> vector<256x8xf32>
    %45 = arith.addf %39, %44 : vector<256x8xf32>
    %c2_49 = arith.constant 2 : index
    %c1_50 = arith.constant 1 : index
    %c0_51 = arith.constant 0 : index
    %46 = vector.load %arg12[%c2_49, %c1_50, %c0_51] : memref<18x18x4xf32, #tpu.memory_space<vmem>>, vector<16x16x4xf32>
    %47 = vector.shape_cast %46 : vector<16x16x4xf32> to vector<256x4xf32>
    %c7 = arith.constant 7 : index
    %c0_52 = arith.constant 0 : index
    %c0_53 = arith.constant 0 : index
    %48 = vector.load %arg2[%c7, %c0_52, %c0_53] : memref<9x4x8xf32, #tpu.memory_space<vmem>>, vector<1x4x8xf32>
    %49 = vector.shape_cast %48 : vector<1x4x8xf32> to vector<4x8xf32>
    %cst_54 = arith.constant dense<0.000000e+00> : vector<256x8xf32>
    %50 = tpu.matmul %47, %49, %cst_54 {dimension_numbers = #tpu.dot_dimension_numbers<[1], [0], [0], [1], [0, 0, 1, 1], [], []>} : vector<256x4xf32>, vector<4x8xf32>, vector<256x8xf32> -> vector<256x8xf32>
    %51 = arith.addf %45, %50 : vector<256x8xf32>
    %c2_55 = arith.constant 2 : index
    %c2_56 = arith.constant 2 : index
    %c0_57 = arith.constant 0 : index
    %52 = vector.load %arg12[%c2_55, %c2_56, %c0_57] : memref<18x18x4xf32, #tpu.memory_space<vmem>>, vector<16x16x4xf32>
    %53 = vector.shape_cast %52 : vector<16x16x4xf32> to vector<256x4xf32>
    %c8 = arith.constant 8 : index
    %c0_58 = arith.constant 0 : index
    %c0_59 = arith.constant 0 : index
    %54 = vector.load %arg2[%c8, %c0_58, %c0_59] : memref<9x4x8xf32, #tpu.memory_space<vmem>>, vector<1x4x8xf32>
    %55 = vector.shape_cast %54 : vector<1x4x8xf32> to vector<4x8xf32>
    %cst_60 = arith.constant dense<0.000000e+00> : vector<256x8xf32>
    %56 = tpu.matmul %53, %55, %cst_60 {dimension_numbers = #tpu.dot_dimension_numbers<[1], [0], [0], [1], [0, 0, 1, 1], [], []>} : vector<256x4xf32>, vector<4x8xf32>, vector<256x8xf32> -> vector<256x8xf32>
    %57 = arith.addf %51, %56 : vector<256x8xf32>
    %c0_61 = arith.constant 0 : index
    %c0_62 = arith.constant 0 : index
    %58 = vector.load %arg3[%c0_61, %c0_62] : memref<1x8xf32, #tpu.memory_space<vmem>>, vector<1x8xf32>
    %59 = vector.broadcast %58 : vector<1x8xf32> to vector<256x8xf32>
    %60 = arith.mulf %57, %59 : vector<256x8xf32>
    %c0_63 = arith.constant 0 : index
    %c0_64 = arith.constant 0 : index
    %61 = vector.load %arg4[%c0_63, %c0_64] : memref<1x8xf32, #tpu.memory_space<vmem>>, vector<1x8xf32>
    %62 = vector.broadcast %61 : vector<1x8xf32> to vector<256x8xf32>
    %63 = arith.addf %60, %62 : vector<256x8xf32>
    %cst_65 = arith.constant 0.000000e+00 : f32
    %64 = vector.broadcast %cst_65 : f32 to vector<256x8xf32>
    %65 = arith.maximumf %63, %64 : vector<256x8xf32>
    %c0_66 = arith.constant 0 : index
    %c0_67 = arith.constant 0 : index
    %66 = vector.load %arg8[%c0_66, %c0_67] : memref<4x8xf32, #tpu.memory_space<vmem>>, vector<4x8xf32>
    %cst_68 = arith.constant dense<0.000000e+00> : vector<256x8xf32>
    %67 = tpu.matmul %29, %66, %cst_68 {dimension_numbers = #tpu.dot_dimension_numbers<[1], [0], [0], [1], [0, 0, 1, 1], [], []>} : vector<256x4xf32>, vector<4x8xf32>, vector<256x8xf32> -> vector<256x8xf32>
    %c0_69 = arith.constant 0 : index
    %c0_70 = arith.constant 0 : index
    %68 = vector.load %arg9[%c0_69, %c0_70] : memref<1x8xf32, #tpu.memory_space<vmem>>, vector<1x8xf32>
    %69 = vector.broadcast %68 : vector<1x8xf32> to vector<256x8xf32>
    %70 = arith.mulf %67, %69 : vector<256x8xf32>
    %c0_71 = arith.constant 0 : index
    %c0_72 = arith.constant 0 : index
    %71 = vector.load %arg10[%c0_71, %c0_72] : memref<1x8xf32, #tpu.memory_space<vmem>>, vector<1x8xf32>
    %72 = vector.broadcast %71 : vector<1x8xf32> to vector<256x8xf32>
    %73 = arith.addf %70, %72 : vector<256x8xf32>
    %cst_73 = arith.constant 0.000000e+00 : f32
    %74 = vector.broadcast %cst_73 : f32 to vector<18x18x8xf32>
    %c0_74 = arith.constant 0 : index
    %c0_75 = arith.constant 0 : index
    %c0_76 = arith.constant 0 : index
    %75 = vector.load %arg13[%c0_74, %c0_75, %c0_76] : memref<18x18x8xf32, #tpu.memory_space<vmem>>, vector<18x18x8xf32>
    tpu.vector_store %arg13[%c0_74, %c0_75, %c0_76], %74 {strides = array<i32>} : memref<18x18x8xf32, #tpu.memory_space<vmem>>, vector<18x18x8xf32>,
    %76 = vector.shape_cast %65 : vector<256x8xf32> to vector<16x16x8xf32>
    %c1_77 = arith.constant 1 : index
    %c1_78 = arith.constant 1 : index
    %c0_79 = arith.constant 0 : index
    %77 = vector.load %arg13[%c1_77, %c1_78, %c0_79] : memref<18x18x8xf32, #tpu.memory_space<vmem>>, vector<16x16x8xf32>
    tpu.vector_store %arg13[%c1_77, %c1_78, %c0_79], %76 {strides = array<i32>} : memref<18x18x8xf32, #tpu.memory_space<vmem>>, vector<16x16x8xf32>,
    %cst_80 = arith.constant 0.000000e+00 : f32
    %78 = vector.broadcast %cst_80 : f32 to vector<256x8xf32>
    %c0_81 = arith.constant 0 : index
    %c0_82 = arith.constant 0 : index
    %c0_83 = arith.constant 0 : index
    %79 = vector.load %arg13[%c0_81, %c0_82, %c0_83] : memref<18x18x8xf32, #tpu.memory_space<vmem>>, vector<16x16x8xf32>
    %80 = vector.shape_cast %79 : vector<16x16x8xf32> to vector<256x8xf32>
    %c0_84 = arith.constant 0 : index
    %c0_85 = arith.constant 0 : index
    %c0_86 = arith.constant 0 : index
    %81 = vector.load %arg5[%c0_84, %c0_85, %c0_86] : memref<9x8x8xf32, #tpu.memory_space<vmem>>, vector<1x8x8xf32>
    %82 = vector.shape_cast %81 : vector<1x8x8xf32> to vector<8x8xf32>
    %cst_87 = arith.constant dense<0.000000e+00> : vector<256x8xf32>
    %83 = tpu.matmul %80, %82, %cst_87 {dimension_numbers = #tpu.dot_dimension_numbers<[1], [0], [0], [1], [0, 0, 1, 1], [], []>} : vector<256x8xf32>, vector<8x8xf32>, vector<256x8xf32> -> vector<256x8xf32>
    %84 = arith.addf %78, %83 : vector<256x8xf32>
    %c0_88 = arith.constant 0 : index
    %c1_89 = arith.constant 1 : index
    %c0_90 = arith.constant 0 : index
    %85 = vector.load %arg13[%c0_88, %c1_89, %c0_90] : memref<18x18x8xf32, #tpu.memory_space<vmem>>, vector<16x16x8xf32>
    %86 = vector.shape_cast %85 : vector<16x16x8xf32> to vector<256x8xf32>
    %c1_91 = arith.constant 1 : index
    %c0_92 = arith.constant 0 : index
    %c0_93 = arith.constant 0 : index
    %87 = vector.load %arg5[%c1_91, %c0_92, %c0_93] : memref<9x8x8xf32, #tpu.memory_space<vmem>>, vector<1x8x8xf32>
    %88 = vector.shape_cast %87 : vector<1x8x8xf32> to vector<8x8xf32>
    %cst_94 = arith.constant dense<0.000000e+00> : vector<256x8xf32>
    %89 = tpu.matmul %86, %88, %cst_94 {dimension_numbers = #tpu.dot_dimension_numbers<[1], [0], [0], [1], [0, 0, 1, 1], [], []>} : vector<256x8xf32>, vector<8x8xf32>, vector<256x8xf32> -> vector<256x8xf32>
    %90 = arith.addf %84, %89 : vector<256x8xf32>
    %c0_95 = arith.constant 0 : index
    %c2_96 = arith.constant 2 : index
    %c0_97 = arith.constant 0 : index
    %91 = vector.load %arg13[%c0_95, %c2_96, %c0_97] : memref<18x18x8xf32, #tpu.memory_space<vmem>>, vector<16x16x8xf32>
    %92 = vector.shape_cast %91 : vector<16x16x8xf32> to vector<256x8xf32>
    %c2_98 = arith.constant 2 : index
    %c0_99 = arith.constant 0 : index
    %c0_100 = arith.constant 0 : index
    %93 = vector.load %arg5[%c2_98, %c0_99, %c0_100] : memref<9x8x8xf32, #tpu.memory_space<vmem>>, vector<1x8x8xf32>
    %94 = vector.shape_cast %93 : vector<1x8x8xf32> to vector<8x8xf32>
    %cst_101 = arith.constant dense<0.000000e+00> : vector<256x8xf32>
    %95 = tpu.matmul %92, %94, %cst_101 {dimension_numbers = #tpu.dot_dimension_numbers<[1], [0], [0], [1], [0, 0, 1, 1], [], []>} : vector<256x8xf32>, vector<8x8xf32>, vector<256x8xf32> -> vector<256x8xf32>
    %96 = arith.addf %90, %95 : vector<256x8xf32>
    %c1_102 = arith.constant 1 : index
    %c0_103 = arith.constant 0 : index
    %c0_104 = arith.constant 0 : index
    %97 = vector.load %arg13[%c1_102, %c0_103, %c0_104] : memref<18x18x8xf32, #tpu.memory_space<vmem>>, vector<16x16x8xf32>
    %98 = vector.shape_cast %97 : vector<16x16x8xf32> to vector<256x8xf32>
    %c3_105 = arith.constant 3 : index
    %c0_106 = arith.constant 0 : index
    %c0_107 = arith.constant 0 : index
    %99 = vector.load %arg5[%c3_105, %c0_106, %c0_107] : memref<9x8x8xf32, #tpu.memory_space<vmem>>, vector<1x8x8xf32>
    %100 = vector.shape_cast %99 : vector<1x8x8xf32> to vector<8x8xf32>
    %cst_108 = arith.constant dense<0.000000e+00> : vector<256x8xf32>
    %101 = tpu.matmul %98, %100, %cst_108 {dimension_numbers = #tpu.dot_dimension_numbers<[1], [0], [0], [1], [0, 0, 1, 1], [], []>} : vector<256x8xf32>, vector<8x8xf32>, vector<256x8xf32> -> vector<256x8xf32>
    %102 = arith.addf %96, %101 : vector<256x8xf32>
    %c1_109 = arith.constant 1 : index
    %c1_110 = arith.constant 1 : index
    %c0_111 = arith.constant 0 : index
    %103 = vector.load %arg13[%c1_109, %c1_110, %c0_111] : memref<18x18x8xf32, #tpu.memory_space<vmem>>, vector<16x16x8xf32>
    %104 = vector.shape_cast %103 : vector<16x16x8xf32> to vector<256x8xf32>
    %c4_112 = arith.constant 4 : index
    %c0_113 = arith.constant 0 : index
    %c0_114 = arith.constant 0 : index
    %105 = vector.load %arg5[%c4_112, %c0_113, %c0_114] : memref<9x8x8xf32, #tpu.memory_space<vmem>>, vector<1x8x8xf32>
    %106 = vector.shape_cast %105 : vector<1x8x8xf32> to vector<8x8xf32>
    %cst_115 = arith.constant dense<0.000000e+00> : vector<256x8xf32>
    %107 = tpu.matmul %104, %106, %cst_115 {dimension_numbers = #tpu.dot_dimension_numbers<[1], [0], [0], [1], [0, 0, 1, 1], [], []>} : vector<256x8xf32>, vector<8x8xf32>, vector<256x8xf32> -> vector<256x8xf32>
    %108 = arith.addf %102, %107 : vector<256x8xf32>
    %c1_116 = arith.constant 1 : index
    %c2_117 = arith.constant 2 : index
    %c0_118 = arith.constant 0 : index
    %109 = vector.load %arg13[%c1_116, %c2_117, %c0_118] : memref<18x18x8xf32, #tpu.memory_space<vmem>>, vector<16x16x8xf32>
    %110 = vector.shape_cast %109 : vector<16x16x8xf32> to vector<256x8xf32>
    %c5_119 = arith.constant 5 : index
    %c0_120 = arith.constant 0 : index
    %c0_121 = arith.constant 0 : index
    %111 = vector.load %arg5[%c5_119, %c0_120, %c0_121] : memref<9x8x8xf32, #tpu.memory_space<vmem>>, vector<1x8x8xf32>
    %112 = vector.shape_cast %111 : vector<1x8x8xf32> to vector<8x8xf32>
    %cst_122 = arith.constant dense<0.000000e+00> : vector<256x8xf32>
    %113 = tpu.matmul %110, %112, %cst_122 {dimension_numbers = #tpu.dot_dimension_numbers<[1], [0], [0], [1], [0, 0, 1, 1], [], []>} : vector<256x8xf32>, vector<8x8xf32>, vector<256x8xf32> -> vector<256x8xf32>
    %114 = arith.addf %108, %113 : vector<256x8xf32>
    %c2_123 = arith.constant 2 : index
    %c0_124 = arith.constant 0 : index
    %c0_125 = arith.constant 0 : index
    %115 = vector.load %arg13[%c2_123, %c0_124, %c0_125] : memref<18x18x8xf32, #tpu.memory_space<vmem>>, vector<16x16x8xf32>
    %116 = vector.shape_cast %115 : vector<16x16x8xf32> to vector<256x8xf32>
    %c6_126 = arith.constant 6 : index
    %c0_127 = arith.constant 0 : index
    %c0_128 = arith.constant 0 : index
    %117 = vector.load %arg5[%c6_126, %c0_127, %c0_128] : memref<9x8x8xf32, #tpu.memory_space<vmem>>, vector<1x8x8xf32>
    %118 = vector.shape_cast %117 : vector<1x8x8xf32> to vector<8x8xf32>
    %cst_129 = arith.constant dense<0.000000e+00> : vector<256x8xf32>
    %119 = tpu.matmul %116, %118, %cst_129 {dimension_numbers = #tpu.dot_dimension_numbers<[1], [0], [0], [1], [0, 0, 1, 1], [], []>} : vector<256x8xf32>, vector<8x8xf32>, vector<256x8xf32> -> vector<256x8xf32>
    %120 = arith.addf %114, %119 : vector<256x8xf32>
    %c2_130 = arith.constant 2 : index
    %c1_131 = arith.constant 1 : index
    %c0_132 = arith.constant 0 : index
    %121 = vector.load %arg13[%c2_130, %c1_131, %c0_132] : memref<18x18x8xf32, #tpu.memory_space<vmem>>, vector<16x16x8xf32>
    %122 = vector.shape_cast %121 : vector<16x16x8xf32> to vector<256x8xf32>
    %c7_133 = arith.constant 7 : index
    %c0_134 = arith.constant 0 : index
    %c0_135 = arith.constant 0 : index
    %123 = vector.load %arg5[%c7_133, %c0_134, %c0_135] : memref<9x8x8xf32, #tpu.memory_space<vmem>>, vector<1x8x8xf32>
    %124 = vector.shape_cast %123 : vector<1x8x8xf32> to vector<8x8xf32>
    %cst_136 = arith.constant dense<0.000000e+00> : vector<256x8xf32>
    %125 = tpu.matmul %122, %124, %cst_136 {dimension_numbers = #tpu.dot_dimension_numbers<[1], [0], [0], [1], [0, 0, 1, 1], [], []>} : vector<256x8xf32>, vector<8x8xf32>, vector<256x8xf32> -> vector<256x8xf32>
    %126 = arith.addf %120, %125 : vector<256x8xf32>
    %c2_137 = arith.constant 2 : index
    %c2_138 = arith.constant 2 : index
    %c0_139 = arith.constant 0 : index
    %127 = vector.load %arg13[%c2_137, %c2_138, %c0_139] : memref<18x18x8xf32, #tpu.memory_space<vmem>>, vector<16x16x8xf32>
    %128 = vector.shape_cast %127 : vector<16x16x8xf32> to vector<256x8xf32>
    %c8_140 = arith.constant 8 : index
    %c0_141 = arith.constant 0 : index
    %c0_142 = arith.constant 0 : index
    %129 = vector.load %arg5[%c8_140, %c0_141, %c0_142] : memref<9x8x8xf32, #tpu.memory_space<vmem>>, vector<1x8x8xf32>
    %130 = vector.shape_cast %129 : vector<1x8x8xf32> to vector<8x8xf32>
    %cst_143 = arith.constant dense<0.000000e+00> : vector<256x8xf32>
    %131 = tpu.matmul %128, %130, %cst_143 {dimension_numbers = #tpu.dot_dimension_numbers<[1], [0], [0], [1], [0, 0, 1, 1], [], []>} : vector<256x8xf32>, vector<8x8xf32>, vector<256x8xf32> -> vector<256x8xf32>
    %132 = arith.addf %126, %131 : vector<256x8xf32>
    %c0_144 = arith.constant 0 : index
    %c0_145 = arith.constant 0 : index
    %133 = vector.load %arg6[%c0_144, %c0_145] : memref<1x8xf32, #tpu.memory_space<vmem>>, vector<1x8xf32>
    %134 = vector.broadcast %133 : vector<1x8xf32> to vector<256x8xf32>
    %135 = arith.mulf %132, %134 : vector<256x8xf32>
    %c0_146 = arith.constant 0 : index
    %c0_147 = arith.constant 0 : index
    %136 = vector.load %arg7[%c0_146, %c0_147] : memref<1x8xf32, #tpu.memory_space<vmem>>, vector<1x8xf32>
    %137 = vector.broadcast %136 : vector<1x8xf32> to vector<256x8xf32>
    %138 = arith.addf %135, %137 : vector<256x8xf32>
    %139 = arith.addf %138, %73 : vector<256x8xf32>
    %cst_148 = arith.constant 0.000000e+00 : f32
    %140 = vector.broadcast %cst_148 : f32 to vector<256x8xf32>
    %141 = arith.maximumf %139, %140 : vector<256x8xf32>
    %c0_149 = arith.constant 0 : index
    %c0_150 = arith.constant 0 : index
    %c0_151 = arith.constant 0 : index
    %142 = vector.load %arg11[%c0_149, %c0_150, %c0_151] : memref<1x256x8xf32, #tpu.memory_space<vmem>>, vector<1x256x8xf32>
    %143 = vector.shape_cast %142 : vector<1x256x8xf32> to vector<256x8xf32>
    %144 = vector.shape_cast %141 : vector<256x8xf32> to vector<1x256x8xf32>
    tpu.vector_store %arg11[%c0_149, %c0_150, %c0_151], %144 {strides = array<i32>} : memref<1x256x8xf32, #tpu.memory_space<vmem>>, vector<1x256x8xf32>,
    return
  }
  func.func @transform_0(%arg0: i32) -> (i32, i32, i32, i32) {
    %c0_i32 = arith.constant 0 : i32
    %c0_i32_0 = arith.constant 0 : i32
    %c0_i32_1 = arith.constant 0 : i32
    %c0_i32_2 = arith.constant 0 : i32
    return %arg0, %c0_i32, %c0_i32_0, %c0_i32_1 : i32, i32, i32, i32
  }
  func.func @transform_1(%arg0: i32) -> (i32, i32, i32) {
    %c0_i32 = arith.constant 0 : i32
    %c0_i32_0 = arith.constant 0 : i32
    %c0_i32_1 = arith.constant 0 : i32
    %c0_i32_2 = arith.constant 0 : i32
    return %c0_i32, %c0_i32_0, %c0_i32_1 : i32, i32, i32
  }
  func.func @transform_2(%arg0: i32) -> (i32, i32) {
    %c0_i32 = arith.constant 0 : i32
    %c0_i32_0 = arith.constant 0 : i32
    %c0_i32_1 = arith.constant 0 : i32
    return %c0_i32, %c0_i32_0 : i32, i32
  }
  func.func @transform_3(%arg0: i32) -> (i32, i32) {
    %c0_i32 = arith.constant 0 : i32
    %c0_i32_0 = arith.constant 0 : i32
    %c0_i32_1 = arith.constant 0 : i32
    return %c0_i32, %c0_i32_0 : i32, i32
  }
  func.func @transform_4(%arg0: i32) -> (i32, i32, i32) {
    %c0_i32 = arith.constant 0 : i32
    %c0_i32_0 = arith.constant 0 : i32
    %c0_i32_1 = arith.constant 0 : i32
    %c0_i32_2 = arith.constant 0 : i32
    return %c0_i32, %c0_i32_0, %c0_i32_1 : i32, i32, i32
  }
  func.func @transform_5(%arg0: i32) -> (i32, i32) {
    %c0_i32 = arith.constant 0 : i32
    %c0_i32_0 = arith.constant 0 : i32
    %c0_i32_1 = arith.constant 0 : i32
    return %c0_i32, %c0_i32_0 : i32, i32
  }
  func.func @transform_6(%arg0: i32) -> (i32, i32) {
    %c0_i32 = arith.constant 0 : i32
    %c0_i32_0 = arith.constant 0 : i32
    %c0_i32_1 = arith.constant 0 : i32
    return %c0_i32, %c0_i32_0 : i32, i32
  }
  func.func @transform_7(%arg0: i32) -> (i32, i32) {
    %c0_i32 = arith.constant 0 : i32
    %c0_i32_0 = arith.constant 0 : i32
    %c0_i32_1 = arith.constant 0 : i32
    return %c0_i32, %c0_i32_0 : i32, i32
  }
  func.func @transform_8(%arg0: i32) -> (i32, i32) {
    %c0_i32 = arith.constant 0 : i32
    %c0_i32_0 = arith.constant 0 : i32
    %c0_i32_1 = arith.constant 0 : i32
    return %c0_i32, %c0_i32_0 : i32, i32
  }
  func.func @transform_9(%arg0: i32) -> (i32, i32) {
    %c0_i32 = arith.constant 0 : i32
    %c0_i32_0 = arith.constant 0 : i32
    %c0_i32_1 = arith.constant 0 : i32
    return %c0_i32, %c0_i32_0 : i32, i32
  }
  func.func @transform_10(%arg0: i32) -> (i32, i32, i32) {
    %c0_i32 = arith.constant 0 : i32
    %c0_i32_0 = arith.constant 0 : i32
    %c0_i32_1 = arith.constant 0 : i32
    return %arg0, %c0_i32, %c0_i32_0 : i32, i32, i32
  }
}

</mosaic_0001>

<bundles_post_ra>
// kernel: tpu_custom_call.1
= control target key start
LH: loop header
LB: loop body
LE: loop exit
PB: predicated region body
PF: predicated region fallthrough
CT: control target
= control target key end

     0   :  { %s6688_s13 = smov 0   ;;  %s9577_s0 = inlined_call_operand.vmem [shape: f32[2,18,18,4], index: 0, kind: input, shape index: {}]   ;;  %s9578_s1 = inlined_call_operand.vmem [shape: f32[9,4,8], index: 1, kind: input, shape index: {}]   ;;  %s9579_s2 = inlined_call_operand.vmem [shape: f32[1,8], index: 2, kind: input, shape index: {}]   ;;  %s9580_s3 = inlined_call_operand.vmem [shape: f32[1,8], index: 3, kind: input, shape index: {}]   ;;  %s9581_s4 = inlined_call_operand.vmem [shape: f32[9,8,8], index: 4, kind: input, shape index: {}]   ;;  %s9582_s5 = inlined_call_operand.vmem [shape: f32[1,8], index: 5, kind: input, shape index: {}]   ;;  %s9583_s6 = inlined_call_operand.vmem [shape: f32[1,8], index: 6, kind: input, shape index: {}]   ;;  %s9584_s7 = inlined_call_operand.vmem [shape: f32[4,8], index: 7, kind: input, shape index: {}]   ;;  %s9585_s8 = inlined_call_operand.vmem [shape: f32[1,8], index: 8, kind: input, shape index: {}]   ;;  %s9586_s9 = inlined_call_operand.vmem [shape: f32[1,8], index: 9, kind: input, shape index: {}]   ;;  %s9587_s10 = inlined_call_operand.vmem [shape: f32[2,256,8], index: 10, kind: output, shape index: {}]  }
   0x1 LB: > { %s5926_s14 = sadd.s32 4294967295, %s6630_s13   ;;  %p5930_p0 = scmp.ge.s32.totalorder %s6630_s13, 1  ;;  %s6630_s13 = sphi %s6688_s13, %s20_s13  }
   0x2   : > { %p312_p1 = scmp.lt.s32.totalorder %s6630_s13, 3 }
   0x4   : > { %p313_p2 = pnand %p5930_p0, %p312_p1 }
   0x6   : > { %316 = sbr.rel (%p313_p2) target bundleno = 1515 (0x5eb), region = 60 }
   0xb   : > { %v5934_v0 = vld [vmem:[%s9578_s1 + $0x4] sm:$0xf]  ;;  %vm633_vm0 = vcmask 1043456   ;;  %v502_v1 = vld [vmem:[%s9578_s1] sm:$0xf]  ;;  %p350_p3 = scmp.lt.s32.totalorder %s5926_s14, 1 }
   0xc   : > { %5935 = vmatpush.msk.msra.mxu0 %vm633_vm0, %v5934_v0  ;;  %6571 = vmatpush.msk.msra.mxu3 %vm633_vm0, %v5934_v0  ;;  %v6001_v2 = vld [vmem:[%s9578_s1 + $0x8] sm:$0xf]  ;;  %v6069_v3 = vld [vmem:[%s9578_s1 + $0x10] sm:$0xf]  ;;  %vm414_vm1 = vcmask 31744   ;;  %vm417_vm2 = vcmask 25600  }
   0xd   : > { %5968 = vmatpush.msk.msra.mxu1 %vm633_vm0, %v502_v1  ;;  %s10004_s14 = smov (!%p350_p3, %s5926_s14), 1  ;;  %6002 = vmatpush.msk.msra.mxu2 %vm633_vm0, %v6001_v2  ;;  %vm3203_vm3 = vcmask 64512   ;;  %vm3206_vm4 = vcmask 58368  }
   0xe   : > { %6572 = vmatpush.msk.msrb.mxu3 %vm633_vm0, %v502_v1  ;;  %6070 = vmatpush.msk.msrb.mxu0 %vm633_vm0, %v6069_v3  ;;  %s6574_s23 = smul.u32 432, %s10004_s14  ;;  %s6570_s19 = sshll.u32 %s10004_s14, 8 }
   0xf   : > { %s9230_s22 = scalar_lea.vmem %s9587_s10, %s6570_s19 }
  0x10   : > { %s6720_s26 = scalar_lea.vmem %s9577_s0, %s6574_s23 }
  0x11   : > { %v360_v4 = vld [vmem:[%s6720_s26] sm:$0xff]  ;;  %v361_v5 = vld [vmem:[%s6720_s26 + $0x8] sm:$0xff]  ;;  %v362_v8 = vld [vmem:[%s6720_s26 + $0x10] sm:$0x3] }
  0x12   : > { %v396_v6 = vld [vmem:[%s6720_s26 + $0x120] sm:$0xff]  ;;  %415 = vst.msk [vmem:[#allocation2] sm:$0xff] %vm414_vm1, %v360_v4  ;;  %v397_v7 = vld [vmem:[%s6720_s26 + $0x128] sm:$0xff]  ;;  %v398_v9 = vld [vmem:[%s6720_s26 + $0x130] sm:$0x3] }
  0x13   : > { %416 = vst.msk [vmem:[#allocation2 + $0x8] sm:$0xff] %vm414_vm1, %v361_v5  ;;  %v363_v10 = vld [vmem:[%s6720_s26 + $0x18] sm:$0xff]  ;;  %v364_v11 = vld [vmem:[%s6720_s26 + $0x20] sm:$0xff]  ;;  %v365_v15 = vld [vmem:[%s6720_s26 + $0x28] sm:$0x3] }
  0x14   : > { %452 = vst.msk [vmem:[#allocation2 + $0x120] sm:$0xff] %vm414_vm1, %v396_v6  ;;  %v399_v12 = vld [vmem:[%s6720_s26 + $0x138] sm:$0xff]  ;;  %v400_v13 = vld [vmem:[%s6720_s26 + $0x140] sm:$0xff]  ;;  %v401_v18 = vld [vmem:[%s6720_s26 + $0x148] sm:$0x3] }
  0x15   : > { %453 = vst.msk [vmem:[#allocation2 + $0x128] sm:$0xff] %vm414_vm1, %v397_v7  ;;  %v366_v19 = vld [vmem:[%s6720_s26 + $0x30] sm:$0xff]  ;;  %v367_v21 = vld [vmem:[%s6720_s26 + $0x38] sm:$0xff]  ;;  %v368_v25 = vld [vmem:[%s6720_s26 + $0x40] sm:$0x3] }
  0x16   : > { %418 = vst.msk [vmem:[#allocation2 + $0x10] sm:$0x3] %vm417_vm2, %v362_v8  ;;  %v402_v22 = vld [vmem:[%s6720_s26 + $0x150] sm:$0xff]  ;;  %v403_v23 = vld [vmem:[%s6720_s26 + $0x158] sm:$0xff]  ;;  %v404_v28 = vld [vmem:[%s6720_s26 + $0x160] sm:$0x3] }
  0x17   : > { %454 = vst.msk [vmem:[#allocation2 + $0x130] sm:$0x3] %vm417_vm2, %v398_v9  ;;  %v369_v30 = vld [vmem:[%s6720_s26 + $0x48] sm:$0xff]  ;;  %v370_v31 = vld [vmem:[%s6720_s26 + $0x50] sm:$0xff]  ;;  %v371_v38 = vld [vmem:[%s6720_s26 + $0x58] sm:$0x3] }
  0x18   : > { %419 = vst.msk [vmem:[#allocation2 + $0x18] sm:$0xff] %vm414_vm1, %v363_v10  ;;  %v405_v32 = vld [vmem:[%s6720_s26 + $0x168] sm:$0xff]  ;;  %v406_v33 = vld [vmem:[%s6720_s26 + $0x170] sm:$0xff]  ;;  %v407_v39 = vld [vmem:[%s6720_s26 + $0x178] sm:$0x3] }
  0x19   : > { %v470_v14 = vld [vmem:[#allocation2] sm:$0xff]  ;;  %420 = vst.msk [vmem:[#allocation2 + $0x20] sm:$0xff] %vm414_vm1, %v364_v11  ;;  %v373_v45 = vld [vmem:[%s6720_s26 + $0x68] sm:$0xff]  ;;  %v374_v50 = vld [vmem:[%s6720_s26 + $0x70] sm:$0x3] }
  0x1a   : > { %v503_v16 = vld [vmem:[#allocation2 + $0x1] sm:$0xff]  ;;  %5969 = vmatmul.msk.f32.vlgmr.msra.gmra.mxu1 %vm414_vm1, %v470_v14  ;;  %455 = vst.msk [vmem:[#allocation2 + $0x138] sm:$0xff] %vm414_vm1, %v399_v12  ;;  %v375_v55 = vld [vmem:[%s6720_s26 + $0x78] sm:$0xff]  ;;  %v382_v14 = vld [vmem:[%s6720_s26 + $0xb0] sm:$0xff] }
  0x1b   : > { %v962_v17 = vld [vmem:[#allocation2 + $0x2] sm:$0xff]  ;;  %5936 = vmatmul.msk.f32.vlgmr.msra.gmra.mxu0 %vm414_vm1, %v503_v16  ;;  %456 = vst.msk [vmem:[#allocation2 + $0x140] sm:$0xff] %vm414_vm1, %v400_v13  ;;  %v379_v3 = vld [vmem:[%s6720_s26 + $0x98] sm:$0xff]  ;;  %v380_v8 = vld [vmem:[%s6720_s26 + $0xa0] sm:$0x3] }
  0x1c   : > { %6003 = vmatmul.msk.f32.vlgmr.msra.gmra.mxu2 %vm414_vm1, %v962_v17  ;;  %v527_v20 = vld [vmem:[#allocation2 + $0x121] sm:$0xff]  ;;  %421 = vst.msk [vmem:[#allocation2 + $0x28] sm:$0x3] %vm417_vm2, %v365_v15 }
  0x1d   : > { %5960 = vmatmul.msk.f32.vlgmr.msra.gmra.mxu3 %vm414_vm1, %v527_v20  ;;  %457 = vst.msk [vmem:[#allocation2 + $0x148] sm:$0x3] %vm417_vm2, %v401_v18  ;;  %v471_v24 = vld [vmem:[#allocation2 + $0x8] sm:$0xff]  ;;  %v372_v44 = vld [vmem:[%s6720_s26 + $0x60] sm:$0xff] }
  0x1e   : > { %422 = vst.msk [vmem:[#allocation2 + $0x30] sm:$0xff] %vm414_vm1, %v366_v19  ;;  %6573 = vmatpush.msk.msra.mxu3 %vm633_vm0, %v6001_v2  ;;  %v504_v26 = vld [vmem:[#allocation2 + $0x9] sm:$0xff]  ;;  %v376_v56 = vld [vmem:[%s6720_s26 + $0x80] sm:$0xff]  ;;  %v383_v19 = vld [vmem:[%s6720_s26 + $0xb8] sm:$0x3] }
  0x1f   : > { %423 = vst.msk [vmem:[#allocation2 + $0x38] sm:$0xff] %vm414_vm1, %v367_v21  ;;  %v963_v27 = vld [vmem:[#allocation2 + $0xa] sm:$0xff]  ;;  %v6773_v34 = vld [vmem:[#allocation2 + $0x18] sm:$0xff]  ;;  %v377_v61 = vld [vmem:[%s6720_s26 + $0x88] sm:$0x3] }
  0x20   : > { %458 = vst.msk [vmem:[#allocation2 + $0x150] sm:$0xff] %vm414_vm1, %v402_v22  ;;  %v528_v29 = vld [vmem:[#allocation2 + $0x129] sm:$0xff]  ;;  %v6776_v35 = vld [vmem:[#allocation2 + $0x19] sm:$0xff] }
  0x21   : > { %459 = vst.msk [vmem:[#allocation2 + $0x158] sm:$0xff] %vm414_vm1, %v403_v23  ;;  %v6778_v36 = vld [vmem:[#allocation2 + $0x1a] sm:$0xff]  ;;  %v378_v2 = vld [vmem:[%s6720_s26 + $0x90] sm:$0xff]  ;;  %v495_v12 = vld [vmem:[#allocation2 + $0x128] sm:$0xff] }
  0x22   : > { %5970 = vmatmul.msk.f32.gmra.mxu1 %vm414_vm1, %v471_v24  ;;  %424 = vst.msk [vmem:[#allocation2 + $0x40] sm:$0x3] %vm417_vm2, %v368_v25  ;;  %v529_v37 = vld [vmem:[#allocation2 + $0x139] sm:$0xff]  ;;  %v381_v13 = vld [vmem:[%s6720_s26 + $0xa8] sm:$0xff] }
  0x23   : > { %5937 = vmatmul.msk.f32.gmra.mxu0 %vm414_vm1, %v504_v26  ;;  %460 = vst.msk [vmem:[#allocation2 + $0x160] sm:$0x3] %vm417_vm2, %v404_v28  ;;  %v6792_v40 = vld [vmem:[#allocation2 + $0x20] sm:$0xff]  ;;  %v496_v18 = vld [vmem:[#allocation2 + $0x138] sm:$0xff]  ;;  %v385_v25 = vld [vmem:[%s6720_s26 + $0xc8] sm:$0xff] }
  0x24   : > { %6004 = vmatmul.msk.f32.gmra.mxu2 %vm414_vm1, %v963_v27  ;;  %425 = vst.msk [vmem:[#allocation2 + $0x48] sm:$0xff] %vm414_vm1, %v369_v30  ;;  %v6794_v41 = vld [vmem:[#allocation2 + $0x21] sm:$0xff]  ;;  %v386_v30 = vld [vmem:[%s6720_s26 + $0xd0] sm:$0x3] }
  0x25   : > { %5961 = vmatmul.msk.f32.gmra.mxu3 %vm414_vm1, %v528_v29  ;;  %426 = vst.msk [vmem:[#allocation2 + $0x50] sm:$0xff] %vm414_vm1, %v370_v31  ;;  %v6796_v42 = vld [vmem:[#allocation2 + $0x22] sm:$0xff]  ;;  %v6809_v46 = vld [vmem:[#allocation2 + $0x30] sm:$0xff]  ;;  %v6035_v31 = vld [vmem:[%s9578_s1 + $0xc] sm:$0xf] }
  0x26   : > { %461 = vst.msk [vmem:[#allocation2 + $0x168] sm:$0xff] %vm414_vm1, %v405_v32  ;;  %v530_v43 = vld [vmem:[#allocation2 + $0x141] sm:$0xff]  ;;  %v6811_v47 = vld [vmem:[#allocation2 + $0x31] sm:$0xff] }
  0x27   : > { %462 = vst.msk [vmem:[#allocation2 + $0x170] sm:$0xff] %vm414_vm1, %v406_v33  ;;  %v6813_v48 = vld [vmem:[#allocation2 + $0x32] sm:$0xff]  ;;  %v494_v7 = vld [vmem:[#allocation2 + $0x120] sm:$0xff] }
  0x28   : > { %427 = vst.msk [vmem:[#allocation2 + $0x58] sm:$0x3] %vm417_vm2, %v371_v38  ;;  %v531_v49 = vld [vmem:[#allocation2 + $0x151] sm:$0xff]  ;;  %v497_v23 = vld [vmem:[#allocation2 + $0x140] sm:$0xff] }
  0x29   : > { %463 = vst.msk [vmem:[#allocation2 + $0x178] sm:$0x3] %vm417_vm2, %v407_v39  ;;  %v6824_v51 = vld [vmem:[#allocation2 + $0x38] sm:$0xff]  ;;  %v384_v24 = vld [vmem:[%s6720_s26 + $0xc0] sm:$0xff]  ;;  %v498_v29 = vld [vmem:[#allocation2 + $0x150] sm:$0xff] }
  0x2a   : > { %5971 = vmatmul.msk.f32.gmra.mxu1 %vm414_vm1, %v6773_v34  ;;  %428 = vst.msk [vmem:[#allocation2 + $0x60] sm:$0xff] %vm414_vm1, %v372_v44  ;;  %v6826_v52 = vld [vmem:[#allocation2 + $0x39] sm:$0xff] }
  0x2b   : > { %5938 = vmatmul.msk.f32.gmra.mxu0 %vm414_vm1, %v6776_v35  ;;  %429 = vst.msk [vmem:[#allocation2 + $0x68] sm:$0xff] %vm414_vm1, %v373_v45  ;;  %v6828_v53 = vld [vmem:[#allocation2 + $0x3a] sm:$0xff]  ;;  %v6841_v57 = vld [vmem:[#allocation2 + $0x48] sm:$0xff]  ;;  %v6103_v45 = vld [vmem:[%s9578_s1 + $0x14] sm:$0xf] }
  0x2c   : > { %6005 = vmatmul.msk.f32.gmra.mxu2 %vm414_vm1, %v6778_v36  ;;  %430 = vst.msk [vmem:[#allocation2 + $0x70] sm:$0x3] %vm417_vm2, %v374_v50  ;;  %v532_v54 = vld [vmem:[#allocation2 + $0x159] sm:$0xff]  ;;  %v6843_v58 = vld [vmem:[#allocation2 + $0x49] sm:$0xff]  ;;  %6104 = vmatpush.msk.msrb.mxu1 %vm633_vm0, %v6103_v45 }
  0x2d   : > { %5962 = vmatmul.msk.f32.gmra.mxu3 %vm414_vm1, %v529_v37  ;;  %431 = vst.msk [vmem:[#allocation2 + $0x78] sm:$0xff] %vm414_vm1, %v375_v55  ;;  %v6845_v59 = vld [vmem:[#allocation2 + $0x4a] sm:$0xff]  ;;  %v6137_v38 = vld [vmem:[%s9578_s1 + $0x18] sm:$0xf]  ;;  %v388_v44 = vld [vmem:[%s6720_s26 + $0xe0] sm:$0xff] }
  0x2e   : > { %432 = vst.msk [vmem:[#allocation2 + $0x80] sm:$0xff] %vm414_vm1, %v376_v56  ;;  %v533_v60 = vld [vmem:[#allocation2 + $0x169] sm:$0xff]  ;;  %v499_v39 = vld [vmem:[#allocation2 + $0x158] sm:$0xff]  ;;  %6138 = vmatpush.msk.msrb.mxu2 %vm633_vm0, %v6137_v38 }
  0x2f   : > { %433 = vst.msk [vmem:[#allocation2 + $0x88] sm:$0x3] %vm417_vm2, %v377_v61  ;;  %v6856_v62 = vld [vmem:[#allocation2 + $0x50] sm:$0xff]  ;;  %v500_v55 = vld [vmem:[#allocation2 + $0x168] sm:$0xff] }
  0x30   : > { %v6858_v63 = vld [vmem:[#allocation2 + $0x51] sm:$0xff]  ;;  %434 = vst.msk [vmem:[#allocation2 + $0x90] sm:$0xff] %vm414_vm1, %v378_v2  ;;  %v389_v56 = vld [vmem:[%s6720_s26 + $0xe8] sm:$0x3] }
  0x31   : > { %v6860_v0 = vld [vmem:[#allocation2 + $0x52] sm:$0xff]  ;;  %435 = vst.msk [vmem:[#allocation2 + $0x98] sm:$0xff] %vm414_vm1, %v379_v3  ;;  %v6873_v4 = vld [vmem:[#allocation2 + $0x60] sm:$0xff] }
  0x32   : > { %5972 = vmatmul.msk.f32.gmra.mxu1 %vm414_vm1, %v6792_v40  ;;  %v534_v1 = vld [vmem:[#allocation2 + $0x171] sm:$0xff]  ;;  %v6875_v5 = vld [vmem:[#allocation2 + $0x61] sm:$0xff]  ;;  %436 = vst.msk [vmem:[#allocation2 + $0xa0] sm:$0x3] %vm417_vm2, %v380_v8 }
  0x33   : > { %5939 = vmatmul.msk.f32.gmra.mxu0 %vm414_vm1, %v6794_v41  ;;  %v6877_v6 = vld [vmem:[#allocation2 + $0x62] sm:$0xff]  ;;  %v6892_v11 = vld [vmem:[#allocation2 + $0x6a] sm:$0xff]  ;;  %437 = vst.msk [vmem:[#allocation2 + $0xa8] sm:$0xff] %vm414_vm1, %v381_v13 }
  0x34   : > { %6006 = vmatmul.msk.f32.gmra.mxu2 %vm414_vm1, %v6796_v42  ;;  %v6888_v9 = vld [vmem:[#allocation2 + $0x68] sm:$0xff]  ;;  %438 = vst.msk [vmem:[#allocation2 + $0xb0] sm:$0xff] %vm414_vm1, %v382_v14  ;;  %v6905_v15 = vld [vmem:[#allocation2 + $0x78] sm:$0xff]  ;;  %v501_v2 = vld [vmem:[#allocation2 + $0x170] sm:$0xff] }
  0x35   : > { %5963 = vmatmul.msk.f32.gmra.mxu3 %vm414_vm1, %v530_v43  ;;  %v6890_v10 = vld [vmem:[#allocation2 + $0x69] sm:$0xff]  ;;  %v6907_v16 = vld [vmem:[#allocation2 + $0x79] sm:$0xff]  ;;  %439 = vst.msk [vmem:[#allocation2 + $0xb8] sm:$0x3] %vm417_vm2, %v383_v19 }
  0x36   : > { %v6909_v17 = vld [vmem:[#allocation2 + $0x7a] sm:$0xff]  ;;  %v6924_v22 = vld [vmem:[#allocation2 + $0x82] sm:$0xff]  ;;  %440 = vst.msk [vmem:[#allocation2 + $0xc0] sm:$0xff] %vm414_vm1, %v384_v24  ;;  %v390_v3 = vld [vmem:[%s6720_s26 + $0xf0] sm:$0xff] }
  0x37   : > { %v6920_v20 = vld [vmem:[#allocation2 + $0x80] sm:$0xff]  ;;  %441 = vst.msk [vmem:[#allocation2 + $0xc8] sm:$0xff] %vm414_vm1, %v385_v25  ;;  %v6937_v26 = vld [vmem:[#allocation2 + $0x90] sm:$0xff]  ;;  %v387_v43 = vld [vmem:[%s6720_s26 + $0xd8] sm:$0xff] }
  0x38   : > { %v6922_v21 = vld [vmem:[#allocation2 + $0x81] sm:$0xff]  ;;  %v6939_v27 = vld [vmem:[#allocation2 + $0x91] sm:$0xff]  ;;  %442 = vst.msk [vmem:[#allocation2 + $0xd0] sm:$0x3] %vm417_vm2, %v386_v30 }
  0x39   : > { %v6941_v28 = vld [vmem:[#allocation2 + $0x92] sm:$0xff]  ;;  %v6960_v37 = vld [vmem:[#allocation2 + $0x9a] sm:$0xff]  ;;  %443 = vst.msk [vmem:[#allocation2 + $0xd8] sm:$0xff] %vm414_vm1, %v387_v43  ;;  %v7025_v19 = vld [vmem:[#allocation2 + $0x122] sm:$0xff] }
  0x3a   : > { %5973 = vmatmul.msk.f32.gmra.mxu1 %vm414_vm1, %v6809_v46  ;;  %v6956_v32 = vld [vmem:[#allocation2 + $0x98] sm:$0xff]  ;;  %444 = vst.msk [vmem:[#allocation2 + $0xe0] sm:$0xff] %vm414_vm1, %v388_v44  ;;  %v7051_v43 = vld [vmem:[#allocation2 + $0x12a] sm:$0xff] }
  0x3b   : > { %5940 = vmatmul.msk.f32.gmra.mxu0 %vm414_vm1, %v6811_v47  ;;  %v6958_v33 = vld [vmem:[#allocation2 + $0x99] sm:$0xff]  ;;  %v6983_v50 = vld [vmem:[#allocation2 + $0xa9] sm:$0xff]  ;;  %445 = vst.msk [vmem:[#allocation2 + $0xe8] sm:$0x3] %vm417_vm2, %v389_v56 }
  0x3c   : > { %6007 = vmatmul.msk.f32.gmra.mxu2 %vm414_vm1, %v6813_v48  ;;  %v6998_v61 = vld [vmem:[#allocation2 + $0xb1] sm:$0xff]  ;;  %446 = vst.msk [vmem:[#allocation2 + $0xf0] sm:$0xff] %vm414_vm1, %v390_v3  ;;  %v393_v44 = vld [vmem:[%s6720_s26 + $0x108] sm:$0xff] }
  0x3d   : > { %5964 = vmatmul.msk.f32.gmra.mxu3 %vm414_vm1, %v531_v49  ;;  %v6981_v49 = vld [vmem:[#allocation2 + $0xa8] sm:$0xff]  ;;  %9669 = vst [vmem:[#allocation6_spill] sm:$0xff] %v7025_v19  ;;  %v394_v45 = vld [vmem:[%s6720_s26 + $0x110] sm:$0xff] }
  0x3e   : > { %v7019_v14 = vld [vmem:[#allocation2 + $0xc1] sm:$0xff]  ;;  %9674 = vst [vmem:[#allocation11_spill] sm:$0xff] %v7051_v43 }
  0x3f   : > { %v7045_v38 = vld [vmem:[#allocation2 + $0xc9] sm:$0xff]  ;;  %449 = vst.msk [vmem:[#allocation2 + $0x108] sm:$0xff] %vm414_vm1, %v393_v44  ;;  %v7079_v44 = vld [vmem:[#allocation2 + $0x13a] sm:$0xff] }
  0x40   : > { %9673 = vst [vmem:[#allocation10_spill] sm:$0xff] %v7045_v38 }
  0x41   : > { %450 = vst.msk [vmem:[#allocation2 + $0x110] sm:$0xff] %vm414_vm1, %v394_v45  ;;  %v395_v45 = vld [vmem:[%s6720_s26 + $0x118] sm:$0x3] }
  0x42   : > { %5974 = vmatmul.msk.f32.gmra.mxu1 %vm414_vm1, %v6824_v51  ;;  %9680 = vst [vmem:[#allocation17_spill] sm:$0xff] %v7079_v44 }
  0x43   : > { %5941 = vmatmul.msk.f32.gmra.mxu0 %vm414_vm1, %v6826_v52  ;;  %451 = vst.msk [vmem:[#allocation2 + $0x118] sm:$0x3] %vm417_vm2, %v395_v45 }
  0x44   : > { %6008 = vmatmul.msk.f32.gmra.mxu2 %vm414_vm1, %v6828_v53 }
  0x45   : > { %5965 = vmatmul.msk.f32.gmra.mxu3 %vm414_vm1, %v532_v54  ;;  %v6985_v54 = vld [vmem:[#allocation2 + $0xaa] sm:$0xff] }
  0x4a   : > { %5975 = vmatmul.msk.f32.gmra.mxu1 %vm414_vm1, %v6841_v57 }
  0x4b   : > { %5942 = vmatmul.msk.f32.gmra.mxu0 %vm414_vm1, %v6843_v58 }
  0x4c   : > { %6009 = vmatmul.msk.f32.gmra.mxu2 %vm414_vm1, %v6845_v59 }
  0x4d   : > { %5966 = vmatmul.msk.f32.gmra.mxu3 %vm414_vm1, %v533_v60  ;;  %v6996_v60 = vld [vmem:[#allocation2 + $0xb0] sm:$0xff] }
  0x52   : > { %5976 = vmatmul.msk.f32.gmra.mxu1 %vm414_vm1, %v6856_v62 }
  0x53   : > { %5943 = vmatmul.msk.f32.gmra.mxu0 %vm414_vm1, %v6858_v63 }
  0x54   : > { %6010 = vmatmul.msk.f32.gmra.mxu2 %vm414_vm1, %v6860_v0 }
  0x55   : > { %5967 = vmatmul.msk.f32.gmra.mxu3 %vm414_vm1, %v534_v1  ;;  %v7000_v1 = vld [vmem:[#allocation2 + $0xb2] sm:$0xff] }
  0x5a   : > { %5977 = vmatmul.msk.f32.gmra.mxu1 %vm414_vm1, %v6873_v4 }
  0x5b   : > { %5944 = vmatmul.msk.f32.gmra.mxu0 %vm414_vm1, %v6875_v5 }
  0x5c   : > { %6011 = vmatmul.msk.f32.gmra.mxu2 %vm414_vm1, %v6877_v6 }
  0x5d   : > { %5993 = vmatmul.msk.f32.vlgmr.msrb.gmra.mxu3 %vm414_vm1, %v494_v7  ;;  %v391_v7 = vld [vmem:[%s6720_s26 + $0xf8] sm:$0xff] }
  0x5e   : > { %6036 = vmatpush.msk.msrb.mxu3 %vm633_vm0, %v6035_v31  ;;  %447 = vst.msk [vmem:[#allocation2 + $0xf8] sm:$0xff] %vm414_vm1, %v391_v7 }
  0x62   : > { %5978 = vmatmul.msk.f32.gmra.mxu1 %vm414_vm1, %v6888_v9 }
  0x63   : > { %5945 = vmatmul.msk.f32.gmra.mxu0 %vm414_vm1, %v6890_v10 }
  0x64   : > { %6012 = vmatmul.msk.f32.gmra.mxu2 %vm414_vm1, %v6892_v11 }
  0x65   : > { %5994 = vmatmul.msk.f32.gmra.mxu3 %vm414_vm1, %v495_v12  ;;  %v7015_v12 = vld [vmem:[#allocation2 + $0xc0] sm:$0xff] }
  0x6a   : > { %5979 = vmatmul.msk.f32.gmra.mxu1 %vm414_vm1, %v6905_v15 }
  0x6b   : > { %5946 = vmatmul.msk.f32.gmra.mxu0 %vm414_vm1, %v6907_v16 }
  0x6c   : > { %6013 = vmatmul.msk.f32.gmra.mxu2 %vm414_vm1, %v6909_v17 }
  0x6d   : > { %5995 = vmatmul.msk.f32.gmra.mxu3 %vm414_vm1, %v496_v18  ;;  %v7021_v18 = vld [vmem:[#allocation2 + $0xc2] sm:$0xff] }
  0x72   : > { %5980 = vmatmul.msk.f32.gmra.mxu1 %vm414_vm1, %v6920_v20 }
  0x73   : > { %5947 = vmatmul.msk.f32.gmra.mxu0 %vm414_vm1, %v6922_v21 }
  0x74   : > { %6014 = vmatmul.msk.f32.gmra.mxu2 %vm414_vm1, %v6924_v22 }
  0x75   : > { %5996 = vmatmul.msk.f32.gmra.mxu3 %vm414_vm1, %v497_v23  ;;  %v392_v23 = vld [vmem:[%s6720_s26 + $0x100] sm:$0x3] }
  0x76   : > { %448 = vst.msk [vmem:[#allocation2 + $0x100] sm:$0x3] %vm417_vm2, %v392_v23  ;;  %v7073_v23 = vld [vmem:[#allocation2 + $0xd9] sm:$0xff] }
  0x77   : > { %9678 = vst [vmem:[#allocation15_spill] sm:$0xff] %v7073_v23 }
  0x7a   : > { %5981 = vmatmul.msk.f32.gmra.mxu1 %vm414_vm1, %v6937_v26 }
  0x7b   : > { %5948 = vmatmul.msk.f32.gmra.mxu0 %vm414_vm1, %v6939_v27 }
  0x7c   : > { %6015 = vmatmul.msk.f32.gmra.mxu2 %vm414_vm1, %v6941_v28 }
  0x7d   : > { %5997 = vmatmul.msk.f32.gmra.mxu3 %vm414_vm1, %v498_v29  ;;  %v7039_v29 = vld [vmem:[#allocation2 + $0xc8] sm:$0xff] }
  0x82   : > { %5982 = vmatmul.msk.f32.gmra.mxu1 %vm414_vm1, %v6956_v32 }
  0x83   : > { %5949 = vmatmul.msk.f32.gmra.mxu0 %vm414_vm1, %v6958_v33 }
  0x84   : > { %6016 = vmatmul.msk.f32.gmra.mxu2 %vm414_vm1, %v6960_v37 }
  0x85   : > { %5998 = vmatmul.msk.f32.gmra.mxu3 %vm414_vm1, %v499_v39  ;;  %v7047_v39 = vld [vmem:[#allocation2 + $0xca] sm:$0xff] }
  0x8a   : > { %5983 = vmatmul.msk.f32.gmra.mxu1 %vm414_vm1, %v6981_v49 }
  0x8b   : > { %5950 = vmatmul.msk.f32.gmra.mxu0 %vm414_vm1, %v6983_v50 }
  0x8c   : > { %6017 = vmatmul.msk.f32.gmra.mxu2 %vm414_vm1, %v6985_v54 }
  0x8d   : > { %5999 = vmatmul.msk.f32.gmra.mxu3 %vm414_vm1, %v500_v55 }
  0x92   : > { %5984 = vmatmul.msk.f32.gmra.mxu1 %vm414_vm1, %v6996_v60 }
  0x93   : > { %5951 = vmatmul.msk.f32.gmra.mxu0 %vm414_vm1, %v6998_v61 }
  0x94   : > { %6018 = vmatmul.msk.f32.gmra.mxu2 %vm414_vm1, %v7000_v1 }
  0x95   : > { %6000 = vmatmul.msk.f32.gmra.mxu3 %vm414_vm1, %v501_v2  ;;  %v7067_v2 = vld [vmem:[#allocation2 + $0xd8] sm:$0xff] }
  0x97   : > { %v7013_v8 = vpop.f32.mrf.mxu1 }
  0x98   : > { %9667 = vst [vmem:[#allocation4_spill] sm:$0xff] %v7013_v8  ;;  %v7017_v13 = vpop.f32.mrf.mxu0  ;;  %v7123_v8 = vld [vmem:[#allocation2 + $0xf1] sm:$0xff] }
  0x99   : > { %9668 = vst [vmem:[#allocation5_spill] sm:$0xff] %v7017_v13  ;;  %v7125_v13 = vld [vmem:[#allocation2 + $0xf2] sm:$0xff] }
  0x9a   : > { %5985 = vmatmul.msk.f32.gmra.mxu1 %vm414_vm1, %v7015_v12  ;;  %9692 = vst [vmem:[#allocation29_spill] sm:$0xff] %v7123_v8 }
  0x9b   : > { %5952 = vmatmul.msk.f32.gmra.mxu0 %vm414_vm1, %v7019_v14  ;;  %9693 = vst [vmem:[#allocation30_spill] sm:$0xff] %v7125_v13 }
  0x9c   : > { %6019 = vmatmul.msk.f32.gmra.mxu2 %vm414_vm1, %v7021_v18 }
  0x9d   : > { %6027 = vmatmul.msk.f32.vlgmr.msra.gmra.mxu3 %vm414_vm1, %v7025_v19  ;;  %v7075_v19 = vld [vmem:[#allocation2 + $0xda] sm:$0xff] }
  0x9e   : > { %9679 = vst [vmem:[#allocation16_spill] sm:$0xff] %v7075_v19 }
  0x9f   : > { %v7035_v24 = vpop.f32.mrf.mxu2  ;;  %v7037_v25 = vpop.f32.mrf.mxu1 }
  0xa0   : > { %9670 = vst [vmem:[#allocation7_spill] sm:$0xff] %v7035_v24  ;;  %v7041_v30 = vpop.f32.mrf.mxu3  ;;  %v7043_v31 = vpop.f32.mrf.mxu0  ;;  %v7101_v24 = vld [vmem:[#allocation2 + $0xe2] sm:$0xff] }
  0xa1   : > { %9671 = vst [vmem:[#allocation8_spill] sm:$0xff] %v7037_v25 }
  0xa2   : > { %9672 = vst [vmem:[#allocation9_spill] sm:$0xff] %v7043_v31  ;;  %5986 = vmatmul.msk.f32.gmra.mxu1 %vm414_vm1, %v7039_v29  ;;  %v7099_v31 = vld [vmem:[#allocation2 + $0xe1] sm:$0xff] }
  0xa3   : > { %5953 = vmatmul.msk.f32.gmra.mxu0 %vm414_vm1, %v7045_v38  ;;  %9685 = vst [vmem:[#allocation22_spill] sm:$0xff] %v7099_v31  ;;  %v7205_v38 = vld [vmem:[#allocation2 + $0x112] sm:$0xff] }
  0xa4   : > { %6020 = vmatmul.msk.f32.gmra.mxu2 %vm414_vm1, %v7047_v39  ;;  %9686 = vst [vmem:[#allocation23_spill] sm:$0xff] %v7101_v24 }
  0xa5   : > { %6028 = vmatmul.msk.f32.gmra.mxu3 %vm414_vm1, %v7051_v43 }
  0xa7   : > { %v7062_v55 = vpop.f32.mrf.mxu2  ;;  %v7065_v56 = vpop.f32.mrf.mxu1 }
  0xa8   : > { %9675 = vst [vmem:[#allocation12_spill] sm:$0xff] %v7062_v55  ;;  %v7069_v3 = vpop.f32.mrf.mxu3  ;;  %v7071_v7 = vpop.f32.mrf.mxu0 }
  0xa9   : > { %9676 = vst [vmem:[#allocation13_spill] sm:$0xff] %v7065_v56 }
  0xaa   : > { %9677 = vst [vmem:[#allocation14_spill] sm:$0xff] %v7071_v7  ;;  %5987 = vmatmul.msk.f32.gmra.mxu1 %vm414_vm1, %v7067_v2  ;;  %v7093_v7 = vld [vmem:[#allocation2 + $0xe0] sm:$0xff] }
  0xab   : > { %5954 = vmatmul.msk.f32.gmra.mxu0 %vm414_vm1, %v7073_v23  ;;  %9683 = vst [vmem:[#allocation20_spill] sm:$0xff] %v7093_v7 }
  0xac   : > { %6021 = vmatmul.msk.f32.gmra.mxu2 %vm414_vm1, %v7075_v19  ;;  %v7181_v19 = vld [vmem:[#allocation2 + $0x10a] sm:$0xff] }
  0xad   : > { %6029 = vmatmul.msk.f32.gmra.mxu3 %vm414_vm1, %v7079_v44  ;;  %v7105_v44 = vld [vmem:[#allocation2 + $0x142] sm:$0xff] }
  0xae   : > { %9687 = vst [vmem:[#allocation24_spill] sm:$0xff] %v7105_v44 }
  0xaf   : > { %v7089_v43 = vpop.f32.mrf.mxu2  ;;  %v7091_v56 = vpop.f32.mrf.mxu1 }
  0xb0   : > { %9681 = vst [vmem:[#allocation18_spill] sm:$0xff] %v7089_v43  ;;  %v7095_v55 = vpop.f32.mrf.mxu3  ;;  %v7097_v25 = vpop.f32.mrf.mxu0 }
  0xb1   : > { %9682 = vst [vmem:[#allocation19_spill] sm:$0xff] %v7091_v56 }
  0xb2   : > { %9684 = vst [vmem:[#allocation21_spill] sm:$0xff] %v7097_v25  ;;  %5988 = vmatmul.msk.f32.gmra.mxu1 %vm414_vm1, %v7093_v7  ;;  %v7117_v25 = vld [vmem:[#allocation2 + $0xf0] sm:$0xff] }
  0xb3   : > { %5955 = vmatmul.msk.f32.gmra.mxu0 %vm414_vm1, %v7099_v31  ;;  %9690 = vst [vmem:[#allocation27_spill] sm:$0xff] %v7117_v25  ;;  %v7129_v31 = vld [vmem:[#allocation2 + $0x152] sm:$0xff] }
  0xb4   : > { %6022 = vmatmul.msk.f32.gmra.mxu2 %vm414_vm1, %v7101_v24  ;;  %9694 = vst [vmem:[#allocation31_spill] sm:$0xff] %v7129_v31  ;;  %v7203_v7 = vld [vmem:[#allocation2 + $0x111] sm:$0xff] }
  0xb5   : > { %6030 = vmatmul.msk.f32.gmra.mxu3 %vm414_vm1, %v7105_v44  ;;  %v6171_v44 = vld [vmem:[%s9578_s1 + $0x1c] sm:$0xf]  ;;  %9711 = vst [vmem:[#allocation48_spill] sm:$0xff] %v7203_v7 }
  0xb6   : > { %6172 = vmatpush.msk.msra.mxu3 %vm633_vm0, %v6171_v44  ;;  %v6205_v44 = vld [vmem:[%s9578_s1 + $0x20] sm:$0xf] }
  0xb7   : > { %v7113_v45 = vpop.f32.mrf.mxu2  ;;  %v7115_v56 = vpop.f32.mrf.mxu1  ;;  %6206 = vmatpush.msk.msra.mxu0 %vm633_vm0, %v6205_v44 }
  0xb8   : > { %9688 = vst [vmem:[#allocation25_spill] sm:$0xff] %v7113_v45  ;;  %v7119_v43 = vpop.f32.mrf.mxu3  ;;  %v7121_v23 = vpop.f32.mrf.mxu0  ;;  %v7145_v45 = vld [vmem:[#allocation2 + $0xf8] sm:$0xff] }
  0xb9   : > { %9689 = vst [vmem:[#allocation26_spill] sm:$0xff] %v7115_v56 }
  0xba   : > { %9691 = vst [vmem:[#allocation28_spill] sm:$0xff] %v7121_v23  ;;  %5989 = vmatmul.msk.f32.gmra.mxu1 %vm414_vm1, %v7117_v25  ;;  %v7153_v25 = vld [vmem:[#allocation2 + $0xfa] sm:$0xff] }
  0xbb   : > { %5956 = vmatmul.msk.f32.gmra.mxu0 %vm414_vm1, %v7123_v8  ;;  %9697 = vst [vmem:[#allocation34_spill] sm:$0xff] %v7145_v45 }
  0xbc   : > { %6023 = vmatmul.msk.f32.gmra.mxu2 %vm414_vm1, %v7125_v13  ;;  %v7151_v13 = vld [vmem:[#allocation2 + $0xf9] sm:$0xff]  ;;  %9700 = vst [vmem:[#allocation37_spill] sm:$0xff] %v7153_v25 }
  0xbd   : > { %6031 = vmatmul.msk.f32.gmra.mxu3 %vm414_vm1, %v7129_v31  ;;  %9699 = vst [vmem:[#allocation36_spill] sm:$0xff] %v7151_v13  ;;  %v7157_v31 = vld [vmem:[#allocation2 + $0x15a] sm:$0xff] }
  0xbe   : > { %9701 = vst [vmem:[#allocation38_spill] sm:$0xff] %v7157_v31 }
  0xbf   : > { %v7140_v56 = vpop.f32.mrf.mxu2  ;;  %v7143_v23 = vpop.f32.mrf.mxu1 }
  0xc0   : > { %9695 = vst [vmem:[#allocation32_spill] sm:$0xff] %v7140_v56  ;;  %v7147_v24 = vpop.f32.mrf.mxu3  ;;  %v7149_v8 = vpop.f32.mrf.mxu0  ;;  %v7173_v56 = vld [vmem:[#allocation2 + $0x108] sm:$0xff] }
  0xc1   : > { %9696 = vst [vmem:[#allocation33_spill] sm:$0xff] %v7143_v23 }
  0xc2   : > { %9698 = vst [vmem:[#allocation35_spill] sm:$0xff] %v7149_v8  ;;  %5990 = vmatmul.msk.f32.gmra.mxu1 %vm414_vm1, %v7145_v45 }
  0xc3   : > { %5957 = vmatmul.msk.f32.gmra.mxu0 %vm414_vm1, %v7151_v13  ;;  %9704 = vst [vmem:[#allocation41_spill] sm:$0xff] %v7173_v56 }
  0xc4   : > { %6024 = vmatmul.msk.f32.gmra.mxu2 %vm414_vm1, %v7153_v25  ;;  %v7179_v25 = vld [vmem:[#allocation2 + $0x109] sm:$0xff] }
  0xc5   : > { %6032 = vmatmul.msk.f32.gmra.mxu3 %vm414_vm1, %v7157_v31  ;;  %9706 = vst [vmem:[#allocation43_spill] sm:$0xff] %v7179_v25  ;;  %v7185_v31 = vld [vmem:[#allocation2 + $0x16a] sm:$0xff] }
  0xc6   : > { %9707 = vst [vmem:[#allocation44_spill] sm:$0xff] %v7185_v31 }
  0xc7   : > { %v7168_v23 = vpop.f32.mrf.mxu2  ;;  %v7171_v8 = vpop.f32.mrf.mxu1 }
  0xc8   : > { %9702 = vst [vmem:[#allocation39_spill] sm:$0xff] %v7168_v23  ;;  %v7175_v45 = vpop.f32.mrf.mxu3  ;;  %v7177_v13 = vpop.f32.mrf.mxu0 }
  0xc9   : > { %9703 = vst [vmem:[#allocation40_spill] sm:$0xff] %v7171_v8 }
  0xca   : > { %9705 = vst [vmem:[#allocation42_spill] sm:$0xff] %v7177_v13  ;;  %5991 = vmatmul.msk.f32.gmra.mxu1 %vm414_vm1, %v7173_v56  ;;  %v7197_v13 = vld [vmem:[#allocation2 + $0x110] sm:$0xff] }
  0xcb   : > { %5958 = vmatmul.msk.f32.gmra.mxu0 %vm414_vm1, %v7179_v25  ;;  %v7209_v25 = vld [vmem:[#allocation2 + $0x172] sm:$0xff] }
  0xcc   : > { %6025 = vmatmul.msk.f32.gmra.mxu2 %vm414_vm1, %v7181_v19  ;;  %9712 = vst [vmem:[#allocation49_spill] sm:$0xff] %v7209_v25 }
  0xcd   : > { %6033 = vmatmul.msk.f32.gmra.mxu3 %vm414_vm1, %v7185_v31 }
  0xcf   : > { %v7193_v44 = vpop.f32.mrf.mxu2  ;;  %v7195_v8 = vpop.f32.mrf.mxu1 }
  0xd0   : > { %9708 = vst [vmem:[#allocation45_spill] sm:$0xff] %v7193_v44  ;;  %v7199_v23 = vpop.f32.mrf.mxu3  ;;  %v7201_v56 = vpop.f32.mrf.mxu0 }
  0xd1   : > { %9709 = vst [vmem:[#allocation46_spill] sm:$0xff] %v7195_v8 }
  0xd2   : > { %9710 = vst [vmem:[#allocation47_spill] sm:$0xff] %v7201_v56  ;;  %5992 = vmatmul.msk.f32.gmra.mxu1 %vm414_vm1, %v7197_v13 }
  0xd3   : > { %5959 = vmatmul.msk.f32.gmra.mxu0 %vm414_vm1, %v7203_v7 }
  0xd4   : > { %6026 = vmatmul.msk.f32.gmra.mxu2 %vm414_vm1, %v7205_v38 }
  0xd5   : > { %6034 = vmatmul.msk.f32.gmra.mxu3 %vm414_vm1, %v7209_v25 }
  0xd7   : > { %v7217_v31 = vpop.f32.mrf.mxu2  ;;  %v7219_v8 = vpop.f32.mrf.mxu1 }
  0xd8   : > { %9713 = vst [vmem:[#allocation50_spill] sm:$0xff] %v7217_v31  ;;  %v7221_v56 = vpop.f32.mrf.mxu3  ;;  %v7223_v44 = vpop.f32.mrf.mxu0 }
  0xd9   : > { %9714 = vst [vmem:[#allocation51_spill] sm:$0xff] %v7219_v8 }
  0xda   : > { %9715 = vst [vmem:[#allocation52_spill] sm:$0xff] %v7223_v44  ;;  %6105 = vmatmul.msk.f32.vlgmr.msrb.gmra.mxu1 %vm414_vm1, %v6778_v36 }
  0xdb   : > { %6071 = vmatmul.msk.f32.vlgmr.msrb.gmra.mxu0 %vm414_vm1, %v6776_v35 }
  0xdc   : > { %6139 = vmatmul.msk.f32.vlgmr.msrb.gmra.mxu2 %vm414_vm1, %v6809_v46 }
  0xdd   : > { %6037 = vmatmul.msk.f32.vlgmr.msrb.gmra.mxu3 %vm414_vm1, %v6773_v34 }
  0xdf   : > { %v7233_v25 = vpop.f32.mrf.mxu2  ;;  %v7235_v31 = vpop.f32.mrf.mxu1 }
  0xe0   : > { %9716 = vst [vmem:[#allocation53_spill] sm:$0xff] %v7235_v31  ;;  %v938_v8 = vpop.f32.mrf.mxu3  ;;  %v7237_v7 = vpop.f32.mrf.mxu0 }
  0xe1   : > { %v7240_v44 = vadd.f32 %v938_v8, %v7041_v30 }
  0xe2   : > { %6106 = vmatmul.msk.f32.gmra.mxu1 %vm414_vm1, %v6796_v42 }
  0xe3   : > { %6072 = vmatmul.msk.f32.gmra.mxu0 %vm414_vm1, %v6794_v41 }
  0xe4   : > { %6140 = vmatmul.msk.f32.gmra.mxu2 %vm414_vm1, %v6824_v51 }
  0xe5   : > { %6038 = vmatmul.msk.f32.gmra.mxu3 %vm414_vm1, %v6792_v40 }
  0xe7   : > { %v7250_v34 = vpop.f32.mrf.mxu2  ;;  %v7252_v35 = vpop.f32.mrf.mxu1 }
  0xe8   : > { %v941_v36 = vpop.f32.mrf.mxu3  ;;  %v7254_v31 = vpop.f32.mrf.mxu0 }
  0xe9   : > { %v7257_v8 = vadd.f32 %v941_v36, %v7069_v3 }
  0xea   : > { %6107 = vmatmul.msk.f32.gmra.mxu1 %vm414_vm1, %v6813_v48 }
  0xeb   : > { %6073 = vmatmul.msk.f32.gmra.mxu0 %vm414_vm1, %v6811_v47 }
  0xec   : > { %6141 = vmatmul.msk.f32.gmra.mxu2 %vm414_vm1, %v6841_v57 }
  0xed   : > { %6039 = vmatmul.msk.f32.gmra.mxu3 %vm414_vm1, %v6809_v46 }
  0xef   : > { %v7267_v40 = vpop.f32.mrf.mxu2  ;;  %v7269_v41 = vpop.f32.mrf.mxu1 }
  0xf0   : > { %v944_v42 = vpop.f32.mrf.mxu3  ;;  %v7271_v30 = vpop.f32.mrf.mxu0 }
  0xf1   : > { %v7274_v3 = vadd.f32 %v944_v42, %v7095_v55 }
  0xf2   : > { %6108 = vmatmul.msk.f32.gmra.mxu1 %vm414_vm1, %v6828_v53 }
  0xf3   : > { %6074 = vmatmul.msk.f32.gmra.mxu0 %vm414_vm1, %v6826_v52 }
  0xf4   : > { %6142 = vmatmul.msk.f32.gmra.mxu2 %vm414_vm1, %v6856_v62 }
  0xf5   : > { %6040 = vmatmul.msk.f32.gmra.mxu3 %vm414_vm1, %v6824_v51 }
  0xf7   : > { %v7284_v46 = vpop.f32.mrf.mxu2  ;;  %v7286_v47 = vpop.f32.mrf.mxu1 }
  0xf8   : > { %v947_v48 = vpop.f32.mrf.mxu3  ;;  %v7288_v36 = vpop.f32.mrf.mxu0 }
  0xf9   : > { %v7291_v55 = vadd.f32 %v947_v48, %v7119_v43 }
  0xfa   : > { %6109 = vmatmul.msk.f32.gmra.mxu1 %vm414_vm1, %v6845_v59 }
  0xfb   : > { %6075 = vmatmul.msk.f32.gmra.mxu0 %vm414_vm1, %v6843_v58 }
  0xfc   : > { %6143 = vmatmul.msk.f32.gmra.mxu2 %vm414_vm1, %v6873_v4 }
  0xfd   : > { %6041 = vmatmul.msk.f32.gmra.mxu3 %vm414_vm1, %v6841_v57 }
  0xff   : > { %v7301_v51 = vpop.f32.mrf.mxu2  ;;  %v7303_v52 = vpop.f32.mrf.mxu1 }
 0x100   : > { %v950_v53 = vpop.f32.mrf.mxu3  ;;  %v7305_v42 = vpop.f32.mrf.mxu0 }
 0x101   : > { %v7308_v43 = vadd.f32 %v950_v53, %v7147_v24 }
 0x102   : > { %6110 = vmatmul.msk.f32.gmra.mxu1 %vm414_vm1, %v6860_v0 }
 0x103   : > { %6076 = vmatmul.msk.f32.gmra.mxu0 %vm414_vm1, %v6858_v63 }
 0x104   : > { %6144 = vmatmul.msk.f32.gmra.mxu2 %vm414_vm1, %v6888_v9 }
 0x105   : > { %6042 = vmatmul.msk.f32.gmra.mxu3 %vm414_vm1, %v6856_v62 }
 0x107   : > { %v7318_v57 = vpop.f32.mrf.mxu2  ;;  %v7320_v58 = vpop.f32.mrf.mxu1 }
 0x108   : > { %v953_v59 = vpop.f32.mrf.mxu3  ;;  %v7322_v48 = vpop.f32.mrf.mxu0 }
 0x109   : > { %v7325_v24 = vadd.f32 %v953_v59, %v7175_v45 }
 0x10a   : > { %6111 = vmatmul.msk.f32.gmra.mxu1 %vm414_vm1, %v6877_v6 }
 0x10b   : > { %6077 = vmatmul.msk.f32.gmra.mxu0 %vm414_vm1, %v6875_v5 }
 0x10c   : > { %6145 = vmatmul.msk.f32.gmra.mxu2 %vm414_vm1, %v6905_v15 }
 0x10d   : > { %6043 = vmatmul.msk.f32.gmra.mxu3 %vm414_vm1, %v6873_v4 }
 0x10f   : > { %v7335_v62 = vpop.f32.mrf.mxu2  ;;  %v7337_v63 = vpop.f32.mrf.mxu1 }
 0x110   : > { %v956_v0 = vpop.f32.mrf.mxu3  ;;  %v7339_v53 = vpop.f32.mrf.mxu0 }
 0x111   : > { %v7342_v45 = vadd.f32 %v956_v0, %v7199_v23 }
 0x112   : > { %6112 = vmatmul.msk.f32.gmra.mxu1 %vm414_vm1, %v6892_v11 }
 0x113   : > { %6078 = vmatmul.msk.f32.gmra.mxu0 %vm414_vm1, %v6890_v10 }
 0x114   : > { %6146 = vmatmul.msk.f32.gmra.mxu2 %vm414_vm1, %v6920_v20 }
 0x115   : > { %6044 = vmatmul.msk.f32.gmra.mxu3 %vm414_vm1, %v6888_v9 }
 0x117   : > { %v7352_v4 = vpop.f32.mrf.mxu2  ;;  %v7354_v5 = vpop.f32.mrf.mxu1 }
 0x118   : > { %v959_v6 = vpop.f32.mrf.mxu3  ;;  %v7356_v59 = vpop.f32.mrf.mxu0 }
 0x119   : > { %v7359_v23 = vadd.f32 %v959_v6, %v7221_v56 }
 0x11a   : > { %6113 = vmatmul.msk.f32.gmra.mxu1 %vm414_vm1, %v6909_v17 }
 0x11b   : > { %6079 = vmatmul.msk.f32.gmra.mxu0 %vm414_vm1, %v6907_v16 }
 0x11c   : > { %6147 = vmatmul.msk.f32.gmra.mxu2 %vm414_vm1, %v6937_v26 }
 0x11d   : > { %6045 = vmatmul.msk.f32.gmra.mxu3 %vm414_vm1, %v6905_v15 }
 0x11f   : > { %v7369_v9 = vpop.f32.mrf.mxu2  ;;  %v7371_v10 = vpop.f32.mrf.mxu1 }
 0x120   : > { %v1184_v11 = vpop.f32.mrf.mxu3  ;;  %v7373_v0 = vpop.f32.mrf.mxu0 }
 0x121   : > { %v7376_v56 = vadd.f32 %v1184_v11, %v7240_v44 }
 0x122   : > { %6114 = vmatmul.msk.f32.gmra.mxu1 %vm414_vm1, %v6924_v22 }
 0x123   : > { %9717 = vst [vmem:[#allocation54_spill] sm:$0xff] %v7376_v56  ;;  %6080 = vmatmul.msk.f32.gmra.mxu0 %vm414_vm1, %v6922_v21 }
 0x124   : > { %6148 = vmatmul.msk.f32.gmra.mxu2 %vm414_vm1, %v6956_v32 }
 0x125   : > { %6046 = vmatmul.msk.f32.gmra.mxu3 %vm414_vm1, %v6920_v20 }
 0x127   : > { %v7386_v15 = vpop.f32.mrf.mxu2  ;;  %v7388_v16 = vpop.f32.mrf.mxu1 }
 0x128   : > { %v1187_v17 = vpop.f32.mrf.mxu3  ;;  %v7390_v6 = vpop.f32.mrf.mxu0 }
 0x129   : > { %v7393_v44 = vadd.f32 %v1187_v17, %v7257_v8 }
 0x12a   : > { %6115 = vmatmul.msk.f32.gmra.mxu1 %vm414_vm1, %v6941_v28 }
 0x12b   : > { %9718 = vst [vmem:[#allocation55_spill] sm:$0xff] %v7393_v44  ;;  %6081 = vmatmul.msk.f32.gmra.mxu0 %vm414_vm1, %v6939_v27  ;;  %v9740_v44 = vld [vmem:[#allocation7_spill] sm:$0xff] }
 0x12c   : > { %6149 = vmatmul.msk.f32.gmra.mxu2 %vm414_vm1, %v6981_v49 }
 0x12d   : > { %6047 = vmatmul.msk.f32.gmra.mxu3 %vm414_vm1, %v6937_v26 }
 0x12f   : > { %v7403_v20 = vpop.f32.mrf.mxu2  ;;  %v7405_v21 = vpop.f32.mrf.mxu1 }
 0x130   : > { %v1190_v22 = vpop.f32.mrf.mxu3  ;;  %v7407_v11 = vpop.f32.mrf.mxu0 }
 0x131   : > { %v7410_v8 = vadd.f32 %v1190_v22, %v7274_v3 }
 0x132   : > { %6116 = vmatmul.msk.f32.gmra.mxu1 %vm414_vm1, %v6960_v37 }
 0x133   : > { %9719 = vst [vmem:[#allocation56_spill] sm:$0xff] %v7410_v8  ;;  %6082 = vmatmul.msk.f32.gmra.mxu0 %vm414_vm1, %v6958_v33  ;;  %v9739_v8 = vld [vmem:[#allocation27_spill] sm:$0xff] }
 0x134   : > { %6150 = vmatmul.msk.f32.gmra.mxu2 %vm414_vm1, %v6996_v60 }
 0x135   : > { %6048 = vmatmul.msk.f32.gmra.mxu3 %vm414_vm1, %v6956_v32 }
 0x137   : > { %v7420_v26 = vpop.f32.mrf.mxu2  ;;  %v7422_v27 = vpop.f32.mrf.mxu1 }
 0x138   : > { %v1193_v28 = vpop.f32.mrf.mxu3  ;;  %v7424_v17 = vpop.f32.mrf.mxu0 }
 0x139   : > { %v7427_v3 = vadd.f32 %v1193_v28, %v7291_v55 }
 0x13a   : > { %6117 = vmatmul.msk.f32.gmra.mxu1 %vm414_vm1, %v6985_v54 }
 0x13b   : > { %9720 = vst [vmem:[#allocation57_spill] sm:$0xff] %v7427_v3  ;;  %6083 = vmatmul.msk.f32.gmra.mxu0 %vm414_vm1, %v6983_v50  ;;  %v9738_v3 = vld [vmem:[#allocation15_spill] sm:$0xff] }
 0x13c   : > { %6151 = vmatmul.msk.f32.gmra.mxu2 %vm414_vm1, %v7015_v12 }
 0x13d   : > { %6049 = vmatmul.msk.f32.gmra.mxu3 %vm414_vm1, %v6981_v49  ;;  %v6272_v49 = vld [vmem:[%s9581_s4 + $0x8] sm:$0xff] }
 0x13e   : > { %3470 = vmatpush.msra.mxu2 %v6272_v49 }
 0x13f   : > { %v7437_v32 = vpop.f32.mrf.mxu2  ;;  %v7439_v33 = vpop.f32.mrf.mxu1 }
 0x140   : > { %9721 = vst [vmem:[#allocation58_spill] sm:$0xff] %v7439_v33  ;;  %v1196_v37 = vpop.f32.mrf.mxu3  ;;  %v7441_v22 = vpop.f32.mrf.mxu0  ;;  %v9751_v33 = vld [vmem:[#allocation29_spill] sm:$0xff] }
 0x141   : > { %v7444_v55 = vadd.f32 %v1196_v37, %v7308_v43 }
 0x142   : > { %6118 = vmatmul.msk.f32.gmra.mxu1 %vm414_vm1, %v7000_v1  ;;  %v3014_v1 = vld [vmem:[%s9584_s7] sm:$0xf] }
 0x143   : > { %9722 = vst [vmem:[#allocation59_spill] sm:$0xff] %v7444_v55  ;;  %6084 = vmatmul.msk.f32.gmra.mxu0 %vm414_vm1, %v6998_v61  ;;  %6239 = vmatpush.msk.msra.mxu1 %vm633_vm0, %v3014_v1 }
 0x144   : > { %6152 = vmatmul.msk.f32.gmra.mxu2 %vm414_vm1, %v7039_v29 }
 0x145   : > { %6050 = vmatmul.msk.f32.gmra.mxu3 %vm414_vm1, %v6996_v60 }
 0x147   : > { %v7457_v50 = vpop.f32.mrf.mxu2  ;;  %v7459_v54 = vpop.f32.mrf.mxu1 }
 0x148   : > { %9723 = vst [vmem:[#allocation60_spill] sm:$0xff] %v7457_v50  ;;  %v1199_v61 = vpop.f32.mrf.mxu3  ;;  %v7464_v43 = vpop.f32.mrf.mxu0 }
 0x149   : > { %9724 = vst [vmem:[#allocation61_spill] sm:$0xff] %v7459_v54  ;;  %v7468_v28 = vadd.f32 %v1199_v61, %v7325_v24 }
 0x14a   : > { %9725 = vst [vmem:[#allocation62_spill] sm:$0xff] %v7464_v43  ;;  %6119 = vmatmul.msk.f32.gmra.mxu1 %vm414_vm1, %v7021_v18  ;;  %v9732_v18 = vld [vmem:[#allocation20_spill] sm:$0xff] }
 0x14b   : > { %9726 = vst [vmem:[#allocation63_spill] sm:$0xff] %v7468_v28  ;;  %6085 = vmatmul.msk.f32.gmra.mxu0 %vm414_vm1, %v7019_v14  ;;  %v9731_v14 = vld [vmem:[#allocation10_spill] sm:$0xff] }
 0x14c   : > { %6153 = vmatmul.msk.f32.gmra.mxu2 %vm414_vm1, %v7067_v2 }
 0x14d   : > { %6051 = vmatmul.msk.f32.gmra.mxu3 %vm414_vm1, %v7015_v12 }
 0x14f   : > { %v7478_v60 = vpop.f32.mrf.mxu2  ;;  %v7480_v37 = vpop.f32.mrf.mxu1 }
 0x150   : > { %9727 = vst [vmem:[#allocation64_spill] sm:$0xff] %v7478_v60  ;;  %v1202_v49 = vpop.f32.mrf.mxu3  ;;  %v7482_v1 = vpop.f32.mrf.mxu0  ;;  %v9745_v60 = vld [vmem:[#allocation34_spill] sm:$0xff] }
 0x151   : > { %9728 = vst [vmem:[#allocation65_spill] sm:$0xff] %v7480_v37  ;;  %v7485_v24 = vadd.f32 %v1202_v49, %v7342_v45  ;;  %v9735_v49 = vld [vmem:[#allocation16_spill] sm:$0xff] }
 0x152   : > { %9729 = vst [vmem:[#allocation66_spill] sm:$0xff] %v7482_v1  ;;  %6120 = vmatmul.msk.f32.gmra.mxu1 %vm414_vm1, %v7047_v39  ;;  %v9736_v39 = vld [vmem:[#allocation5_spill] sm:$0xff]  ;;  %v9744_v1 = vld [vmem:[#allocation22_spill] sm:$0xff] }
 0x153   : > { %9730 = vst [vmem:[#allocation67_spill] sm:$0xff] %v7485_v24  ;;  %6086 = vmatmul.msk.f32.gmra.mxu0 %vm414_vm1, %v9731_v14  ;;  %v9737_v24 = vld [vmem:[#allocation4_spill] sm:$0xff] }
 0x154   : > { %6154 = vmatmul.msk.f32.gmra.mxu2 %vm414_vm1, %v9732_v18  ;;  %v867_v14 = vadd.f32 %v9737_v24, %v9736_v39  ;;  %v9742_v24 = vld [vmem:[#allocation9_spill] sm:$0xff]  ;;  %v9743_v39 = vld [vmem:[#allocation8_spill] sm:$0xff] }
 0x155   : > { %6052 = vmatmul.msk.f32.gmra.mxu3 %vm414_vm1, %v7039_v29  ;;  %v870_v37 = vadd.f32 %v9743_v39, %v9742_v24 }
 0x156   : > { %v1208_v56 = vadd.f32 %v9740_v44, %v867_v14  ;;  %v9746_v14 = vld [vmem:[#allocation12_spill] sm:$0xff] }
 0x157   : > { %v7495_v12 = vpop.f32.mrf.mxu2  ;;  %v1947_v61 = vpop.f32.mrf.mxu1 }
 0x158   : > { %9733 = vst [vmem:[#allocation10_spill] sm:$0xff] %v7495_v12  ;;  %v1205_v28 = vpop.f32.mrf.mxu3  ;;  %v1669_v55 = vpop.f32.mrf.mxu0 }
 0x159   : > { %v7498_v45 = vadd.f32 %v1205_v28, %v7359_v23 }
 0x15a   : > { %6121 = vmatmul.msk.f32.gmra.mxu1 %vm414_vm1, %v9735_v49  ;;  %v9741_v49 = vld [vmem:[#allocation23_spill] sm:$0xff] }
 0x15b   : > { %9734 = vst [vmem:[#allocation20_spill] sm:$0xff] %v7498_v45  ;;  %6087 = vmatmul.msk.f32.gmra.mxu0 %vm414_vm1, %v9738_v3 }
 0x15c   : > { %6155 = vmatmul.msk.f32.gmra.mxu2 %vm414_vm1, %v9739_v8 }
 0x15d   : > { %6053 = vmatmul.msk.f32.gmra.mxu3 %vm414_vm1, %v7067_v2 }
 0x15f   : > { %v2226_v29 = vpop.f32.mrf.mxu2  ;;  %v1950_v23 = vpop.f32.mrf.mxu1 }
 0x160   : > { %v1391_v28 = vpop.f32.mrf.mxu3  ;;  %v1672_v45 = vpop.f32.mrf.mxu0 }
 0x161   : > { %v1487_v12 = vadd.f32 %v1391_v28, %v1208_v56  ;;  %v1209_v56 = vadd.f32 %v9746_v14, %v870_v37 }
 0x162   : > { %6122 = vmatmul.msk.f32.gmra.mxu1 %vm414_vm1, %v9741_v49 }
 0x163   : > { %v1765_v3 = vadd.f32 %v1669_v55, %v1487_v12  ;;  %6088 = vmatmul.msk.f32.gmra.mxu0 %vm414_vm1, %v9744_v1  ;;  %v9748_v55 = vld [vmem:[#allocation30_spill] sm:$0xff]  ;;  %v9750_v12 = vld [vmem:[#allocation13_spill] sm:$0xff] }
 0x164   : > { %6156 = vmatmul.msk.f32.gmra.mxu2 %vm414_vm1, %v9745_v60  ;;  %v9749_v1 = vld [vmem:[#allocation14_spill] sm:$0xff] }
 0x165   : > { %6054 = vmatmul.msk.f32.gmra.mxu3 %vm414_vm1, %v9732_v18  ;;  %v2043_v2 = vadd.f32 %v1947_v61, %v1765_v3  ;;  %v873_v39 = vadd.f32 %v9750_v12, %v9749_v1  ;;  %v9752_v18 = vld [vmem:[#allocation41_spill] sm:$0xff] }
 0x167   : > { %v2229_v44 = vpop.f32.mrf.mxu2  ;;  %v7522_v28 = vadd.f32 %v2226_v29, %v2043_v2  ;;  %v1953_v49 = vpop.f32.mrf.mxu1  ;;  %v9753_v29 = vld [vmem:[#allocation18_spill] sm:$0xff] }
 0x168   : > { %v1394_v54 = vpop.f32.mrf.mxu3  ;;  %v1675_v43 = vpop.f32.mrf.mxu0 }
 0x169   : > { %9747 = vst [vmem:[#allocation16_spill] sm:$0xff] %v7522_v28  ;;  %v1488_v24 = vadd.f32 %v1394_v54, %v1209_v56  ;;  %v1210_v54 = vadd.f32 %v9753_v29, %v873_v39  ;;  %v9757_v28 = vld [vmem:[#allocation36_spill] sm:$0xff] }
 0x16a   : > { %6123 = vmatmul.msk.f32.gmra.mxu1 %vm414_vm1, %v9748_v55 }
 0x16b   : > { %v1766_v50 = vadd.f32 %v1672_v45, %v1488_v24  ;;  %6089 = vmatmul.msk.f32.gmra.mxu0 %vm414_vm1, %v9751_v33  ;;  %v9754_v45 = vld [vmem:[#allocation37_spill] sm:$0xff]  ;;  %v9756_v24 = vld [vmem:[#allocation19_spill] sm:$0xff] }
 0x16c   : > { %6157 = vmatmul.msk.f32.gmra.mxu2 %vm414_vm1, %v9752_v18  ;;  %v9755_v33 = vld [vmem:[#allocation21_spill] sm:$0xff] }
 0x16d   : > { %6055 = vmatmul.msk.f32.gmra.mxu3 %vm414_vm1, %v9739_v8  ;;  %v2044_v37 = vadd.f32 %v1950_v23, %v1766_v50  ;;  %v876_v1 = vadd.f32 %v9756_v24, %v9755_v33  ;;  %v9758_v23 = vld [vmem:[#allocation25_spill] sm:$0xff]  ;;  %v9761_v24 = vld [vmem:[#allocation43_spill] sm:$0xff] }
 0x16f   : > { %v2232_v61 = vpop.f32.mrf.mxu2  ;;  %v7535_v3 = vadd.f32 %v2229_v44, %v2044_v37  ;;  %v1956_v2 = vpop.f32.mrf.mxu1  ;;  %v1211_v44 = vadd.f32 %v9758_v23, %v876_v1 }
 0x170   : > { %v1397_v14 = vpop.f32.mrf.mxu3  ;;  %v1678_v56 = vpop.f32.mrf.mxu0 }
 0x171   : > { %v1489_v55 = vadd.f32 %v1397_v14, %v1210_v54  ;;  %v2096_v14 = vld [vmem:[#allocation2 + $0x120] sm:$0xff] }
 0x172   : > { %6124 = vmatmul.msk.f32.gmra.mxu1 %vm414_vm1, %v9754_v45 }
 0x173   : > { %v1767_v12 = vadd.f32 %v1675_v43, %v1489_v55  ;;  %6090 = vmatmul.msk.f32.gmra.mxu0 %vm414_vm1, %v9757_v28  ;;  %v9759_v28 = vld [vmem:[#allocation28_spill] sm:$0xff]  ;;  %v9760_v55 = vld [vmem:[#allocation26_spill] sm:$0xff] }
 0x174   : > { %6158 = vmatmul.msk.f32.gmra.mxu2 %vm414_vm1, %v7197_v13  ;;  %v879_v45 = vadd.f32 %v9760_v55, %v9759_v28 }
 0x175   : > { %6056 = vmatmul.msk.f32.gmra.mxu3 %vm414_vm1, %v9745_v60  ;;  %v2045_v8 = vadd.f32 %v1953_v49, %v1767_v12 }
 0x177   : > { %v2235_v50 = vpop.f32.mrf.mxu2  ;;  %v7548_v39 = vadd.f32 %v2232_v61, %v2045_v8  ;;  %v1959_v37 = vpop.f32.mrf.mxu1  ;;  %v9762_v61 = vld [vmem:[#allocation32_spill] sm:$0xff] }
 0x178   : > { %v1400_v29 = vpop.f32.mrf.mxu3  ;;  %v1681_v54 = vpop.f32.mrf.mxu0  ;;  %v1212_v1 = vadd.f32 %v9762_v61, %v879_v45 }
 0x179   : > { %v1490_v43 = vadd.f32 %v1400_v29, %v1211_v44  ;;  %v2097_v44 = vld [vmem:[#allocation2 + $0x128] sm:$0xff] }
 0x17a   : > { %6125 = vmatmul.msk.f32.gmra.mxu1 %vm414_vm1, %v7181_v19 }
 0x17b   : > { %v1768_v33 = vadd.f32 %v1678_v56, %v1490_v43  ;;  %6091 = vmatmul.msk.f32.gmra.mxu0 %vm414_vm1, %v9761_v24  ;;  %v9764_v56 = vld [vmem:[#allocation35_spill] sm:$0xff]  ;;  %v9765_v43 = vld [vmem:[#allocation33_spill] sm:$0xff]  ;;  %v9766_v24 = vld [vmem:[#allocation48_spill] sm:$0xff] }
 0x17c   : > { %6159 = vmatmul.msk.f32.gmra.mxu2 %vm414_vm1, %v2096_v14  ;;  %v882_v28 = vadd.f32 %v9765_v43, %v9764_v56  ;;  %v9770_v56 = vld [vmem:[#allocation42_spill] sm:$0xff]  ;;  %v9771_v43 = vld [vmem:[#allocation40_spill] sm:$0xff] }
 0x17d   : > { %6057 = vmatmul.msk.f32.gmra.mxu3 %vm414_vm1, %v9752_v18  ;;  %v2046_v60 = vadd.f32 %v1956_v2, %v1768_v33  ;;  %v9767_v2 = vld [vmem:[#allocation39_spill] sm:$0xff] }
 0x17f   : > { %v2238_v49 = vpop.f32.mrf.mxu2  ;;  %v7560_v12 = vadd.f32 %v2235_v50, %v2046_v60  ;;  %v1962_v8 = vpop.f32.mrf.mxu1  ;;  %v1213_v50 = vadd.f32 %v9767_v2, %v882_v28 }
 0x180   : > { %v1403_v19 = vpop.f32.mrf.mxu3  ;;  %v1684_v23 = vpop.f32.mrf.mxu0 }
 0x181   : > { %9763 = vst [vmem:[#allocation5_spill] sm:$0xff] %v7560_v12  ;;  %v1491_v29 = vadd.f32 %v1403_v19, %v1212_v1  ;;  %v1541_v1 = vld [vmem:[#allocation2 + $0x121] sm:$0xff]  ;;  %v2098_v19 = vld [vmem:[#allocation2 + $0x138] sm:$0xff] }
 0x182   : > { %6126 = vmatmul.msk.f32.gmra.mxu1 %vm414_vm1, %v7205_v38 }
 0x183   : > { %v1769_v55 = vadd.f32 %v1681_v54, %v1491_v29  ;;  %6092 = vmatmul.msk.f32.gmra.mxu0 %vm414_vm1, %v9766_v24  ;;  %v9769_v29 = vld [vmem:[#allocation6_spill] sm:$0xff]  ;;  %v885_v24 = vadd.f32 %v9771_v43, %v9770_v56 }
 0x184   : > { %6160 = vmatmul.msk.f32.gmra.mxu2 %vm414_vm1, %v2097_v44 }
 0x185   : > { %6058 = vmatmul.msk.f32.gmra.mxu3 %vm414_vm1, %v7197_v13  ;;  %v2047_v18 = vadd.f32 %v1959_v37, %v1769_v55  ;;  %v9772_v37 = vld [vmem:[#allocation45_spill] sm:$0xff] }
 0x187   : > { %v7572_v45 = vadd.f32 %v2238_v49, %v2047_v18  ;;  %v1965_v33 = vpop.f32.mrf.mxu1  ;;  %v2241_v60 = vpop.f32.mrf.mxu2  ;;  %v1214_v49 = vadd.f32 %v9772_v37, %v885_v24  ;;  %v1543_v37 = vld [vmem:[#allocation2 + $0x139] sm:$0xff] }
 0x188   : > { %v1406_v38 = vpop.f32.mrf.mxu3  ;;  %v1687_v61 = vpop.f32.mrf.mxu0 }
 0x189   : > { %9768 = vst [vmem:[#allocation4_spill] sm:$0xff] %v7572_v45  ;;  %v1492_v54 = vadd.f32 %v1406_v38, %v1213_v50  ;;  %v1542_v50 = vld [vmem:[#allocation2 + $0x129] sm:$0xff]  ;;  %v2099_v38 = vld [vmem:[#allocation2 + $0x140] sm:$0xff]  ;;  %v9774_v45 = vld [vmem:[#allocation11_spill] sm:$0xff] }
 0x18a   : > { %6127 = vmatmul.msk.f32.gmra.mxu1 %vm414_vm1, %v9769_v29 }
 0x18b   : > { %v1770_v12 = vadd.f32 %v1684_v23, %v1492_v54  ;;  %6093 = vmatmul.msk.f32.gmra.mxu0 %vm414_vm1, %v1541_v1  ;;  %v9775_v1 = vld [vmem:[#allocation47_spill] sm:$0xff]  ;;  %v9776_v54 = vld [vmem:[#allocation46_spill] sm:$0xff] }
 0x18c   : > { %6161 = vmatmul.msk.f32.gmra.mxu2 %vm414_vm1, %v2098_v19  ;;  %v888_v56 = vadd.f32 %v9776_v54, %v9775_v1 }
 0x18d   : > { %6059 = vmatmul.msk.f32.gmra.mxu3 %vm414_vm1, %v2096_v14  ;;  %v2048_v13 = vadd.f32 %v1962_v8, %v1770_v12  ;;  %v9777_v8 = vld [vmem:[#allocation50_spill] sm:$0xff] }
 0x18f   : > { %v7582_v28 = vadd.f32 %v2241_v60, %v2048_v13  ;;  %v1968_v55 = vpop.f32.mrf.mxu1  ;;  %v2244_v23 = vpop.f32.mrf.mxu2  ;;  %v1215_v60 = vadd.f32 %v9777_v8, %v888_v56  ;;  %v1544_v8 = vld [vmem:[#allocation2 + $0x141] sm:$0xff] }
 0x190   : > { %v1409_v18 = vpop.f32.mrf.mxu3  ;;  %v1690_v2 = vpop.f32.mrf.mxu0 }
 0x191   : > { %9773 = vst [vmem:[#allocation15_spill] sm:$0xff] %v7582_v28  ;;  %v1493_v29 = vadd.f32 %v1409_v18, %v1214_v49  ;;  %v2100_v49 = vld [vmem:[#allocation2 + $0x150] sm:$0xff]  ;;  %v9778_v28 = vld [vmem:[#allocation17_spill] sm:$0xff] }
 0x192   : > { %6128 = vmatmul.msk.f32.gmra.mxu1 %vm414_vm1, %v9774_v45 }
 0x193   : > { %v1771_v14 = vadd.f32 %v1687_v61, %v1493_v29  ;;  %6094 = vmatmul.msk.f32.gmra.mxu0 %vm414_vm1, %v1542_v50  ;;  %v408_v61 = vld [vmem:[%s6720_s26 + $0x180] sm:$0xff]  ;;  %v9780_v29 = vld [vmem:[#allocation51_spill] sm:$0xff] }
 0x194   : > { %6162 = vmatmul.msk.f32.gmra.mxu2 %vm414_vm1, %v2099_v38  ;;  %v9779_v50 = vld [vmem:[#allocation52_spill] sm:$0xff]  ;;  %464 = vst.msk [vmem:[#allocation2 + $0x180] sm:$0xff] %vm414_vm1, %v408_v61 }
 0x195   : > { %6060 = vmatmul.msk.f32.gmra.mxu3 %vm414_vm1, %v2097_v44  ;;  %v2049_v12 = vadd.f32 %v1965_v33, %v1771_v14  ;;  %v891_v1 = vadd.f32 %v9780_v29, %v9779_v50 }
 0x197   : > { %v7592_v43 = vadd.f32 %v2244_v23, %v2049_v12  ;;  %v1971_v24 = vpop.f32.mrf.mxu1  ;;  %v2247_v44 = vpop.f32.mrf.mxu2  ;;  %v1216_v23 = vadd.f32 %v7233_v25, %v891_v1 }
 0x198   : > { %v1412_v13 = vpop.f32.mrf.mxu3  ;;  %v1693_v45 = vpop.f32.mrf.mxu0 }
 0x199   : > { %v1494_v18 = vadd.f32 %v1412_v13, %v1215_v60  ;;  %v9781_v13 = vld [vmem:[#allocation24_spill] sm:$0xff] }
 0x19a   : > { %6129 = vmatmul.msk.f32.gmra.mxu1 %vm414_vm1, %v9778_v28 }
 0x19b   : > { %v1772_v54 = vadd.f32 %v1690_v2, %v1494_v18  ;;  %6095 = vmatmul.msk.f32.gmra.mxu0 %vm414_vm1, %v1543_v37  ;;  %v2101_v2 = vld [vmem:[#allocation2 + $0x158] sm:$0xff]  ;;  %v409_v37 = vld [vmem:[%s6720_s26 + $0x188] sm:$0xff] }
 0x19c   : > { %6163 = vmatmul.msk.f32.gmra.mxu2 %vm414_vm1, %v2100_v49  ;;  %v9782_v18 = vld [vmem:[#allocation53_spill] sm:$0xff]  ;;  %465 = vst.msk [vmem:[#allocation2 + $0x188] sm:$0xff] %vm414_vm1, %v409_v37  ;;  %v9784_v37 = vld [vmem:[#allocation38_spill] sm:$0xff] }
 0x19d   : > { %6061 = vmatmul.msk.f32.gmra.mxu3 %vm414_vm1, %v2098_v19  ;;  %v2050_v33 = vadd.f32 %v1968_v55, %v1772_v54  ;;  %v894_v61 = vadd.f32 %v9782_v18, %v7237_v7  ;;  %v1545_v54 = vld [vmem:[#allocation2 + $0x151] sm:$0xff]  ;;  %v412_v18 = vld [vmem:[%s6720_s26 + $0x1a0] sm:$0xff] }
 0x19e   : > { %468 = vst.msk [vmem:[#allocation2 + $0x1a0] sm:$0xff] %vm414_vm1, %v412_v18 }
 0x19f   : > { %v7604_v56 = vadd.f32 %v2247_v44, %v2050_v33  ;;  %v1974_v28 = vpop.f32.mrf.mxu1  ;;  %v1217_v55 = vadd.f32 %v7250_v34, %v894_v61  ;;  %v2102_v44 = vld [vmem:[#allocation2 + $0x168] sm:$0xff]  ;;  %v411_v33 = vld [vmem:[%s6720_s26 + $0x198] sm:$0xff]  ;;  %v410_v34 = vld [vmem:[%s6720_s26 + $0x190] sm:$0x3]  ;;  %v900_v61 = vadd.f32 %v7269_v41, %v7271_v30  ;;  %v903_v30 = vadd.f32 %v7286_v47, %v7288_v36 }
 0x1a0   : > { %v1415_v14 = vpop.f32.mrf.mxu3  ;;  %v1696_v12 = vpop.f32.mrf.mxu0  ;;  %467 = vst.msk [vmem:[#allocation2 + $0x198] sm:$0xff] %vm414_vm1, %v411_v33  ;;  %v9785_v41 = vld [vmem:[#allocation44_spill] sm:$0xff]  ;;  %v906_v47 = vadd.f32 %v7303_v52, %v7305_v42  ;;  %v909_v52 = vadd.f32 %v7320_v58, %v7322_v48  ;;  %v912_v58 = vadd.f32 %v7337_v63, %v7339_v53  ;;  %v915_v63 = vadd.f32 %v7354_v5, %v7356_v59 }
 0x1a1   : > { %v1495_v60 = vadd.f32 %v1415_v14, %v1216_v23  ;;  %v897_v23 = vadd.f32 %v7252_v35, %v7254_v31  ;;  %466 = vst.msk [vmem:[#allocation2 + $0x190] sm:$0x3] %vm417_vm2, %v410_v34  ;;  %v1546_v35 = vld [vmem:[#allocation2 + $0x159] sm:$0xff]  ;;  %v918_v5 = vadd.f32 %v7371_v10, %v7373_v0  ;;  %v921_v10 = vadd.f32 %v7388_v16, %v7390_v6  ;;  %v7709_v6 = vpop.f32.mrf.mxu2 }
 0x1a2   : > { %6130 = vmatmul.msk.f32.gmra.mxu1 %vm414_vm1, %v9781_v13  ;;  %v924_v16 = vadd.f32 %v7405_v21, %v7407_v11  ;;  %v927_v21 = vadd.f32 %v7422_v27, %v7424_v17  ;;  %v9787_v27 = vld [vmem:[#allocation58_spill] sm:$0xff] }
 0x1a3   : > { %v1773_v19 = vadd.f32 %v1693_v45, %v1495_v60  ;;  %6096 = vmatmul.msk.f32.gmra.mxu0 %vm414_vm1, %v1544_v8  ;;  %v9783_v45 = vld [vmem:[#allocation31_spill] sm:$0xff]  ;;  %v2105_v34 = vld [vmem:[#allocation2 + $0x188] sm:$0xff]  ;;  %v930_v17 = vadd.f32 %v9787_v27, %v7441_v22  ;;  %v9789_v22 = vld [vmem:[#allocation62_spill] sm:$0xff] }
 0x1a4   : > { %6164 = vmatmul.msk.f32.gmra.mxu2 %vm414_vm1, %v2101_v2 }
 0x1a5   : > { %6062 = vmatmul.msk.f32.gmra.mxu3 %vm414_vm1, %v2099_v38  ;;  %v7615_v25 = vadd.f32 %v1971_v24, %v1773_v19  ;;  %v1218_v24 = vadd.f32 %v7267_v40, %v897_v23 }
 0x1a7   : > { %v1977_v50 = vpop.f32.mrf.mxu1  ;;  %v2106_v18 = vld [vmem:[#allocation2 + $0x198] sm:$0xff] }
 0x1a8   : > { %v1418_v29 = vpop.f32.mrf.mxu3  ;;  %v1699_v1 = vpop.f32.mrf.mxu0 }
 0x1a9   : > { %v1496_v7 = vadd.f32 %v1418_v29, %v1217_v55 }
 0x1aa   : > { %6131 = vmatmul.msk.f32.gmra.mxu1 %vm414_vm1, %v9783_v45 }
 0x1ab   : > { %v1774_v14 = vadd.f32 %v1696_v12, %v1496_v7  ;;  %6097 = vmatmul.msk.f32.gmra.mxu0 %vm414_vm1, %v1545_v54  ;;  %v2103_v12 = vld [vmem:[#allocation2 + $0x170] sm:$0xff]  ;;  %v2104_v7 = vld [vmem:[#allocation2 + $0x180] sm:$0xff] }
 0x1ac   : > { %6165 = vmatmul.msk.f32.gmra.mxu2 %vm414_vm1, %v2102_v44  ;;  %v1547_v54 = vld [vmem:[#allocation2 + $0x169] sm:$0xff] }
 0x1ad   : > { %6063 = vmatmul.msk.f32.gmra.mxu3 %vm414_vm1, %v2100_v49  ;;  %v7628_v38 = vadd.f32 %v1974_v28, %v1774_v14  ;;  %v1219_v28 = vadd.f32 %v7284_v46, %v900_v61  ;;  %v1548_v14 = vld [vmem:[#allocation2 + $0x171] sm:$0xff] }
 0x1af   : > { %v1980_v8 = vpop.f32.mrf.mxu1 }
 0x1b0   : > { %v1421_v60 = vpop.f32.mrf.mxu3  ;;  %v1702_v31 = vpop.f32.mrf.mxu0 }
 0x1b1   : > { %v1497_v13 = vadd.f32 %v1421_v60, %v1218_v24  ;;  %v9786_v60 = vld [vmem:[#allocation49_spill] sm:$0xff] }
 0x1b2   : > { %6132 = vmatmul.msk.f32.gmra.mxu1 %vm414_vm1, %v9784_v37  ;;  %v1549_v37 = vld [vmem:[#allocation2 + $0x181] sm:$0xff] }
 0x1b3   : > { %v1775_v49 = vadd.f32 %v1699_v1, %v1497_v13  ;;  %6098 = vmatmul.msk.f32.gmra.mxu0 %vm414_vm1, %v1546_v35 }
 0x1b4   : > { %6166 = vmatmul.msk.f32.gmra.mxu2 %vm414_vm1, %v2103_v12 }
 0x1b5   : > { %6064 = vmatmul.msk.f32.gmra.mxu3 %vm414_vm1, %v2101_v2  ;;  %v7641_v40 = vadd.f32 %v1977_v50, %v1775_v49  ;;  %v1220_v2 = vadd.f32 %v7301_v51, %v903_v30 }
 0x1b7   : > { %v1983_v19 = vpop.f32.mrf.mxu1 }
 0x1b8   : > { %v1424_v55 = vpop.f32.mrf.mxu3  ;;  %v1705_v29 = vpop.f32.mrf.mxu0 }
 0x1b9   : > { %v1498_v45 = vadd.f32 %v1424_v55, %v1219_v28  ;;  %v1828_v28 = vld [vmem:[#allocation2 + $0x18a] sm:$0xff] }
 0x1ba   : > { %6133 = vmatmul.msk.f32.gmra.mxu1 %vm414_vm1, %v9785_v41 }
 0x1bb   : > { %v1776_v1 = vadd.f32 %v1702_v31, %v1498_v45  ;;  %6099 = vmatmul.msk.f32.gmra.mxu0 %vm414_vm1, %v1547_v54  ;;  %v1827_v31 = vld [vmem:[#allocation2 + $0x182] sm:$0xff] }
 0x1bc   : > { %6167 = vmatmul.msk.f32.gmra.mxu2 %vm414_vm1, %v2104_v7  ;;  %v2107_v54 = vld [vmem:[#allocation2 + $0x1a0] sm:$0xff] }
 0x1bd   : > { %6065 = vmatmul.msk.f32.gmra.mxu3 %vm414_vm1, %v2102_v44  ;;  %v7651_v46 = vadd.f32 %v1980_v8, %v1776_v1  ;;  %v1221_v44 = vadd.f32 %v7318_v57, %v906_v47  ;;  %v2633_v47 = vld [vmem:[#allocation2 + $0x3a] sm:$0xff] }
 0x1bf   : > { %v1986_v50 = vpop.f32.mrf.mxu1 }
 0x1c0   : > { %v1427_v33 = vpop.f32.mrf.mxu3  ;;  %v1708_v23 = vpop.f32.mrf.mxu0 }
 0x1c1   : > { %v1499_v24 = vadd.f32 %v1427_v33, %v1220_v2  ;;  %v2632_v2 = vld [vmem:[#allocation2 + $0x32] sm:$0xff] }
 0x1c2   : > { %6134 = vmatmul.msk.f32.gmra.mxu1 %vm414_vm1, %v9786_v60  ;;  %v2354_v33 = vld [vmem:[#allocation2 + $0x31] sm:$0xff] }
 0x1c3   : > { %v1777_v36 = vadd.f32 %v1705_v29, %v1499_v24  ;;  %6100 = vmatmul.msk.f32.gmra.mxu0 %vm414_vm1, %v1548_v14  ;;  %v1550_v29 = vld [vmem:[#allocation2 + $0x189] sm:$0xff] }
 0x1c4   : > { %6168 = vmatmul.msk.f32.gmra.mxu2 %vm414_vm1, %v2105_v34 }
 0x1c5   : > { %6066 = vmatmul.msk.f32.gmra.mxu3 %vm414_vm1, %v2103_v12  ;;  %v7661_v51 = vadd.f32 %v1983_v19, %v1777_v36  ;;  %v1222_v12 = vadd.f32 %v7335_v62, %v909_v52  ;;  %v2356_v52 = vld [vmem:[#allocation2 + $0x49] sm:$0xff] }
 0x1c7   : > { %v1989_v8 = vpop.f32.mrf.mxu1 }
 0x1c8   : > { %v1430_v35 = vpop.f32.mrf.mxu3  ;;  %v1711_v13 = vpop.f32.mrf.mxu0 }
 0x1c9   : > { %v1500_v61 = vadd.f32 %v1430_v35, %v1221_v44  ;;  %v2355_v44 = vld [vmem:[#allocation2 + $0x39] sm:$0xff] }
 0x1ca   : > { %6135 = vmatmul.msk.f32.gmra.mxu1 %vm414_vm1, %v1827_v31 }
 0x1cb   : > { %v1778_v42 = vadd.f32 %v1708_v23, %v1500_v61  ;;  %6101 = vmatmul.msk.f32.gmra.mxu0 %vm414_vm1, %v1549_v37  ;;  %v6590_v23 = vld [vmem:[#allocation2 + $0x19] sm:$0xff] }
 0x1cc   : > { %6169 = vmatmul.msk.f32.gmra.mxu2 %vm414_vm1, %v2106_v18  ;;  %v2634_v18 = vld [vmem:[#allocation2 + $0x4a] sm:$0xff] }
 0x1cd   : > { %6067 = vmatmul.msk.f32.gmra.mxu3 %vm414_vm1, %v2104_v7  ;;  %v7670_v57 = vadd.f32 %v1986_v50, %v1778_v42  ;;  %v1223_v7 = vadd.f32 %v7352_v4, %v912_v58  ;;  %v1224_v4 = vadd.f32 %v7369_v9, %v915_v63  ;;  %v1225_v9 = vadd.f32 %v7386_v15, %v918_v5  ;;  %v6592_v42 = vld [vmem:[#allocation2 + $0x31] sm:$0xff] }
 0x1ce   : > { %v1226_v15 = vadd.f32 %v7403_v20, %v921_v10  ;;  %v1228_v63 = vadd.f32 %v7437_v32, %v927_v21  ;;  %v9788_v32 = vld [vmem:[#allocation60_spill] sm:$0xff] }
 0x1cf   : > { %v1992_v49 = vpop.f32.mrf.mxu1  ;;  %v1229_v5 = vadd.f32 %v9788_v32, %v930_v17  ;;  %v2641_v32 = vld [vmem:[#allocation2 + $0x9a] sm:$0xff] }
 0x1d0   : > { %v1433_v19 = vpop.f32.mrf.mxu3  ;;  %v1714_v55 = vpop.f32.mrf.mxu0 }
 0x1d1   : > { %v1501_v45 = vadd.f32 %v1433_v19, %v1222_v12 }
 0x1d2   : > { %6136 = vmatmul.msk.f32.gmra.mxu1 %vm414_vm1, %v1828_v28 }
 0x1d3   : > { %v1779_v48 = vadd.f32 %v1711_v13, %v1501_v45  ;;  %6102 = vmatmul.msk.f32.gmra.mxu0 %vm414_vm1, %v1550_v29  ;;  %v6593_v45 = vld [vmem:[#allocation2 + $0x39] sm:$0xff] }
 0x1d4   : > { %6170 = vmatmul.msk.f32.gmra.mxu2 %vm414_vm1, %v2107_v54  ;;  %v2357_v54 = vld [vmem:[#allocation2 + $0x51] sm:$0xff] }
 0x1d5   : > { %6068 = vmatmul.msk.f32.gmra.mxu3 %vm414_vm1, %v2105_v34  ;;  %v7679_v62 = vadd.f32 %v1989_v8, %v1779_v48  ;;  %v6591_v8 = vld [vmem:[#allocation2 + $0x21] sm:$0xff]  ;;  %v1227_v48 = vadd.f32 %v7420_v26, %v924_v16 }
 0x1d7   : > { %v1995_v41 = vpop.f32.mrf.mxu1 }
 0x1d8   : > { %v1436_v30 = vpop.f32.mrf.mxu3  ;;  %v1717_v1 = vpop.f32.mrf.mxu0 }
 0x1d9   : > { %v1502_v50 = vadd.f32 %v1436_v30, %v1223_v7 }
 0x1da   : > { %6240 = vmatmul.msk.f32.vlgmr.msra.gmra.mxu1 %vm414_vm1, %v6590_v23  ;;  %v7720_v23 = vpop.f32.mrf.mxu2 }
 0x1db   : > { %v1780_v53 = vadd.f32 %v1714_v55, %v1502_v50  ;;  %6207 = vmatmul.msk.f32.vlgmr.msra.gmra.mxu0 %vm414_vm1, %v2632_v2  ;;  %v2635_v55 = vld [vmem:[#allocation2 + $0x52] sm:$0xff]  ;;  %v2358_v50 = vld [vmem:[#allocation2 + $0x61] sm:$0xff] }
 0x1dd   : > { %6173 = vmatmul.msk.f32.vlgmr.msra.gmra.mxu3 %vm414_vm1, %v2354_v33  ;;  %v7687_v14 = vadd.f32 %v1992_v49, %v1780_v53  ;;  %v6594_v33 = vld [vmem:[#allocation2 + $0x49] sm:$0xff] }
 0x1df   : > { %v1998_v34 = vpop.f32.mrf.mxu1 }
 0x1e0   : > { %v1439_v24 = vpop.f32.mrf.mxu3  ;;  %v1720_v60 = vpop.f32.mrf.mxu0 }
 0x1e1   : > { %v1503_v36 = vadd.f32 %v1439_v24, %v1224_v4  ;;  %v2637_v24 = vld [vmem:[#allocation2 + $0x6a] sm:$0xff] }
 0x1e2   : > { %6241 = vmatmul.msk.f32.gmra.mxu1 %vm414_vm1, %v6591_v8 }
 0x1e3   : > { %v1781_v59 = vadd.f32 %v1717_v1, %v1503_v36  ;;  %6208 = vmatmul.msk.f32.gmra.mxu0 %vm414_vm1, %v2633_v47  ;;  %v2636_v1 = vld [vmem:[#allocation2 + $0x62] sm:$0xff]  ;;  %v6595_v36 = vld [vmem:[#allocation2 + $0x51] sm:$0xff] }
 0x1e4   : > { %v2359_v47 = vld [vmem:[#allocation2 + $0x69] sm:$0xff] }
 0x1e5   : > { %6174 = vmatmul.msk.f32.gmra.mxu3 %vm414_vm1, %v2355_v44  ;;  %v7695_v31 = vadd.f32 %v1995_v41, %v1781_v59  ;;  %v7734_v59 = vpop.f32.mrf.mxu2 }
 0x1e7   : > { %v2001_v35 = vpop.f32.mrf.mxu1 }
 0x1e8   : > { %v1442_v13 = vpop.f32.mrf.mxu3  ;;  %v1723_v37 = vpop.f32.mrf.mxu0 }
 0x1e9   : > { %v1504_v61 = vadd.f32 %v1442_v13, %v1225_v9 }
 0x1ea   : > { %6242 = vmatmul.msk.f32.gmra.mxu1 %vm414_vm1, %v6592_v42  ;;  %v9790_v42 = vld [vmem:[#allocation61_spill] sm:$0xff] }
 0x1eb   : > { %v1782_v0 = vadd.f32 %v1720_v60, %v1504_v61  ;;  %6209 = vmatmul.msk.f32.gmra.mxu0 %vm414_vm1, %v2634_v18  ;;  %v2360_v61 = vld [vmem:[#allocation2 + $0x79] sm:$0xff]  ;;  %v933_v10 = vadd.f32 %v9790_v42, %v9789_v22 }
 0x1ed   : > { %6175 = vmatmul.msk.f32.gmra.mxu3 %vm414_vm1, %v2356_v52  ;;  %v7703_v12 = vadd.f32 %v1998_v34, %v1782_v0  ;;  %v6596_v52 = vld [vmem:[#allocation2 + $0x61] sm:$0xff] }
 0x1ef   : > { %v2004_v49 = vpop.f32.mrf.mxu1 }
 0x1f0   : > { %v1445_v28 = vpop.f32.mrf.mxu3  ;;  %v1726_v19 = vpop.f32.mrf.mxu0 }
 0x1f1   : > { %v1505_v29 = vadd.f32 %v1445_v28, %v1226_v15 }
 0x1f2   : > { %6243 = vmatmul.msk.f32.gmra.mxu1 %vm414_vm1, %v6593_v45  ;;  %v7744_v45 = vpop.f32.mrf.mxu2 }
 0x1f3   : > { %v1783_v58 = vadd.f32 %v1723_v37, %v1505_v29  ;;  %6210 = vmatmul.msk.f32.gmra.mxu0 %vm414_vm1, %v2635_v55  ;;  %v2638_v37 = vld [vmem:[#allocation2 + $0x7a] sm:$0xff] }
 0x1f5   : > { %6176 = vmatmul.msk.f32.gmra.mxu3 %vm414_vm1, %v2357_v54  ;;  %v7713_v20 = vadd.f32 %v2001_v35, %v1783_v58  ;;  %v2639_v54 = vld [vmem:[#allocation2 + $0x82] sm:$0xff] }
 0x1f6   : > { %v2361_v58 = vld [vmem:[#allocation2 + $0x81] sm:$0xff] }
 0x1f7   : > { %v2007_v7 = vpop.f32.mrf.mxu1 }
 0x1f8   : > { %v1448_v41 = vpop.f32.mrf.mxu3  ;;  %v1729_v30 = vpop.f32.mrf.mxu0 }
 0x1f9   : > { %v1506_v2 = vadd.f32 %v1448_v41, %v1227_v48  ;;  %v6597_v48 = vld [vmem:[#allocation2 + $0x69] sm:$0xff] }
 0x1fa   : > { %6244 = vmatmul.msk.f32.gmra.mxu1 %vm414_vm1, %v6594_v33  ;;  %v9793_v41 = vld [vmem:[#allocation65_spill] sm:$0xff] }
 0x1fb   : > { %v1784_v11 = vadd.f32 %v1726_v19, %v1506_v2  ;;  %6211 = vmatmul.msk.f32.gmra.mxu0 %vm414_vm1, %v2636_v1 }
 0x1fd   : > { %6177 = vmatmul.msk.f32.gmra.mxu3 %vm414_vm1, %v2358_v50  ;;  %v7723_v26 = vadd.f32 %v2004_v49, %v1784_v11  ;;  %v9791_v49 = vld [vmem:[#allocation64_spill] sm:$0xff]  ;;  %v9794_v50 = vld [vmem:[#allocation10_spill] sm:$0xff] }
 0x1fe   : > { %v1230_v28 = vadd.f32 %v9791_v49, %v933_v10  ;;  %v2642_v10 = vld [vmem:[#allocation2 + $0xaa] sm:$0xff] }
 0x1ff   : > { %v2010_v53 = vpop.f32.mrf.mxu1 }
 0x200   : > { %v1451_v4 = vpop.f32.mrf.mxu3  ;;  %v1732_v34 = vpop.f32.mrf.mxu0 }
 0x201   : > { %v1507_v60 = vadd.f32 %v1451_v4, %v1228_v63 }
 0x202   : > { %6245 = vmatmul.msk.f32.gmra.mxu1 %vm414_vm1, %v6595_v36 }
 0x203   : > { %v1785_v44 = vadd.f32 %v1729_v30, %v1507_v60  ;;  %6212 = vmatmul.msk.f32.gmra.mxu0 %vm414_vm1, %v2637_v24  ;;  %v6598_v24 = vld [vmem:[#allocation2 + $0x79] sm:$0xff]  ;;  %v7755_v60 = vpop.f32.mrf.mxu2 }
 0x205   : > { %6178 = vmatmul.msk.f32.gmra.mxu3 %vm414_vm1, %v2359_v47  ;;  %v7731_v8 = vadd.f32 %v2007_v7, %v1785_v44  ;;  %v9792_v7 = vld [vmem:[#allocation66_spill] sm:$0xff] }
 0x206   : > { %v936_v30 = vadd.f32 %v9793_v41, %v9792_v7  ;;  %v2643_v7 = vld [vmem:[#allocation2 + $0xb2] sm:$0xff]  ;;  %v9797_v41 = vld [vmem:[#allocation56_spill] sm:$0xff] }
 0x207   : > { %v2013_v9 = vpop.f32.mrf.mxu1 }
 0x208   : > { %v1454_v35 = vpop.f32.mrf.mxu3  ;;  %v1735_v13 = vpop.f32.mrf.mxu0  ;;  %v1231_v33 = vadd.f32 %v9794_v50, %v936_v30  ;;  %v6601_v50 = vld [vmem:[#allocation2 + $0x99] sm:$0xff] }
 0x209   : > { %v1508_v18 = vadd.f32 %v1454_v35, %v1229_v5  ;;  %v9795_v5 = vld [vmem:[#allocation54_spill] sm:$0xff]  ;;  %v2363_v35 = vld [vmem:[#allocation2 + $0x99] sm:$0xff] }
 0x20a   : > { %6246 = vmatmul.msk.f32.gmra.mxu1 %vm414_vm1, %v6596_v52 }
 0x20b   : > { %v1786_v0 = vadd.f32 %v1732_v34, %v1508_v18  ;;  %6213 = vmatmul.msk.f32.gmra.mxu0 %vm414_vm1, %v2638_v37  ;;  %v2362_v34 = vld [vmem:[#allocation2 + $0x91] sm:$0xff]  ;;  %v7764_v18 = vpop.f32.mrf.mxu2 }
 0x20d   : > { %6179 = vmatmul.msk.f32.gmra.mxu3 %vm414_vm1, %v2360_v61  ;;  %v7741_v15 = vadd.f32 %v2010_v53, %v1786_v0  ;;  %v2640_v53 = vld [vmem:[#allocation2 + $0x92] sm:$0xff] }
 0x20e   : > { %v9796_v0 = vld [vmem:[#allocation55_spill] sm:$0xff] }
 0x20f   : > { %v2016_v19 = vpop.f32.mrf.mxu1 }
 0x210   : > { %v1457_v55 = vpop.f32.mrf.mxu3  ;;  %v1738_v29 = vpop.f32.mrf.mxu0 }
 0x211   : > { %v1509_v16 = vadd.f32 %v1457_v55, %v1230_v28  ;;  %v2364_v28 = vld [vmem:[#allocation2 + $0xa9] sm:$0xff] }
 0x212   : > { %6247 = vmatmul.msk.f32.gmra.mxu1 %vm414_vm1, %v6597_v48 }
 0x213   : > { %v1787_v1 = vadd.f32 %v1735_v13, %v1509_v16  ;;  %6214 = vmatmul.msk.f32.gmra.mxu0 %vm414_vm1, %v2639_v54  ;;  %v6599_v13 = vld [vmem:[#allocation2 + $0x81] sm:$0xff]  ;;  %v7775_v54 = vpop.f32.mrf.mxu2 }
 0x215   : > { %6180 = vmatmul.msk.f32.gmra.mxu3 %vm414_vm1, %v2361_v58  ;;  %v7751_v2 = vadd.f32 %v2013_v9, %v1787_v1  ;;  %v2365_v1 = vld [vmem:[#allocation2 + $0xb1] sm:$0xff] }
 0x217   : > { %v2019_v21 = vpop.f32.mrf.mxu1 }
 0x218   : > { %v1460_v11 = vpop.f32.mrf.mxu3  ;;  %v1741_v63 = vpop.f32.mrf.mxu0 }
 0x219   : > { %v1510_v4 = vadd.f32 %v1460_v11, %v1231_v33 }
 0x21a   : > { %6248 = vmatmul.msk.f32.gmra.mxu1 %vm414_vm1, %v6598_v24  ;;  %v9798_v24 = vld [vmem:[#allocation57_spill] sm:$0xff] }
 0x21b   : > { %v1788_v47 = vadd.f32 %v1738_v29, %v1510_v4  ;;  %6215 = vmatmul.msk.f32.gmra.mxu0 %vm414_vm1, %v2640_v53  ;;  %v2644_v4 = vld [vmem:[#allocation2 + $0xc2] sm:$0xff] }
 0x21d   : > { %6181 = vmatmul.msk.f32.gmra.mxu3 %vm414_vm1, %v2362_v34  ;;  %v7759_v36 = vadd.f32 %v2016_v19, %v1788_v47  ;;  %v6600_v19 = vld [vmem:[#allocation2 + $0x91] sm:$0xff]  ;;  %v7783_v34 = vpop.f32.mrf.mxu2 }
 0x21f   : > { %v2022_v27 = vpop.f32.mrf.mxu1 }
 0x220   : > { %v1463_v17 = vpop.f32.mrf.mxu3  ;;  %v1744_v44 = vpop.f32.mrf.mxu0 }
 0x221   : > { %v1511_v9 = vadd.f32 %v1463_v17, %v9795_v5  ;;  %v6602_v17 = vld [vmem:[#allocation2 + $0xa9] sm:$0xff] }
 0x222   : > { %6249 = vmatmul.msk.f32.gmra.mxu1 %vm414_vm1, %v6599_v13 }
 0x223   : > { %v1789_v37 = vadd.f32 %v1741_v63, %v1511_v9  ;;  %6216 = vmatmul.msk.f32.gmra.mxu0 %vm414_vm1, %v2641_v32  ;;  %v6632_v32 = vmov 0.0   ;;  %v3324_v9 = vld [vmem:[%s9581_s4] sm:$0xff] }
 0x224   : > { %3208 = vst.msk [vmem:[#allocation3 + $0x18] sm:$0xff] %vm3203_vm3, %v6632_v32  ;;  %3679 = vmatpush.msrb.mxu3 %v3324_v9  ;;  %v9801_v9 = vld [vmem:[#allocation67_spill] sm:$0xff] }
 0x225   : > { %6182 = vmatmul.msk.f32.gmra.mxu3 %vm414_vm1, %v2363_v35  ;;  %v7767_v61 = vadd.f32 %v2019_v21, %v1789_v37  ;;  %3209 = vst.msk [vmem:[#allocation3 + $0x20] sm:$0xff] %vm3203_vm3, %v6632_v32 }
 0x226   : > { %3204 = vst.msk [vmem:[#allocation3] sm:$0xff] %vm3203_vm3, %v6632_v32 }
 0x227   : > { %v2025_v52 = vpop.f32.mrf.mxu1  ;;  %3205 = vst.msk [vmem:[#allocation3 + $0x8] sm:$0xff] %vm3203_vm3, %v6632_v32 }
 0x228   : > { %v1466_v22 = vpop.f32.mrf.mxu3  ;;  %v1747_v42 = vpop.f32.mrf.mxu0  ;;  %3211 = vst.msk [vmem:[#allocation3 + $0x30] sm:$0xff] %vm3203_vm3, %v6632_v32 }
 0x229   : > { %v1512_v49 = vadd.f32 %v1466_v22, %v9796_v0  ;;  %3212 = vst.msk [vmem:[#allocation3 + $0x38] sm:$0xff] %vm3203_vm3, %v6632_v32  ;;  %v9799_v22 = vld [vmem:[#allocation59_spill] sm:$0xff] }
 0x22a   : > { %6250 = vmatmul.msk.f32.gmra.mxu1 %vm414_vm1, %v6600_v19  ;;  %3214 = vst.msk [vmem:[#allocation3 + $0x48] sm:$0xff] %vm3203_vm3, %v6632_v32  ;;  %v6603_v0 = vld [vmem:[#allocation2 + $0xb1] sm:$0xff] }
 0x22b   : > { %v1790_v55 = vadd.f32 %v1744_v44, %v1512_v49  ;;  %6217 = vmatmul.msk.f32.gmra.mxu0 %vm414_vm1, %v2642_v10  ;;  %v2367_v10 = vld [vmem:[#allocation2 + $0xc9] sm:$0xff]  ;;  %3215 = vst.msk [vmem:[#allocation3 + $0x50] sm:$0xff] %vm3203_vm3, %v6632_v32  ;;  %v7812_v49 = vpop.f32.mrf.mxu2 }
 0x22c   : > { %3217 = vst.msk [vmem:[#allocation3 + $0x60] sm:$0xff] %vm3203_vm3, %v6632_v32 }
 0x22d   : > { %6183 = vmatmul.msk.f32.gmra.mxu3 %vm414_vm1, %v2364_v28  ;;  %v7773_v29 = vadd.f32 %v2022_v27, %v1790_v55  ;;  %v2366_v27 = vld [vmem:[#allocation2 + $0xc1] sm:$0xff]  ;;  %3218 = vst.msk [vmem:[#allocation3 + $0x68] sm:$0xff] %vm3203_vm3, %v6632_v32 }
 0x22e   : > { %3220 = vst.msk [vmem:[#allocation3 + $0x78] sm:$0xff] %vm3203_vm3, %v6632_v32  ;;  %v3325_v55 = vld [vmem:[#allocation3 + $0x1] sm:$0xff] }
 0x22f   : > { %v2028_v16 = vpop.f32.mrf.mxu1  ;;  %3221 = vst.msk [vmem:[#allocation3 + $0x80] sm:$0xff] %vm3203_vm3, %v6632_v32  ;;  %6273 = vmatmul.msk.f32.vlgmr.msra.gmra.mxu2 %vm3203_vm3, %v3325_v55  ;;  %v2648_v55 = vld [vmem:[#allocation2 + $0xf2] sm:$0xff] }
 0x230   : > { %v1469_v58 = vpop.f32.mrf.mxu3  ;;  %v1750_v48 = vpop.f32.mrf.mxu0  ;;  %3223 = vst.msk [vmem:[#allocation3 + $0x90] sm:$0xff] %vm3203_vm3, %v6632_v32 }
 0x231   : > { %v1513_v30 = vadd.f32 %v1469_v58, %v9797_v41  ;;  %3224 = vst.msk [vmem:[#allocation3 + $0x98] sm:$0xff] %vm3203_vm3, %v6632_v32  ;;  %v9800_v41 = vld [vmem:[#allocation63_spill] sm:$0xff] }
 0x232   : > { %6251 = vmatmul.msk.f32.gmra.mxu1 %vm414_vm1, %v6601_v50  ;;  %3226 = vst.msk [vmem:[#allocation3 + $0xa8] sm:$0xff] %vm3203_vm3, %v6632_v32  ;;  %v6604_v50 = vld [vmem:[#allocation2 + $0xc1] sm:$0xff] }
 0x233   : > { %v1791_v33 = vadd.f32 %v1747_v42, %v1513_v30  ;;  %6218 = vmatmul.msk.f32.gmra.mxu0 %vm414_vm1, %v2643_v7  ;;  %v2646_v7 = vld [vmem:[#allocation2 + $0xda] sm:$0xff]  ;;  %3227 = vst.msk [vmem:[#allocation3 + $0xb0] sm:$0xff] %vm3203_vm3, %v6632_v32 }
 0x234   : > { %3229 = vst.msk [vmem:[#allocation3 + $0xc0] sm:$0xff] %vm3203_vm3, %v6632_v32 }
 0x235   : > { %6184 = vmatmul.msk.f32.gmra.mxu3 %vm414_vm1, %v2365_v1  ;;  %v7781_v21 = vadd.f32 %v2025_v52, %v1791_v33  ;;  %v2645_v52 = vld [vmem:[#allocation2 + $0xca] sm:$0xff]  ;;  %v2368_v1 = vld [vmem:[#allocation2 + $0xd9] sm:$0xff]  ;;  %3230 = vst.msk [vmem:[#allocation3 + $0xc8] sm:$0xff] %vm3203_vm3, %v6632_v32 }
 0x236   : > { %3232 = vst.msk [vmem:[#allocation3 + $0xd8] sm:$0xff] %vm3203_vm3, %v6632_v32 }
 0x237   : > { %v2031_v11 = vpop.f32.mrf.mxu1  ;;  %3233 = vst.msk [vmem:[#allocation3 + $0xe0] sm:$0xff] %vm3203_vm3, %v6632_v32 }
 0x238   : > { %v1472_v63 = vpop.f32.mrf.mxu3  ;;  %v1753_v53 = vpop.f32.mrf.mxu0  ;;  %3235 = vst.msk [vmem:[#allocation3 + $0xf0] sm:$0xff] %vm3203_vm3, %v6632_v32 }
 0x239   : > { %v1514_v47 = vadd.f32 %v1472_v63, %v9798_v24  ;;  %v6337_v63 = vld [vmem:[%s9581_s4 + $0x10] sm:$0xff]  ;;  %3236 = vst.msk [vmem:[#allocation3 + $0xf8] sm:$0xff] %vm3203_vm3, %v6632_v32 }
 0x23a   : > { %6252 = vmatmul.msk.f32.gmra.mxu1 %vm414_vm1, %v6602_v17  ;;  %3922 = vmatpush.msrb.mxu0 %v6337_v63  ;;  %3238 = vst.msk [vmem:[#allocation3 + $0x108] sm:$0xff] %vm3203_vm3, %v6632_v32 }
 0x23b   : > { %v1792_v44 = vadd.f32 %v1750_v48, %v1514_v47  ;;  %6219 = vmatmul.msk.f32.gmra.mxu0 %vm414_vm1, %v2644_v4  ;;  %v7851_v4 = vpop.f32.mrf.mxu2  ;;  %3239 = vst.msk [vmem:[#allocation3 + $0x110] sm:$0xff] %vm3203_vm3, %v6632_v32 }
 0x23c   : > { %3241 = vst.msk [vmem:[#allocation3 + $0x120] sm:$0xff] %vm3203_vm3, %v6632_v32 }
 0x23d   : > { %6185 = vmatmul.msk.f32.gmra.mxu3 %vm414_vm1, %v2366_v27  ;;  %v7793_v5 = vadd.f32 %v2028_v16, %v1792_v44  ;;  %v2647_v44 = vld [vmem:[#allocation2 + $0xe2] sm:$0xff]  ;;  %3242 = vst.msk [vmem:[#allocation3 + $0x128] sm:$0xff] %vm3203_vm3, %v6632_v32 }
 0x23e   : > { %3244 = vst.msk [vmem:[#allocation3 + $0x138] sm:$0xff] %vm3203_vm3, %v6632_v32 }
 0x23f   : > { %v2034_v35 = vpop.f32.mrf.mxu1  ;;  %3245 = vst.msk [vmem:[#allocation3 + $0x140] sm:$0xff] %vm3203_vm3, %v6632_v32 }
 0x240   : > { %v1475_v13 = vpop.f32.mrf.mxu3  ;;  %v1756_v37 = vpop.f32.mrf.mxu0  ;;  %3247 = vst.msk [vmem:[#allocation3 + $0x150] sm:$0xff] %vm3203_vm3, %v6632_v32 }
 0x241   : > { %v1515_v42 = vadd.f32 %v1475_v13, %v9799_v22  ;;  %v2369_v13 = vld [vmem:[#allocation2 + $0xe1] sm:$0xff]  ;;  %3248 = vst.msk [vmem:[#allocation3 + $0x158] sm:$0xff] %vm3203_vm3, %v6632_v32 }
 0x242   : > { %6253 = vmatmul.msk.f32.gmra.mxu1 %vm414_vm1, %v6603_v0  ;;  %3250 = vst.msk [vmem:[#allocation3 + $0x168] sm:$0xff] %vm3203_vm3, %v6632_v32 }
 0x243   : > { %v1793_v28 = vadd.f32 %v1753_v53, %v1515_v42  ;;  %6220 = vmatmul.msk.f32.gmra.mxu0 %vm414_vm1, %v2645_v52  ;;  %v6370_v53 = vld [vmem:[%s9581_s4 + $0x18] sm:$0xff]  ;;  %v7882_v42 = vpop.f32.mrf.mxu2  ;;  %3251 = vst.msk [vmem:[#allocation3 + $0x170] sm:$0xff] %vm3203_vm3, %v6632_v32 }
 0x244   : > { %4197 = vmatpush.msrb.mxu1 %v6370_v53  ;;  %3253 = vst.msk [vmem:[#allocation3 + $0x180] sm:$0xff] %vm3203_vm3, %v6632_v32  ;;  %v9805_v53 = vld [vmem:[#allocation16_spill] sm:$0xff] }
 0x245   : > { %6186 = vmatmul.msk.f32.gmra.mxu3 %vm414_vm1, %v2367_v10  ;;  %v7820_v19 = vadd.f32 %v2031_v11, %v1793_v28  ;;  %v6403_v11 = vld [vmem:[%s9581_s4 + $0x20] sm:$0xff]  ;;  %3254 = vst.msk [vmem:[#allocation3 + $0x188] sm:$0xff] %vm3203_vm3, %v6632_v32 }
 0x246   : > { %4472 = vmatpush.msrb.mxu2 %v6403_v11  ;;  %3256 = vst.msk [vmem:[#allocation3 + $0x198] sm:$0xff] %vm3203_vm3, %v6632_v32  ;;  %v2649_v11 = vld [vmem:[#allocation2 + $0xfa] sm:$0xff] }
 0x247   : > { %v2037_v16 = vpop.f32.mrf.mxu1  ;;  %3257 = vst.msk [vmem:[#allocation3 + $0x1a0] sm:$0xff] %vm3203_vm3, %v6632_v32 }
 0x248   : > { %v1478_v58 = vpop.f32.mrf.mxu3  ;;  %v1759_v48 = vpop.f32.mrf.mxu0  ;;  %3210 = vst.msk [vmem:[#allocation3 + $0x28] sm:$0x3] %vm3206_vm4, %v6632_v32 }
 0x249   : > { %v1516_v30 = vadd.f32 %v1478_v58, %v9800_v41  ;;  %3207 = vst.msk [vmem:[#allocation3 + $0x10] sm:$0x3] %vm3206_vm4, %v6632_v32 }
 0x24a   : > { %6254 = vmatmul.msk.f32.gmra.mxu1 %vm414_vm1, %v6604_v50  ;;  %3213 = vst.msk [vmem:[#allocation3 + $0x40] sm:$0x3] %vm3206_vm4, %v6632_v32 }
 0x24b   : > { %v1794_v33 = vadd.f32 %v1756_v37, %v1516_v30  ;;  %6221 = vmatmul.msk.f32.gmra.mxu0 %vm414_vm1, %v2646_v7  ;;  %v6605_v37 = vld [vmem:[#allocation2 + $0xc9] sm:$0xff]  ;;  %v6606_v7 = vld [vmem:[#allocation2 + $0xd9] sm:$0xff]  ;;  %v7914_v63 = vpop.f32.mrf.mxu2  ;;  %3216 = vst.msk [vmem:[#allocation3 + $0x58] sm:$0x3] %vm3206_vm4, %v6632_v32 }
 0x24c   : > { %3219 = vst.msk [vmem:[#allocation3 + $0x70] sm:$0x3] %vm3206_vm4, %v6632_v32 }
 0x24d   : > { %6187 = vmatmul.msk.f32.gmra.mxu3 %vm414_vm1, %v2368_v1  ;;  %v7854_v24 = vadd.f32 %v2034_v35, %v1794_v33  ;;  %3222 = vst.msk [vmem:[#allocation3 + $0x88] sm:$0x3] %vm3206_vm4, %v6632_v32 }
 0x24e   : > { %3225 = vst.msk [vmem:[#allocation3 + $0xa0] sm:$0x3] %vm3206_vm4, %v6632_v32 }
 0x24f   : > { %v2040_v47 = vpop.f32.mrf.mxu1  ;;  %3228 = vst.msk [vmem:[#allocation3 + $0xb8] sm:$0x3] %vm3206_vm4, %v6632_v32 }
 0x250   : > { %v1481_v27 = vpop.f32.mrf.mxu3  ;;  %v1762_v17 = vpop.f32.mrf.mxu0  ;;  %3231 = vst.msk [vmem:[#allocation3 + $0xd0] sm:$0x3] %vm3206_vm4, %v6632_v32 }
 0x251   : > { %v1517_v35 = vadd.f32 %v1481_v27, %v9801_v9  ;;  %v7920_v27 = vld [vmem:[%s9579_s2] ss:$0 sm:$0xff]  ;;  %3234 = vst.msk [vmem:[#allocation3 + $0xe8] sm:$0x3] %vm3206_vm4, %v6632_v32 }
 0x252   : > { %6255 = vmatmul.msk.f32.gmra.mxu1 %vm414_vm1, %v6605_v37  ;;  %3237 = vst.msk [vmem:[#allocation3 + $0x100] sm:$0x3] %vm3206_vm4, %v6632_v32 }
 0x253   : > { %v1795_v52 = vadd.f32 %v1759_v48, %v1517_v35  ;;  %6222 = vmatmul.msk.f32.gmra.mxu0 %vm414_vm1, %v2647_v44  ;;  %v2370_v48 = vld [vmem:[#allocation2 + $0xf1] sm:$0xff]  ;;  %v6607_v44 = vld [vmem:[#allocation2 + $0xe1] sm:$0xff]  ;;  %v7930_v35 = vld [vmem:[%s9580_s3] ss:$0 sm:$0xff]  ;;  %3240 = vst.msk [vmem:[#allocation3 + $0x118] sm:$0x3] %vm3206_vm4, %v6632_v32 }
 0x254   : > { %3243 = vst.msk [vmem:[#allocation3 + $0x130] sm:$0x3] %vm3206_vm4, %v6632_v32 }
 0x255   : > { %6188 = vmatmul.msk.f32.gmra.mxu3 %vm414_vm1, %v2369_v13  ;;  %v7876_v22 = vadd.f32 %v2037_v16, %v1795_v52  ;;  %v9803_v16 = vld [vmem:[#allocation20_spill] sm:$0xff]  ;;  %3246 = vst.msk [vmem:[#allocation3 + $0x148] sm:$0x3] %vm3206_vm4, %v6632_v32 }
 0x256   : > { %3249 = vst.msk [vmem:[#allocation3 + $0x160] sm:$0x3] %vm3206_vm4, %v6632_v32 }
 0x257   : > { %v7884_v10 = vpop.f32.mrf.mxu1  ;;  %3252 = vst.msk [vmem:[#allocation3 + $0x178] sm:$0x3] %vm3206_vm4, %v6632_v32 }
 0x258   : > { %9802 = vst [vmem:[#allocation27_spill] sm:$0xff] %v7884_v10  ;;  %v1484_v0 = vpop.f32.mrf.mxu3  ;;  %v2782_v28 = vpop.f32.mrf.mxu0 }
 0x259   : > { %v1518_v58 = vadd.f32 %v1484_v0, %v9803_v16  ;;  %v3326_v0 = vld [vmem:[#allocation3 + $0x9] sm:$0xff]  ;;  %v2650_v16 = vld [vmem:[#allocation2 + $0x10a] sm:$0xff]  ;;  %3255 = vst.msk [vmem:[#allocation3 + $0x190] sm:$0x3] %vm3206_vm4, %v6632_v32 }
 0x25a   : > { %6256 = vmatmul.msk.f32.gmra.mxu1 %vm414_vm1, %v6606_v7  ;;  %6274 = vmatmul.msk.f32.gmra.mxu2 %vm3203_vm3, %v3326_v0  ;;  %v2372_v7 = vld [vmem:[#allocation2 + $0x109] sm:$0xff]  ;;  %3258 = vst.msk [vmem:[#allocation3 + $0x1a8] sm:$0x3] %vm3206_vm4, %v6632_v32  ;;  %v2373_v0 = vld [vmem:[#allocation2 + $0x111] sm:$0xff] }
 0x25b   : > { %v1796_v41 = vadd.f32 %v1762_v17, %v1518_v58  ;;  %6223 = vmatmul.msk.f32.gmra.mxu0 %vm414_vm1, %v2648_v55  ;;  %v2371_v17 = vld [vmem:[#allocation2 + $0xf9] sm:$0xff] }
 0x25d   : > { %6189 = vmatmul.msk.f32.gmra.mxu3 %vm414_vm1, %v2370_v48  ;;  %v7902_v30 = vadd.f32 %v2040_v47, %v1796_v41  ;;  %v6608_v41 = vld [vmem:[#allocation2 + $0xf1] sm:$0xff] }
 0x25f   : > { %v7908_v1 = vpop.f32.mrf.mxu1 }
 0x260   : > { %9804 = vst [vmem:[#allocation7_spill] sm:$0xff] %v7908_v1  ;;  %v2504_v50 = vpop.f32.mrf.mxu3  ;;  %v2785_v33 = vpop.f32.mrf.mxu0 }
 0x261   : > { %v2600_v47 = vadd.f32 %v2504_v50, %v9805_v53  ;;  %v7957_v50 = vpop.f32.mrf.mxu2 }
 0x262   : > { %6257 = vmatmul.msk.f32.gmra.mxu1 %vm414_vm1, %v6607_v44  ;;  %v2651_v44 = vld [vmem:[#allocation2 + $0x112] sm:$0xff] }
 0x263   : > { %v2878_v9 = vadd.f32 %v2782_v28, %v2600_v47  ;;  %6224 = vmatmul.msk.f32.gmra.mxu0 %vm414_vm1, %v2649_v11 }
 0x265   : > { %v2914_v13 = vmul.f32 %v7920_v27, %v2878_v9  ;;  %6190 = vmatmul.msk.f32.gmra.mxu3 %vm414_vm1, %v2371_v17 }
 0x267   : > { %v2950_v37 = vadd.f32 %v7930_v35, %v2914_v13  ;;  %v7946_v52 = vpop.f32.mrf.mxu1 }
 0x268   : > { %9806 = vst [vmem:[#allocation23_spill] sm:$0xff] %v7946_v52  ;;  %v2507_v28 = vpop.f32.mrf.mxu3  ;;  %v2788_v55 = vpop.f32.mrf.mxu0 }
 0x269   : > { %v2982_v58 = vmax.f32 %v2950_v37, 0.0  ;;  %v2601_v48 = vadd.f32 %v2507_v28, %v7535_v3  ;;  %v6609_v28 = vld [vmem:[#allocation2 + $0xf9] sm:$0xff] }
 0x26a   : > { %6258 = vmatmul.msk.f32.gmra.mxu1 %vm414_vm1, %v6608_v41 }
 0x26b   : > { %3260 = vst.msk [vmem:[#allocation3 + $0x19] sm:$0xff] %vm3203_vm3, %v2982_v58  ;;  %v2879_v11 = vadd.f32 %v2785_v33, %v2601_v48  ;;  %6225 = vmatmul.msk.f32.gmra.mxu0 %vm414_vm1, %v2650_v16  ;;  %v7983_v58 = vpop.f32.mrf.mxu2 }
 0x26d   : > { %v2915_v3 = vmul.f32 %v7920_v27, %v2879_v11  ;;  %6191 = vmatmul.msk.f32.gmra.mxu3 %vm414_vm1, %v2372_v7  ;;  %v2652_v11 = vld [vmem:[#allocation2 + $0x122] sm:$0xff] }
 0x26f   : > { %v2951_v53 = vadd.f32 %v7930_v35, %v2915_v3  ;;  %v7972_v33 = vpop.f32.mrf.mxu1 }
 0x270   : > { %9807 = vst [vmem:[#allocation9_spill] sm:$0xff] %v7972_v33  ;;  %v2510_v47 = vpop.f32.mrf.mxu3  ;;  %v2791_v17 = vpop.f32.mrf.mxu0 }
 0x271   : > { %v2983_v9 = vmax.f32 %v2951_v53, 0.0  ;;  %v2602_v13 = vadd.f32 %v2510_v47, %v7548_v39  ;;  %v9809_v53 = vld [vmem:[#allocation5_spill] sm:$0xff] }
 0x272   : > { %v3327_v37 = vld [vmem:[#allocation3 + $0x19] sm:$0xff]  ;;  %6259 = vmatmul.msk.f32.gmra.mxu1 %vm414_vm1, %v6609_v28 }
 0x273   : > { %3261 = vst.msk [vmem:[#allocation3 + $0x21] sm:$0xff] %vm3203_vm3, %v2983_v9  ;;  %v2880_v16 = vadd.f32 %v2788_v55, %v2602_v13  ;;  %6275 = vmatmul.msk.f32.gmra.mxu2 %vm3203_vm3, %v3327_v37  ;;  %6226 = vmatmul.msk.f32.gmra.mxu0 %vm414_vm1, %v2651_v44  ;;  %v2374_v9 = vld [vmem:[#allocation2 + $0x121] sm:$0xff]  ;;  %v6610_v13 = vld [vmem:[#allocation2 + $0x109] sm:$0xff] }
 0x275   : > { %v2916_v48 = vmul.f32 %v7920_v27, %v2880_v16  ;;  %6192 = vmatmul.msk.f32.gmra.mxu3 %vm414_vm1, %v2373_v0  ;;  %v7997_v0 = vpop.f32.mrf.mxu2 }
 0x277   : > { %v2952_v39 = vadd.f32 %v7930_v35, %v2916_v48  ;;  %v7988_v32 = vpop.f32.mrf.mxu1 }
 0x278   : > { %9808 = vst [vmem:[#allocation8_spill] sm:$0xff] %v7988_v32  ;;  %v2513_v7 = vpop.f32.mrf.mxu3  ;;  %v2794_v41 = vpop.f32.mrf.mxu0  ;;  %v6612_v32 = vld [vmem:[#allocation2 + $0x121] sm:$0xff] }
 0x279   : > { %v2984_v3 = vmax.f32 %v2952_v39, 0.0  ;;  %v2603_v55 = vadd.f32 %v2513_v7, %v9809_v53  ;;  %v2653_v7 = vld [vmem:[#allocation2 + $0x12a] sm:$0xff] }
 0x27a   : > { %v3328_v47 = vld [vmem:[#allocation3 + $0x21] sm:$0xff]  ;;  %6260 = vmatmul.msk.f32.gmra.mxu1 %vm414_vm1, %v6610_v13 }
 0x27b   : > { %3262 = vst.msk [vmem:[#allocation3 + $0x31] sm:$0xff] %vm3203_vm3, %v2984_v3  ;;  %v2881_v44 = vadd.f32 %v2791_v17, %v2603_v55  ;;  %6276 = vmatmul.msk.f32.gmra.mxu2 %vm3203_vm3, %v3328_v47  ;;  %6227 = vmatmul.msk.f32.gmra.mxu0 %vm414_vm1, %v2652_v11  ;;  %v9811_v3 = vld [vmem:[#allocation4_spill] sm:$0xff]  ;;  %v2375_v47 = vld [vmem:[#allocation2 + $0x129] sm:$0xff]  ;;  %v6611_v13 = vld [vmem:[#allocation2 + $0x111] sm:$0xff] }
 0x27d   : > { %v2917_v37 = vmul.f32 %v7920_v27, %v2881_v44  ;;  %6193 = vmatmul.msk.f32.gmra.mxu3 %vm414_vm1, %v2374_v9 }
 0x27f   : > { %v2953_v28 = vadd.f32 %v7930_v35, %v2917_v37  ;;  %v8000_v16 = vpop.f32.mrf.mxu1 }
 0x280   : > { %9810 = vst [vmem:[#allocation22_spill] sm:$0xff] %v8000_v16  ;;  %v2516_v48 = vpop.f32.mrf.mxu3  ;;  %v2797_v39 = vpop.f32.mrf.mxu0 }
 0x281   : > { %v2985_v53 = vmax.f32 %v2953_v28, 0.0  ;;  %v2604_v17 = vadd.f32 %v2516_v48, %v9811_v3  ;;  %v2654_v3 = vld [vmem:[#allocation2 + $0x13a] sm:$0xff]  ;;  %v8012_v16 = vpop.f32.mrf.mxu2 }
 0x282   : > { %v3329_v55 = vld [vmem:[#allocation3 + $0x31] sm:$0xff]  ;;  %6261 = vmatmul.msk.f32.gmra.mxu1 %vm414_vm1, %v6611_v13 }
 0x283   : > { %3263 = vst.msk [vmem:[#allocation3 + $0x39] sm:$0xff] %vm3203_vm3, %v2985_v53  ;;  %v2882_v11 = vadd.f32 %v2794_v41, %v2604_v17  ;;  %6277 = vmatmul.msk.f32.gmra.mxu2 %vm3203_vm3, %v3329_v55  ;;  %6228 = vmatmul.msk.f32.gmra.mxu0 %vm414_vm1, %v2653_v7  ;;  %v9813_v53 = vld [vmem:[#allocation15_spill] sm:$0xff] }
 0x284   : > { %v2376_v55 = vld [vmem:[#allocation2 + $0x139] sm:$0xff] }
 0x285   : > { %v2918_v9 = vmul.f32 %v7920_v27, %v2882_v11  ;;  %6194 = vmatmul.msk.f32.gmra.mxu3 %vm414_vm1, %v2375_v47 }
 0x287   : > { %v2954_v44 = vadd.f32 %v7930_v35, %v2918_v9  ;;  %v8010_v37 = vpop.f32.mrf.mxu1 }
 0x288   : > { %9812 = vst [vmem:[#allocation34_spill] sm:$0xff] %v8010_v37  ;;  %v2519_v28 = vpop.f32.mrf.mxu3  ;;  %v2800_v48 = vpop.f32.mrf.mxu0 }
 0x289   : > { %v2986_v13 = vmax.f32 %v2954_v44, 0.0  ;;  %v2605_v41 = vadd.f32 %v2519_v28, %v9813_v53  ;;  %v2655_v53 = vld [vmem:[#allocation2 + $0x142] sm:$0xff] }
 0x28a   : > { %v3330_v17 = vld [vmem:[#allocation3 + $0x39] sm:$0xff]  ;;  %6262 = vmatmul.msk.f32.gmra.mxu1 %vm414_vm1, %v6612_v32 }
 0x28b   : > { %3264 = vst.msk [vmem:[#allocation3 + $0x49] sm:$0xff] %vm3203_vm3, %v2986_v13  ;;  %v2883_v7 = vadd.f32 %v2797_v39, %v2605_v41  ;;  %6278 = vmatmul.msk.f32.gmra.mxu2 %vm3203_vm3, %v3330_v17  ;;  %6229 = vmatmul.msk.f32.gmra.mxu0 %vm414_vm1, %v2654_v3  ;;  %v2377_v39 = vld [vmem:[#allocation2 + $0x141] sm:$0xff]  ;;  %v6613_v41 = vld [vmem:[#allocation2 + $0x129] sm:$0xff]  ;;  %v8026_v3 = vpop.f32.mrf.mxu2 }
 0x28d   : > { %v2919_v47 = vmul.f32 %v7920_v27, %v2883_v7  ;;  %6195 = vmatmul.msk.f32.gmra.mxu3 %vm414_vm1, %v2376_v55 }
 0x28f   : > { %v2955_v11 = vadd.f32 %v7930_v35, %v2919_v47  ;;  %v8022_v9 = vpop.f32.mrf.mxu1 }
 0x290   : > { %9814 = vst [vmem:[#allocation12_spill] sm:$0xff] %v8022_v9  ;;  %v2522_v44 = vpop.f32.mrf.mxu3  ;;  %v2803_v28 = vpop.f32.mrf.mxu0 }
 0x291   : > { %v2987_v37 = vmax.f32 %v2955_v11, 0.0  ;;  %v2606_v32 = vadd.f32 %v2522_v44, %v7592_v43  ;;  %v2656_v44 = vld [vmem:[#allocation2 + $0x152] sm:$0xff] }
 0x292   : > { %v3331_v13 = vld [vmem:[#allocation3 + $0x49] sm:$0xff]  ;;  %6263 = vmatmul.msk.f32.gmra.mxu1 %vm414_vm1, %v6613_v41 }
 0x293   : > { %3265 = vst.msk [vmem:[#allocation3 + $0x51] sm:$0xff] %vm3203_vm3, %v2987_v37  ;;  %v2884_v17 = vadd.f32 %v2800_v48, %v2606_v32  ;;  %6279 = vmatmul.msk.f32.gmra.mxu2 %vm3203_vm3, %v3331_v13  ;;  %6230 = vmatmul.msk.f32.gmra.mxu0 %vm414_vm1, %v2655_v53  ;;  %v2378_v48 = vld [vmem:[#allocation2 + $0x151] sm:$0xff]  ;;  %v6614_v32 = vld [vmem:[#allocation2 + $0x139] sm:$0xff]  ;;  %v8041_v13 = vpop.f32.mrf.mxu2 }
 0x295   : > { %v2920_v55 = vmul.f32 %v7920_v27, %v2884_v17  ;;  %6196 = vmatmul.msk.f32.gmra.mxu3 %vm414_vm1, %v2377_v39 }
 0x297   : > { %v2956_v43 = vadd.f32 %v7930_v35, %v2920_v55  ;;  %v8034_v7 = vpop.f32.mrf.mxu1 }
 0x298   : > { %9815 = vst [vmem:[#allocation30_spill] sm:$0xff] %v8034_v7  ;;  %v2525_v47 = vpop.f32.mrf.mxu3  ;;  %v2806_v11 = vpop.f32.mrf.mxu0 }
 0x299   : > { %v2988_v41 = vmax.f32 %v2956_v43, 0.0  ;;  %v2607_v9 = vadd.f32 %v2525_v47, %v7604_v56  ;;  %v2330_v56 = vadd.f32 %v7709_v6, %v7615_v25  ;;  %v2331_v6 = vadd.f32 %v7720_v23, %v7628_v38  ;;  %v413_v23 = vld [vmem:[%s6720_s26 + $0x1a8] sm:$0x3] }
 0x29a   : > { %v3332_v37 = vld [vmem:[#allocation3 + $0x51] sm:$0xff]  ;;  %6264 = vmatmul.msk.f32.gmra.mxu1 %vm414_vm1, %v6614_v32  ;;  %469 = vst.msk [vmem:[#allocation2 + $0x1a8] sm:$0x3] %vm417_vm2, %v413_v23 }
 0x29b   : > { %3266 = vst.msk [vmem:[#allocation3 + $0x61] sm:$0xff] %vm3203_vm3, %v2988_v41  ;;  %v2885_v53 = vadd.f32 %v2803_v28, %v2607_v9  ;;  %6280 = vmatmul.msk.f32.gmra.mxu2 %vm3203_vm3, %v3332_v37  ;;  %6231 = vmatmul.msk.f32.gmra.mxu0 %vm414_vm1, %v2656_v44  ;;  %v2657_v9 = vld [vmem:[#allocation2 + $0x15a] sm:$0xff] }
 0x29c   : > { %v2379_v44 = vld [vmem:[#allocation2 + $0x159] sm:$0xff]  ;;  %v6615_v32 = vld [vmem:[#allocation2 + $0x141] sm:$0xff] }
 0x29d   : > { %v2921_v39 = vmul.f32 %v7920_v27, %v2885_v53  ;;  %6197 = vmatmul.msk.f32.gmra.mxu3 %vm414_vm1, %v2378_v48  ;;  %v8058_v53 = vpop.f32.mrf.mxu2 }
 0x29f   : > { %v2957_v17 = vadd.f32 %v7930_v35, %v2921_v39  ;;  %v8048_v55 = vpop.f32.mrf.mxu1 }
 0x2a0   : > { %9816 = vst [vmem:[#allocation14_spill] sm:$0xff] %v8048_v55  ;;  %v2528_v43 = vpop.f32.mrf.mxu3  ;;  %v2809_v47 = vpop.f32.mrf.mxu0 }
 0x2a1   : > { %v2989_v28 = vmax.f32 %v2957_v17, 0.0  ;;  %v2608_v41 = vadd.f32 %v2528_v43, %v2330_v56  ;;  %v2658_v43 = vld [vmem:[#allocation2 + $0x16a] sm:$0xff] }
 0x2a2   : > { %v3333_v37 = vld [vmem:[#allocation3 + $0x61] sm:$0xff]  ;;  %6265 = vmatmul.msk.f32.gmra.mxu1 %vm414_vm1, %v6615_v32 }
 0x2a3   : > { %3267 = vst.msk [vmem:[#allocation3 + $0x69] sm:$0xff] %vm3203_vm3, %v2989_v28  ;;  %v2886_v48 = vadd.f32 %v2806_v11, %v2608_v41  ;;  %6281 = vmatmul.msk.f32.gmra.mxu2 %vm3203_vm3, %v3333_v37  ;;  %6232 = vmatmul.msk.f32.gmra.mxu0 %vm414_vm1, %v2657_v9  ;;  %v2380_v37 = vld [vmem:[#allocation2 + $0x169] sm:$0xff]  ;;  %v6616_v32 = vld [vmem:[#allocation2 + $0x151] sm:$0xff] }
 0x2a5   : > { %v2922_v25 = vmul.f32 %v7920_v27, %v2886_v48  ;;  %6198 = vmatmul.msk.f32.gmra.mxu3 %vm414_vm1, %v2379_v44  ;;  %v2332_v48 = vadd.f32 %v7734_v59, %v7641_v40  ;;  %v2333_v59 = vadd.f32 %v7744_v45, %v7651_v46  ;;  %v2334_v45 = vadd.f32 %v7755_v60, %v7661_v51 }
 0x2a7   : > { %v2958_v39 = vadd.f32 %v7930_v35, %v2922_v25  ;;  %v8061_v56 = vpop.f32.mrf.mxu1 }
 0x2a8   : > { %9817 = vst [vmem:[#allocation13_spill] sm:$0xff] %v8061_v56  ;;  %v2531_v17 = vpop.f32.mrf.mxu3  ;;  %v2812_v11 = vpop.f32.mrf.mxu0 }
 0x2a9   : > { %v2990_v28 = vmax.f32 %v2958_v39, 0.0  ;;  %v2609_v41 = vadd.f32 %v2531_v17, %v2331_v6  ;;  %v2659_v17 = vld [vmem:[#allocation2 + $0x172] sm:$0xff] }
 0x2aa   : > { %v3334_v9 = vld [vmem:[#allocation3 + $0x69] sm:$0xff]  ;;  %6266 = vmatmul.msk.f32.gmra.mxu1 %vm414_vm1, %v6616_v32  ;;  %v2381_v32 = vld [vmem:[#allocation2 + $0x171] sm:$0xff] }
 0x2ab   : > { %3268 = vst.msk [vmem:[#allocation3 + $0x79] sm:$0xff] %vm3203_vm3, %v2990_v28  ;;  %v2887_v38 = vadd.f32 %v2809_v47, %v2609_v41  ;;  %6282 = vmatmul.msk.f32.gmra.mxu2 %vm3203_vm3, %v3334_v9  ;;  %6233 = vmatmul.msk.f32.gmra.mxu0 %vm414_vm1, %v2658_v43  ;;  %v8076_v28 = vpop.f32.mrf.mxu2 }
 0x2ad   : > { %v2923_v44 = vmul.f32 %v7920_v27, %v2887_v38  ;;  %6199 = vmatmul.msk.f32.gmra.mxu3 %vm414_vm1, %v2380_v37  ;;  %v6617_v38 = vld [vmem:[#allocation2 + $0x159] sm:$0xff] }
 0x2af   : > { %v2959_v25 = vadd.f32 %v7930_v35, %v2923_v44  ;;  %v8074_v6 = vpop.f32.mrf.mxu1 }
 0x2b0   : > { %9818 = vst [vmem:[#allocation29_spill] sm:$0xff] %v8074_v6  ;;  %v2534_v39 = vpop.f32.mrf.mxu3  ;;  %v2815_v47 = vpop.f32.mrf.mxu0 }
 0x2b1   : > { %v2991_v43 = vmax.f32 %v2959_v25, 0.0  ;;  %v2610_v41 = vadd.f32 %v2534_v39, %v2332_v48  ;;  %v2660_v39 = vld [vmem:[#allocation2 + $0x182] sm:$0xff] }
 0x2b2   : > { %v3335_v9 = vld [vmem:[#allocation3 + $0x79] sm:$0xff]  ;;  %6267 = vmatmul.msk.f32.gmra.mxu1 %vm414_vm1, %v6617_v38 }
 0x2b3   : > { %3269 = vst.msk [vmem:[#allocation3 + $0x81] sm:$0xff] %vm3203_vm3, %v2991_v43  ;;  %v2888_v37 = vadd.f32 %v2812_v11, %v2610_v41  ;;  %6283 = vmatmul.msk.f32.gmra.mxu2 %vm3203_vm3, %v3335_v9  ;;  %6234 = vmatmul.msk.f32.gmra.mxu0 %vm414_vm1, %v2659_v17  ;;  %v2382_v9 = vld [vmem:[#allocation2 + $0x181] sm:$0xff]  ;;  %v6618_v38 = vld [vmem:[#allocation2 + $0x169] sm:$0xff]  ;;  %v8090_v17 = vpop.f32.mrf.mxu2 }
 0x2b5   : > { %v2924_v40 = vmul.f32 %v7920_v27, %v2888_v37  ;;  %6200 = vmatmul.msk.f32.gmra.mxu3 %vm414_vm1, %v2381_v32 }
 0x2b7   : > { %v2960_v23 = vadd.f32 %v7930_v35, %v2924_v40  ;;  %v8087_v44 = vpop.f32.mrf.mxu1 }
 0x2b8   : > { %9819 = vst [vmem:[#allocation41_spill] sm:$0xff] %v8087_v44  ;;  %v2537_v48 = vpop.f32.mrf.mxu3  ;;  %v2818_v25 = vpop.f32.mrf.mxu0  ;;  %v8301_v44 = vld [vmem:[#allocation3 + $0x78] sm:$0xff] }
 0x2b9   : > { %v2992_v43 = vmax.f32 %v2960_v23, 0.0  ;;  %v2611_v11 = vadd.f32 %v2537_v48, %v2333_v59  ;;  %v2661_v48 = vld [vmem:[#allocation2 + $0x18a] sm:$0xff] }
 0x2ba   : > { %v3336_v41 = vld [vmem:[#allocation3 + $0x81] sm:$0xff]  ;;  %6268 = vmatmul.msk.f32.gmra.mxu1 %vm414_vm1, %v6618_v38 }
 0x2bb   : > { %3270 = vst.msk [vmem:[#allocation3 + $0x91] sm:$0xff] %vm3203_vm3, %v2992_v43  ;;  %v2889_v32 = vadd.f32 %v2815_v47, %v2611_v11  ;;  %6284 = vmatmul.msk.f32.gmra.mxu2 %vm3203_vm3, %v3336_v41  ;;  %6235 = vmatmul.msk.f32.gmra.mxu0 %vm414_vm1, %v2660_v39  ;;  %v2383_v41 = vld [vmem:[#allocation2 + $0x189] sm:$0xff]  ;;  %v6619_v38 = vld [vmem:[#allocation2 + $0x171] sm:$0xff]  ;;  %v8106_v51 = vpop.f32.mrf.mxu2 }
 0x2bc   : > { %v8324_v56 = vld [vmem:[#allocation3 + $0x80] sm:$0xff] }
 0x2bd   : > { %v2925_v46 = vmul.f32 %v7920_v27, %v2889_v32  ;;  %6201 = vmatmul.msk.f32.gmra.mxu3 %vm414_vm1, %v2382_v9  ;;  %v2335_v9 = vadd.f32 %v7764_v18, %v7670_v57  ;;  %v2336_v18 = vadd.f32 %v7775_v54, %v7679_v62  ;;  %v2337_v54 = vadd.f32 %v7783_v34, %v7687_v14 }
 0x2be   : > { %v2338_v34 = vadd.f32 %v7812_v49, %v7695_v31  ;;  %v2339_v49 = vadd.f32 %v7851_v4, %v7703_v12  ;;  %9833 = vst [vmem:[#allocation39_spill] sm:$0xff] %v8324_v56 }
 0x2bf   : > { %v2961_v37 = vadd.f32 %v7930_v35, %v2925_v46  ;;  %v8100_v40 = vpop.f32.mrf.mxu1 }
 0x2c0   : > { %9820 = vst [vmem:[#allocation18_spill] sm:$0xff] %v8100_v40  ;;  %v2540_v59 = vpop.f32.mrf.mxu3  ;;  %v2821_v23 = vpop.f32.mrf.mxu0 }
 0x2c1   : > { %v2993_v43 = vmax.f32 %v2961_v37, 0.0  ;;  %v2612_v47 = vadd.f32 %v2540_v59, %v2334_v45 }
 0x2c2   : > { %v3337_v11 = vld [vmem:[#allocation3 + $0x91] sm:$0xff]  ;;  %6269 = vmatmul.msk.f32.gmra.mxu1 %vm414_vm1, %v6619_v38 }
 0x2c3   : > { %3271 = vst.msk [vmem:[#allocation3 + $0x99] sm:$0xff] %vm3203_vm3, %v2993_v43  ;;  %v2890_v39 = vadd.f32 %v2818_v25, %v2612_v47  ;;  %6285 = vmatmul.msk.f32.gmra.mxu2 %vm3203_vm3, %v3337_v11  ;;  %6236 = vmatmul.msk.f32.gmra.mxu0 %vm414_vm1, %v2661_v48  ;;  %v2662_v25 = vld [vmem:[#allocation2 + $0x19a] sm:$0xff]  ;;  %v8123_v38 = vpop.f32.mrf.mxu2 }
 0x2c4   : > { %v2384_v48 = vld [vmem:[#allocation2 + $0x199] sm:$0xff]  ;;  %v6620_v11 = vld [vmem:[#allocation2 + $0x181] sm:$0xff] }
 0x2c5   : > { %v2926_v60 = vmul.f32 %v7920_v27, %v2890_v39  ;;  %6202 = vmatmul.msk.f32.gmra.mxu3 %vm414_vm1, %v2383_v41  ;;  %v8347_v7 = vld [vmem:[#allocation3 + $0x90] sm:$0xff] }
 0x2c6   : > { %9837 = vst [vmem:[#allocation45_spill] sm:$0xff] %v8347_v7 }
 0x2c7   : > { %v2962_v32 = vadd.f32 %v7930_v35, %v2926_v60  ;;  %v8113_v46 = vpop.f32.mrf.mxu1 }
 0x2c8   : > { %9821 = vst [vmem:[#allocation37_spill] sm:$0xff] %v8113_v46  ;;  %v2543_v45 = vpop.f32.mrf.mxu3  ;;  %v2824_v37 = vpop.f32.mrf.mxu0  ;;  %v8278_v46 = vld [vmem:[#allocation3 + $0x68] sm:$0xff] }
 0x2c9   : > { %v2994_v59 = vmax.f32 %v2962_v32, 0.0  ;;  %v2613_v43 = vadd.f32 %v2543_v45, %v2335_v9 }
 0x2ca   : > { %v3338_v47 = vld [vmem:[#allocation3 + $0x99] sm:$0xff]  ;;  %6270 = vmatmul.msk.f32.gmra.mxu1 %vm414_vm1, %v6620_v11 }
 0x2cb   : > { %3272 = vst.msk [vmem:[#allocation3 + $0xa9] sm:$0xff] %vm3203_vm3, %v2994_v59  ;;  %v2891_v41 = vadd.f32 %v2821_v23, %v2613_v43  ;;  %6286 = vmatmul.msk.f32.gmra.mxu2 %vm3203_vm3, %v3338_v47  ;;  %6237 = vmatmul.msk.f32.gmra.mxu0 %vm414_vm1, %v2662_v25  ;;  %v2663_v23 = vld [vmem:[#allocation2 + $0x1a2] sm:$0xff] }
 0x2cc   : > { %v2385_v25 = vld [vmem:[#allocation2 + $0x1a1] sm:$0xff]  ;;  %v6621_v47 = vld [vmem:[#allocation2 + $0x189] sm:$0xff] }
 0x2cd   : > { %v2927_v57 = vmul.f32 %v7920_v27, %v2891_v41  ;;  %6203 = vmatmul.msk.f32.gmra.mxu3 %vm414_vm1, %v2384_v48  ;;  %v8370_v52 = vld [vmem:[#allocation3 + $0x98] sm:$0xff] }
 0x2ce   : > { %9841 = vst [vmem:[#allocation50_spill] sm:$0xff] %v8370_v52 }
 0x2cf   : > { %v2963_v39 = vadd.f32 %v7930_v35, %v2927_v57  ;;  %v8126_v60 = vpop.f32.mrf.mxu1 }
 0x2d0   : > { %9822 = vst [vmem:[#allocation21_spill] sm:$0xff] %v8126_v60  ;;  %v2546_v9 = vpop.f32.mrf.mxu3  ;;  %v2827_v32 = vpop.f32.mrf.mxu0 }
 0x2d1   : > { %v2995_v45 = vmax.f32 %v2963_v39, 0.0  ;;  %v2614_v59 = vadd.f32 %v2546_v9, %v2336_v18  ;;  %v3777_v39 = vld [vmem:[#allocation3 + $0x2] sm:$0xff] }
 0x2d2   : > { %v3339_v43 = vld [vmem:[#allocation3 + $0xa9] sm:$0xff]  ;;  %6271 = vmatmul.msk.f32.gmra.mxu1 %vm414_vm1, %v6621_v47 }
 0x2d3   : > { %3273 = vst.msk [vmem:[#allocation3 + $0xb1] sm:$0xff] %vm3203_vm3, %v2995_v45  ;;  %v2892_v48 = vadd.f32 %v2824_v37, %v2614_v59  ;;  %6287 = vmatmul.msk.f32.gmra.mxu2 %vm3203_vm3, %v3339_v43  ;;  %6238 = vmatmul.msk.f32.gmra.mxu0 %vm414_vm1, %v2663_v23  ;;  %v4052_v45 = vld [vmem:[#allocation3 + $0x18] sm:$0xff]  ;;  %v8139_v59 = vpop.f32.mrf.mxu2  ;;  %v3292_v43 = vld [vmem:[#allocation3] sm:$0xff]  ;;  %v8393_v10 = vld [vmem:[#allocation3 + $0xa8] sm:$0xff] }
 0x2d4   : > { %9845 = vst [vmem:[#allocation24_spill] sm:$0xff] %v8393_v10 }
 0x2d5   : > { %v2928_v62 = vmul.f32 %v7920_v27, %v2892_v48  ;;  %6204 = vmatmul.msk.f32.gmra.mxu3 %vm414_vm1, %v2385_v25 }
 0x2d7   : > { %v2964_v11 = vadd.f32 %v7930_v35, %v2928_v62  ;;  %v8137_v41 = vpop.f32.mrf.mxu1 }
 0x2d8   : > { %9823 = vst [vmem:[#allocation19_spill] sm:$0xff] %v8137_v41  ;;  %v2549_v57 = vpop.f32.mrf.mxu3  ;;  %v2830_v18 = vpop.f32.mrf.mxu0  ;;  %v8255_v41 = vld [vmem:[#allocation3 + $0x60] sm:$0xff] }
 0x2d9   : > { %v2996_v9 = vmax.f32 %v2964_v11, 0.0  ;;  %v2615_v37 = vadd.f32 %v2549_v57, %v2337_v54  ;;  %v3778_v11 = vld [vmem:[#allocation3 + $0xa] sm:$0xff] }
 0x2da   : > { %v3340_v23 = vld [vmem:[#allocation3 + $0xb1] sm:$0xff]  ;;  %6371 = vmatmul.msk.f32.vlgmr.msrb.gmra.mxu1 %vm3203_vm3, %v4052_v45 }
 0x2db   : > { %3274 = vst.msk [vmem:[#allocation3 + $0xc1] sm:$0xff] %vm3203_vm3, %v2996_v9  ;;  %v2893_v25 = vadd.f32 %v2827_v32, %v2615_v37  ;;  %6288 = vmatmul.msk.f32.gmra.mxu2 %vm3203_vm3, %v3340_v23  ;;  %6338 = vmatmul.msk.f32.vlgmr.msrb.gmra.mxu0 %vm3203_vm3, %v3777_v39  ;;  %v4053_v9 = vld [vmem:[#allocation3 + $0x20] sm:$0xff]  ;;  %v3293_v23 = vld [vmem:[#allocation3 + $0x8] sm:$0xff]  ;;  %v8153_v39 = vpop.f32.mrf.mxu2 }
 0x2dd   : > { %v2929_v14 = vmul.f32 %v7920_v27, %v2893_v25  ;;  %6305 = vmatmul.msk.f32.vlgmr.msrb.gmra.mxu3 %vm3203_vm3, %v3292_v43 }
 0x2df   : > { %v2965_v47 = vadd.f32 %v7930_v35, %v2929_v14  ;;  %v8150_v48 = vpop.f32.mrf.mxu1 }
 0x2e0   : > { %9824 = vst [vmem:[#allocation36_spill] sm:$0xff] %v8150_v48  ;;  %v2552_v62 = vpop.f32.mrf.mxu3  ;;  %v2833_v54 = vpop.f32.mrf.mxu0 }
 0x2e1   : > { %v2997_v57 = vmax.f32 %v2965_v47, 0.0  ;;  %v2616_v32 = vadd.f32 %v2552_v62, %v2338_v34 }
 0x2e2   : > { %v3341_v37 = vld [vmem:[#allocation3 + $0xc1] sm:$0xff]  ;;  %6372 = vmatmul.msk.f32.gmra.mxu1 %vm3203_vm3, %v4053_v9 }
 0x2e3   : > { %3275 = vst.msk [vmem:[#allocation3 + $0xc9] sm:$0xff] %vm3203_vm3, %v2997_v57  ;;  %v2894_v43 = vadd.f32 %v2830_v18, %v2616_v32  ;;  %6289 = vmatmul.msk.f32.gmra.mxu2 %vm3203_vm3, %v3341_v37  ;;  %6339 = vmatmul.msk.f32.gmra.mxu0 %vm3203_vm3, %v3778_v11  ;;  %v8165_v18 = vld [vmem:[#allocation3 + $0x30] sm:$0xff]  ;;  %v8169_v11 = vld [vmem:[#allocation3 + $0x1a] sm:$0xff]  ;;  %v8178_v4 = vpop.f32.mrf.mxu2 }
 0x2e5   : > { %v2930_v31 = vmul.f32 %v7920_v27, %v2894_v43  ;;  %6306 = vmatmul.msk.f32.gmra.mxu3 %vm3203_vm3, %v3293_v23  ;;  %v2340_v23 = vadd.f32 %v7882_v42, %v7713_v20 }
 0x2e7   : > { %v2966_v25 = vadd.f32 %v7930_v35, %v2930_v31  ;;  %v8163_v14 = vpop.f32.mrf.mxu1 }
 0x2e8   : > { %9825 = vst [vmem:[#allocation25_spill] sm:$0xff] %v8163_v14  ;;  %v2555_v34 = vpop.f32.mrf.mxu3  ;;  %v2836_v47 = vpop.f32.mrf.mxu0  ;;  %v8191_v14 = vld [vmem:[#allocation3 + $0x22] sm:$0xff] }
 0x2e9   : > { %v2998_v62 = vmax.f32 %v2966_v25, 0.0  ;;  %v2617_v57 = vadd.f32 %v2555_v34, %v2339_v49 }
 0x2ea   : > { %v8167_v32 = vld [vmem:[#allocation3 + $0xc9] sm:$0xff]  ;;  %6373 = vmatmul.msk.f32.gmra.mxu1 %vm3203_vm3, %v8165_v18 }
 0x2eb   : > { %3276 = vst.msk [vmem:[#allocation3 + $0xd9] sm:$0xff] %vm3203_vm3, %v2998_v62  ;;  %v2895_v12 = vadd.f32 %v2833_v54, %v2617_v57  ;;  %6290 = vmatmul.msk.f32.gmra.mxu2 %vm3203_vm3, %v8167_v32  ;;  %6340 = vmatmul.msk.f32.gmra.mxu0 %vm3203_vm3, %v8169_v11  ;;  %v8187_v62 = vld [vmem:[#allocation3 + $0x38] sm:$0xff] }
 0x2ed   : > { %v2931_v37 = vmul.f32 %v7920_v27, %v2895_v12  ;;  %6307 = vmatmul.msk.f32.gmra.mxu3 %vm3203_vm3, %v4052_v45  ;;  %v2341_v12 = vadd.f32 %v7914_v63, %v7723_v26 }
 0x2ef   : > { %v2967_v43 = vadd.f32 %v7930_v35, %v2931_v37  ;;  %v8185_v31 = vpop.f32.mrf.mxu1 }
 0x2f0   : > { %9826 = vst [vmem:[#allocation28_spill] sm:$0xff] %v8185_v31  ;;  %v2558_v54 = vpop.f32.mrf.mxu3  ;;  %v2839_v49 = vpop.f32.mrf.mxu0 }
 0x2f1   : > { %v2999_v25 = vmax.f32 %v2967_v43, 0.0  ;;  %v2618_v34 = vadd.f32 %v2558_v54, %v2340_v23 }
 0x2f2   : > { %v8189_v57 = vld [vmem:[#allocation3 + $0xd9] sm:$0xff]  ;;  %6374 = vmatmul.msk.f32.gmra.mxu1 %vm3203_vm3, %v8187_v62 }
 0x2f3   : > { %3277 = vst.msk [vmem:[#allocation3 + $0xe1] sm:$0xff] %vm3203_vm3, %v2999_v25  ;;  %v2896_v20 = vadd.f32 %v2836_v47, %v2618_v34  ;;  %6291 = vmatmul.msk.f32.gmra.mxu2 %vm3203_vm3, %v8189_v57  ;;  %6341 = vmatmul.msk.f32.gmra.mxu0 %vm3203_vm3, %v8191_v14  ;;  %v8209_v34 = vld [vmem:[#allocation3 + $0x48] sm:$0xff] }
 0x2f5   : > { %v2932_v42 = vmul.f32 %v7920_v27, %v2896_v20  ;;  %6308 = vmatmul.msk.f32.gmra.mxu3 %vm3203_vm3, %v4053_v9  ;;  %v8213_v20 = vld [vmem:[#allocation3 + $0x32] sm:$0xff] }
 0x2f6   : > { %v8202_v45 = vpop.f32.mrf.mxu2 }
 0x2f7   : > { %v2968_v37 = vadd.f32 %v7930_v35, %v2932_v42  ;;  %v8207_v23 = vpop.f32.mrf.mxu1  ;;  %v2342_v42 = vadd.f32 %v7957_v50, %v7731_v8 }
 0x2f8   : > { %9827 = vst [vmem:[#allocation26_spill] sm:$0xff] %v8207_v23  ;;  %v2561_v47 = vpop.f32.mrf.mxu3  ;;  %v2842_v43 = vpop.f32.mrf.mxu0  ;;  %v8232_v23 = vld [vmem:[#allocation3 + $0x50] sm:$0xff] }
 0x2f9   : > { %v3000_v54 = vmax.f32 %v2968_v37, 0.0  ;;  %v2619_v25 = vadd.f32 %v2561_v47, %v2341_v12 }
 0x2fa   : > { %v8211_v31 = vld [vmem:[#allocation3 + $0xe1] sm:$0xff]  ;;  %6375 = vmatmul.msk.f32.gmra.mxu1 %vm3203_vm3, %v8209_v34 }
 0x2fb   : > { %3278 = vst.msk [vmem:[#allocation3 + $0xf1] sm:$0xff] %vm3203_vm3, %v3000_v54  ;;  %v2897_v26 = vadd.f32 %v2839_v49, %v2619_v25  ;;  %6292 = vmatmul.msk.f32.gmra.mxu2 %vm3203_vm3, %v8211_v31  ;;  %6342 = vmatmul.msk.f32.gmra.mxu0 %vm3203_vm3, %v8213_v20 }
 0x2fd   : > { %v2933_v63 = vmul.f32 %v7920_v27, %v2897_v26  ;;  %6309 = vmatmul.msk.f32.gmra.mxu3 %vm3203_vm3, %v8165_v18  ;;  %v8236_v26 = vld [vmem:[#allocation3 + $0x3a] sm:$0xff] }
 0x2fe   : > { %v8225_v9 = vpop.f32.mrf.mxu2 }
 0x2ff   : > { %v2969_v12 = vadd.f32 %v7930_v35, %v2933_v63  ;;  %v8230_v37 = vpop.f32.mrf.mxu1 }
 0x300   : > { %9828 = vst [vmem:[#allocation43_spill] sm:$0xff] %v8230_v37  ;;  %v2564_v49 = vpop.f32.mrf.mxu3  ;;  %v2845_v47 = vpop.f32.mrf.mxu0 }
 0x301   : > { %v3001_v54 = vmax.f32 %v2969_v12, 0.0  ;;  %v2620_v25 = vadd.f32 %v2564_v49, %v2342_v42  ;;  %v2343_v42 = vadd.f32 %v7983_v58, %v7741_v15 }
 0x302   : > { %v8234_v48 = vld [vmem:[#allocation3 + $0xf1] sm:$0xff]  ;;  %6376 = vmatmul.msk.f32.gmra.mxu1 %vm3203_vm3, %v8232_v23 }
 0x303   : > { %3279 = vst.msk [vmem:[#allocation3 + $0xf9] sm:$0xff] %vm3203_vm3, %v3001_v54  ;;  %v2898_v8 = vadd.f32 %v2842_v43, %v2620_v25  ;;  %6293 = vmatmul.msk.f32.gmra.mxu2 %vm3203_vm3, %v8234_v48  ;;  %6343 = vmatmul.msk.f32.gmra.mxu0 %vm3203_vm3, %v8236_v26 }
 0x305   : > { %v2934_v50 = vmul.f32 %v7920_v27, %v2898_v8  ;;  %6310 = vmatmul.msk.f32.gmra.mxu3 %vm3203_vm3, %v8187_v62  ;;  %v8259_v8 = vld [vmem:[#allocation3 + $0x4a] sm:$0xff] }
 0x306   : > { %v8248_v63 = vpop.f32.mrf.mxu2 }
 0x307   : > { %v2970_v12 = vadd.f32 %v7930_v35, %v2934_v50  ;;  %v8253_v49 = vpop.f32.mrf.mxu1 }
 0x308   : > { %9829 = vst [vmem:[#allocation32_spill] sm:$0xff] %v8253_v49  ;;  %v2567_v43 = vpop.f32.mrf.mxu3  ;;  %v2848_v54 = vpop.f32.mrf.mxu0 }
 0x309   : > { %v3002_v25 = vmax.f32 %v2970_v12, 0.0  ;;  %v2621_v37 = vadd.f32 %v2567_v43, %v2343_v42  ;;  %v2344_v42 = vadd.f32 %v7997_v0, %v7751_v2 }
 0x30a   : > { %v8257_v60 = vld [vmem:[#allocation3 + $0xf9] sm:$0xff]  ;;  %6377 = vmatmul.msk.f32.gmra.mxu1 %vm3203_vm3, %v8255_v41 }
 0x30b   : > { %3280 = vst.msk [vmem:[#allocation3 + $0x109] sm:$0xff] %vm3203_vm3, %v3002_v25  ;;  %v2899_v15 = vadd.f32 %v2845_v47, %v2621_v37  ;;  %6294 = vmatmul.msk.f32.gmra.mxu2 %vm3203_vm3, %v8257_v60  ;;  %6344 = vmatmul.msk.f32.gmra.mxu0 %vm3203_vm3, %v8259_v8 }
 0x30d   : > { %v2935_v58 = vmul.f32 %v7920_v27, %v2899_v15  ;;  %6311 = vmatmul.msk.f32.gmra.mxu3 %vm3203_vm3, %v8209_v34  ;;  %v8282_v15 = vld [vmem:[#allocation3 + $0x52] sm:$0xff] }
 0x30e   : > { %v8271_v50 = vpop.f32.mrf.mxu2 }
 0x30f   : > { %v2971_v12 = vadd.f32 %v7930_v35, %v2935_v58  ;;  %v8276_v43 = vpop.f32.mrf.mxu1 }
 0x310   : > { %9830 = vst [vmem:[#allocation35_spill] sm:$0xff] %v8276_v43  ;;  %v2570_v37 = vpop.f32.mrf.mxu3  ;;  %v2851_v47 = vpop.f32.mrf.mxu0 }
 0x311   : > { %v3003_v25 = vmax.f32 %v2971_v12, 0.0  ;;  %v2622_v49 = vadd.f32 %v2570_v37, %v2344_v42  ;;  %v2345_v42 = vadd.f32 %v8012_v16, %v7759_v36 }
 0x312   : > { %v8280_v40 = vld [vmem:[#allocation3 + $0x109] sm:$0xff]  ;;  %6378 = vmatmul.msk.f32.gmra.mxu1 %vm3203_vm3, %v8278_v46 }
 0x313   : > { %3281 = vst.msk [vmem:[#allocation3 + $0x111] sm:$0xff] %vm3203_vm3, %v3003_v25  ;;  %v2900_v2 = vadd.f32 %v2848_v54, %v2622_v49  ;;  %6295 = vmatmul.msk.f32.gmra.mxu2 %vm3203_vm3, %v8280_v40  ;;  %6345 = vmatmul.msk.f32.gmra.mxu0 %vm3203_vm3, %v8282_v15 }
 0x315   : > { %v2936_v0 = vmul.f32 %v7920_v27, %v2900_v2  ;;  %6312 = vmatmul.msk.f32.gmra.mxu3 %vm3203_vm3, %v8232_v23  ;;  %v8305_v2 = vld [vmem:[#allocation3 + $0x62] sm:$0xff] }
 0x316   : > { %v8294_v58 = vpop.f32.mrf.mxu2 }
 0x317   : > { %v2972_v12 = vadd.f32 %v7930_v35, %v2936_v0  ;;  %v8299_v37 = vpop.f32.mrf.mxu1 }
 0x318   : > { %9831 = vst [vmem:[#allocation33_spill] sm:$0xff] %v8299_v37  ;;  %v2573_v49 = vpop.f32.mrf.mxu3  ;;  %v2854_v54 = vpop.f32.mrf.mxu0 }
 0x319   : > { %v3004_v25 = vmax.f32 %v2972_v12, 0.0  ;;  %v2623_v43 = vadd.f32 %v2573_v49, %v2345_v42  ;;  %v2346_v42 = vadd.f32 %v8026_v3, %v7767_v61 }
 0x31a   : > { %v8303_v6 = vld [vmem:[#allocation3 + $0x111] sm:$0xff]  ;;  %6379 = vmatmul.msk.f32.gmra.mxu1 %vm3203_vm3, %v8301_v44 }
 0x31b   : > { %3282 = vst.msk [vmem:[#allocation3 + $0x121] sm:$0xff] %vm3203_vm3, %v3004_v25  ;;  %v2901_v36 = vadd.f32 %v2851_v47, %v2623_v43  ;;  %6296 = vmatmul.msk.f32.gmra.mxu2 %vm3203_vm3, %v8303_v6  ;;  %6346 = vmatmul.msk.f32.gmra.mxu0 %vm3203_vm3, %v8305_v2 }
 0x31d   : > { %v2937_v16 = vmul.f32 %v7920_v27, %v2901_v36  ;;  %6313 = vmatmul.msk.f32.gmra.mxu3 %vm3203_vm3, %v8255_v41  ;;  %v8328_v36 = vld [vmem:[#allocation3 + $0x6a] sm:$0xff] }
 0x31e   : > { %v8317_v0 = vpop.f32.mrf.mxu2  ;;  %9835 = vst [vmem:[#allocation42_spill] sm:$0xff] %v8328_v36 }
 0x31f   : > { %v2973_v12 = vadd.f32 %v7930_v35, %v2937_v16  ;;  %v8322_v49 = vpop.f32.mrf.mxu1 }
 0x320   : > { %9832 = vst [vmem:[#allocation48_spill] sm:$0xff] %v8322_v49  ;;  %v2576_v43 = vpop.f32.mrf.mxu3  ;;  %v2857_v47 = vpop.f32.mrf.mxu0 }
 0x321   : > { %v3005_v25 = vmax.f32 %v2973_v12, 0.0  ;;  %v2624_v37 = vadd.f32 %v2576_v43, %v2346_v42  ;;  %v2347_v42 = vadd.f32 %v8041_v13, %v7773_v29 }
 0x322   : > { %v8326_v55 = vld [vmem:[#allocation3 + $0x121] sm:$0xff]  ;;  %6380 = vmatmul.msk.f32.gmra.mxu1 %vm3203_vm3, %v8324_v56 }
 0x323   : > { %9834 = vst [vmem:[#allocation6_spill] sm:$0xff] %v8326_v55  ;;  %v2902_v61 = vadd.f32 %v2854_v54, %v2624_v37  ;;  %6297 = vmatmul.msk.f32.gmra.mxu2 %vm3203_vm3, %v8326_v55  ;;  %6347 = vmatmul.msk.f32.gmra.mxu0 %vm3203_vm3, %v8328_v36 }
 0x324   : > { %3283 = vst.msk [vmem:[#allocation3 + $0x129] sm:$0xff] %vm3203_vm3, %v3005_v25 }
 0x325   : > { %v2938_v3 = vmul.f32 %v7920_v27, %v2902_v61  ;;  %6314 = vmatmul.msk.f32.gmra.mxu3 %vm3203_vm3, %v8278_v46  ;;  %v8351_v61 = vld [vmem:[#allocation3 + $0x7a] sm:$0xff] }
 0x326   : > { %v8340_v16 = vpop.f32.mrf.mxu2  ;;  %9839 = vst [vmem:[#allocation47_spill] sm:$0xff] %v8351_v61 }
 0x327   : > { %v2974_v12 = vadd.f32 %v7930_v35, %v2938_v3  ;;  %v8345_v43 = vpop.f32.mrf.mxu1 }
 0x328   : > { %9836 = vst [vmem:[#allocation40_spill] sm:$0xff] %v8345_v43  ;;  %v2579_v37 = vpop.f32.mrf.mxu3  ;;  %v2860_v54 = vpop.f32.mrf.mxu0 }
 0x329   : > { %v3006_v25 = vmax.f32 %v2974_v12, 0.0  ;;  %v2625_v49 = vadd.f32 %v2579_v37, %v2347_v42  ;;  %v2348_v42 = vadd.f32 %v8058_v53, %v7781_v21 }
 0x32a   : > { %6381 = vmatmul.msk.f32.gmra.mxu1 %vm3203_vm3, %v8347_v7 }
 0x32b   : > { %v8349_v33 = vld [vmem:[#allocation3 + $0x129] sm:$0xff]  ;;  %3284 = vst.msk [vmem:[#allocation3 + $0x139] sm:$0xff] %vm3203_vm3, %v3006_v25  ;;  %v2903_v29 = vadd.f32 %v2857_v47, %v2625_v49  ;;  %6348 = vmatmul.msk.f32.gmra.mxu0 %vm3203_vm3, %v8351_v61 }
 0x32c   : > { %9838 = vst [vmem:[#allocation11_spill] sm:$0xff] %v8349_v33  ;;  %6298 = vmatmul.msk.f32.gmra.mxu2 %vm3203_vm3, %v8349_v33  ;;  %v8622_v36 = vld [vmem:[#allocation3 + $0x128] sm:$0xff] }
 0x32d   : > { %v2939_v13 = vmul.f32 %v7920_v27, %v2903_v29  ;;  %6315 = vmatmul.msk.f32.gmra.mxu3 %vm3203_vm3, %v8301_v44  ;;  %v8374_v29 = vld [vmem:[#allocation3 + $0x82] sm:$0xff]  ;;  %9875 = vst [vmem:[#allocation72_spill] sm:$0xff] %v8622_v36 }
 0x32e   : > { %v8363_v3 = vpop.f32.mrf.mxu2  ;;  %9843 = vst [vmem:[#allocation52_spill] sm:$0xff] %v8374_v29 }
 0x32f   : > { %v2975_v12 = vadd.f32 %v7930_v35, %v2939_v13  ;;  %v8368_v37 = vpop.f32.mrf.mxu1 }
 0x330   : > { %9840 = vst [vmem:[#allocation46_spill] sm:$0xff] %v8368_v37  ;;  %v2582_v49 = vpop.f32.mrf.mxu3  ;;  %v2863_v47 = vpop.f32.mrf.mxu0 }
 0x331   : > { %v3007_v25 = vmax.f32 %v2975_v12, 0.0  ;;  %v2626_v43 = vadd.f32 %v2582_v49, %v2348_v42  ;;  %v2349_v42 = vadd.f32 %v8076_v28, %v7793_v5 }
 0x332   : > { %v8372_v1 = vld [vmem:[#allocation3 + $0x139] sm:$0xff]  ;;  %6382 = vmatmul.msk.f32.gmra.mxu1 %vm3203_vm3, %v8370_v52 }
 0x333   : > { %9842 = vst [vmem:[#allocation17_spill] sm:$0xff] %v8372_v1  ;;  %v2904_v21 = vadd.f32 %v2860_v54, %v2626_v43  ;;  %6349 = vmatmul.msk.f32.gmra.mxu0 %vm3203_vm3, %v8374_v29  ;;  %v8641_v55 = vld [vmem:[#allocation3 + $0x138] sm:$0xff] }
 0x334   : > { %3285 = vst.msk [vmem:[#allocation3 + $0x141] sm:$0xff] %vm3203_vm3, %v3007_v25  ;;  %6299 = vmatmul.msk.f32.gmra.mxu2 %vm3203_vm3, %v8372_v1  ;;  %v8584_v1 = vld [vmem:[#allocation3 + $0x110] sm:$0xff] }
 0x335   : > { %v2940_v53 = vmul.f32 %v7920_v27, %v2904_v21  ;;  %6316 = vmatmul.msk.f32.gmra.mxu3 %vm3203_vm3, %v8324_v56  ;;  %v8397_v21 = vld [vmem:[#allocation3 + $0x92] sm:$0xff]  ;;  %9871 = vst [vmem:[#allocation68_spill] sm:$0xff] %v8584_v1 }
 0x336   : > { %v8386_v13 = vpop.f32.mrf.mxu2  ;;  %9847 = vst [vmem:[#allocation31_spill] sm:$0xff] %v8397_v21 }
 0x337   : > { %v2976_v12 = vadd.f32 %v7930_v35, %v2940_v53  ;;  %v8391_v49 = vpop.f32.mrf.mxu1  ;;  %9879 = vst [vmem:[#allocation76_spill] sm:$0xff] %v8641_v55 }
 0x338   : > { %9844 = vst [vmem:[#allocation51_spill] sm:$0xff] %v8391_v49  ;;  %v2585_v43 = vpop.f32.mrf.mxu3  ;;  %v2866_v54 = vpop.f32.mrf.mxu0 }
 0x339   : > { %v3008_v25 = vmax.f32 %v2976_v12, 0.0  ;;  %v2627_v37 = vadd.f32 %v2585_v43, %v2349_v42  ;;  %v2350_v42 = vadd.f32 %v8090_v17, %v7820_v19  ;;  %v6535_v17 = vld [vmem:[%s9581_s4 + $0x40] sm:$0xff] }
 0x33a   : > { %6383 = vmatmul.msk.f32.gmra.mxu1 %vm3203_vm3, %v8393_v10  ;;  %5573 = vmatpush.msra.mxu2 %v6535_v17 }
 0x33b   : > { %v8395_v29 = vld [vmem:[#allocation3 + $0x141] sm:$0xff]  ;;  %3286 = vst.msk [vmem:[#allocation3 + $0x151] sm:$0xff] %vm3203_vm3, %v3008_v25  ;;  %v2905_v5 = vadd.f32 %v2863_v47, %v2627_v37  ;;  %6350 = vmatmul.msk.f32.gmra.mxu0 %vm3203_vm3, %v8397_v21 }
 0x33c   : > { %9846 = vst [vmem:[#allocation53_spill] sm:$0xff] %v8395_v29  ;;  %6300 = vmatmul.msk.f32.gmra.mxu2 %vm3203_vm3, %v8395_v29  ;;  %v8416_v29 = vld [vmem:[#allocation3 + $0xb0] sm:$0xff] }
 0x33d   : > { %v2941_v28 = vmul.f32 %v7920_v27, %v2905_v5  ;;  %6317 = vmatmul.msk.f32.gmra.mxu3 %vm3203_vm3, %v8347_v7  ;;  %9849 = vst [vmem:[#allocation44_spill] sm:$0xff] %v8416_v29  ;;  %v8420_v27 = vld [vmem:[#allocation3 + $0x9a] sm:$0xff] }
 0x33e   : > { %v8409_v53 = vpop.f32.mrf.mxu2  ;;  %9851 = vst [vmem:[#allocation58_spill] sm:$0xff] %v8420_v27  ;;  %v6469_v5 = vld [vmem:[%s9581_s4 + $0x30] sm:$0xff] }
 0x33f   : > { %v2977_v12 = vadd.f32 %v7930_v35, %v2941_v28  ;;  %v8414_v43 = vpop.f32.mrf.mxu1  ;;  %v6436_v35 = vld [vmem:[%s9581_s4 + $0x28] sm:$0xff]  ;;  %5023 = vmatpush.msra.mxu0 %v6469_v5  ;;  %v8455_v5 = vld [vmem:[#allocation3 + $0xc0] sm:$0xff] }
 0x340   : > { %9848 = vst [vmem:[#allocation38_spill] sm:$0xff] %v8414_v43  ;;  %v2588_v37 = vpop.f32.mrf.mxu3  ;;  %v2869_v47 = vpop.f32.mrf.mxu0  ;;  %4747 = vmatpush.msra.mxu3 %v6436_v35  ;;  %v8603_v7 = vld [vmem:[#allocation3 + $0x120] sm:$0xff] }
 0x341   : > { %v3009_v25 = vmax.f32 %v2977_v12, 0.0  ;;  %v2628_v49 = vadd.f32 %v2588_v37, %v2350_v42  ;;  %v6502_v42 = vld [vmem:[%s9581_s4 + $0x38] sm:$0xff]  ;;  %v2351_v12 = vadd.f32 %v8106_v51, %v7854_v24  ;;  %v6623_v37 = vld [vmem:[%s9580_s3] ss:$0 sm:$0xff]  ;;  %9853 = vst [vmem:[#allocation62_spill] sm:$0xff] %v8455_v5 }
 0x342   : > { %v8418_v21 = vld [vmem:[#allocation3 + $0x151] sm:$0xff]  ;;  %6384 = vmatmul.msk.f32.gmra.mxu1 %vm3203_vm3, %v8416_v29  ;;  %9873 = vst [vmem:[#allocation70_spill] sm:$0xff] %v8603_v7 }
 0x343   : > { %9850 = vst [vmem:[#allocation49_spill] sm:$0xff] %v8418_v21  ;;  %v2906_v19 = vadd.f32 %v2866_v54, %v2628_v49  ;;  %6351 = vmatmul.msk.f32.gmra.mxu0 %vm3203_vm3, %v8420_v27  ;;  %v6622_v49 = vld [vmem:[%s9579_s2] ss:$0 sm:$0xff]  ;;  %5298 = vmatpush.msra.mxu1 %v6502_v42  ;;  %v2352_v42 = vadd.f32 %v8123_v38, %v7876_v22 }
 0x344   : > { %3287 = vst.msk [vmem:[#allocation3 + $0x159] sm:$0xff] %vm3203_vm3, %v3009_v25  ;;  %6301 = vmatmul.msk.f32.gmra.mxu2 %vm3203_vm3, %v8418_v21 }
 0x345   : > { %v2942_v54 = vmul.f32 %v6622_v49, %v2906_v19  ;;  %6318 = vmatmul.msk.f32.gmra.mxu3 %vm3203_vm3, %v8370_v52  ;;  %v8459_v52 = vld [vmem:[#allocation3 + $0xaa] sm:$0xff] }
 0x346   : > { %v8443_v28 = vpop.f32.mrf.mxu2  ;;  %9855 = vst [vmem:[#allocation64_spill] sm:$0xff] %v8459_v52 }
 0x347   : > { %v2978_v25 = vadd.f32 %v6623_v37, %v2942_v54  ;;  %v8453_v19 = vpop.f32.mrf.mxu1 }
 0x348   : > { %9852 = vst [vmem:[#allocation60_spill] sm:$0xff] %v8453_v19  ;;  %v2591_v35 = vpop.f32.mrf.mxu3  ;;  %v2872_v17 = vpop.f32.mrf.mxu0  ;;  %v8476_v19 = vld [vmem:[#allocation3 + $0xc8] sm:$0xff] }
 0x349   : > { %v3010_v43 = vmax.f32 %v2978_v25, 0.0  ;;  %v2629_v27 = vadd.f32 %v2591_v35, %v2351_v12  ;;  %9857 = vst [vmem:[#allocation65_spill] sm:$0xff] %v8476_v19 }
 0x34a   : > { %6385 = vmatmul.msk.f32.gmra.mxu1 %vm3203_vm3, %v8455_v5 }
 0x34b   : > { %v8457_v21 = vld [vmem:[#allocation3 + $0x159] sm:$0xff]  ;;  %3288 = vst.msk [vmem:[#allocation3 + $0x169] sm:$0xff] %vm3203_vm3, %v3010_v43  ;;  %v2907_v24 = vadd.f32 %v2869_v47, %v2629_v27  ;;  %6352 = vmatmul.msk.f32.gmra.mxu0 %vm3203_vm3, %v8459_v52 }
 0x34c   : > { %9854 = vst [vmem:[#allocation61_spill] sm:$0xff] %v8457_v21  ;;  %6302 = vmatmul.msk.f32.gmra.mxu2 %vm3203_vm3, %v8457_v21 }
 0x34d   : > { %v2943_v51 = vmul.f32 %v6622_v49, %v2907_v24  ;;  %6319 = vmatmul.msk.f32.gmra.mxu3 %vm3203_vm3, %v8393_v10  ;;  %v8480_v24 = vld [vmem:[#allocation3 + $0xb2] sm:$0xff] }
 0x34e   : > { %v8470_v54 = vpop.f32.mrf.mxu2  ;;  %9859 = vst [vmem:[#allocation54_spill] sm:$0xff] %v8480_v24 }
 0x34f   : > { %v2979_v12 = vadd.f32 %v6623_v37, %v2943_v51  ;;  %v8474_v25 = vpop.f32.mrf.mxu1  ;;  %v2353_v51 = vadd.f32 %v8139_v59, %v7902_v30 }
 0x350   : > { %9856 = vst [vmem:[#allocation66_spill] sm:$0xff] %v8474_v25  ;;  %v2594_v43 = vpop.f32.mrf.mxu3  ;;  %v2875_v47 = vpop.f32.mrf.mxu0  ;;  %v8495_v25 = vld [vmem:[#allocation3 + $0xd8] sm:$0xff] }
 0x351   : > { %v3011_v27 = vmax.f32 %v2979_v12, 0.0  ;;  %v2630_v35 = vadd.f32 %v2594_v43, %v2352_v42  ;;  %9860 = vst [vmem:[#allocation55_spill] sm:$0xff] %v8495_v25 }
 0x352   : > { %v8478_v21 = vld [vmem:[#allocation3 + $0x169] sm:$0xff]  ;;  %6386 = vmatmul.msk.f32.gmra.mxu1 %vm3203_vm3, %v8476_v19 }
 0x353   : > { %9858 = vst [vmem:[#allocation10_spill] sm:$0xff] %v8478_v21  ;;  %v2908_v52 = vadd.f32 %v2872_v17, %v2630_v35  ;;  %6353 = vmatmul.msk.f32.gmra.mxu0 %vm3203_vm3, %v8480_v24  ;;  %v8499_v24 = vld [vmem:[#allocation3 + $0xc2] sm:$0xff] }
 0x354   : > { %3289 = vst.msk [vmem:[#allocation3 + $0x171] sm:$0xff] %vm3203_vm3, %v3011_v27  ;;  %6303 = vmatmul.msk.f32.gmra.mxu2 %vm3203_vm3, %v8478_v21 }
 0x355   : > { %v2944_v22 = vmul.f32 %v6622_v49, %v2908_v52  ;;  %6320 = vmatmul.msk.f32.gmra.mxu3 %vm3203_vm3, %v8416_v29  ;;  %9862 = vst [vmem:[#allocation57_spill] sm:$0xff] %v8499_v24 }
 0x356   : > { %v8491_v38 = vpop.f32.mrf.mxu2 }
 0x357   : > { %v2980_v42 = vadd.f32 %v6623_v37, %v2944_v22  ;;  %v4199_v12 = vpop.f32.mrf.mxu1 }
 0x358   : > { %v2597_v43 = vpop.f32.mrf.mxu3  ;;  %v3924_v27 = vpop.f32.mrf.mxu0 }
 0x359   : > { %v3012_v17 = vmax.f32 %v2980_v42, 0.0  ;;  %v2631_v35 = vadd.f32 %v2597_v43, %v2353_v51 }
 0x35a   : > { %6387 = vmatmul.msk.f32.gmra.mxu1 %vm3203_vm3, %v8495_v25 }
 0x35b   : > { %v8497_v21 = vld [vmem:[#allocation3 + $0x171] sm:$0xff]  ;;  %3290 = vst.msk [vmem:[#allocation3 + $0x181] sm:$0xff] %vm3203_vm3, %v3012_v17  ;;  %v2909_v52 = vadd.f32 %v2875_v47, %v2631_v35  ;;  %6354 = vmatmul.msk.f32.gmra.mxu0 %vm3203_vm3, %v8499_v24  ;;  %v8513_v47 = vld [vmem:[#allocation3 + $0xe0] sm:$0xff] }
 0x35c   : > { %9861 = vst [vmem:[#allocation56_spill] sm:$0xff] %v8497_v21  ;;  %6304 = vmatmul.msk.f32.gmra.mxu2 %vm3203_vm3, %v8497_v21  ;;  %v4327_v35 = vld [vmem:[#allocation3 + $0x19] sm:$0xff]  ;;  %v8515_v21 = vld [vmem:[#allocation3 + $0xca] sm:$0xff] }
 0x35d   : > { %v2945_v30 = vmul.f32 %v6622_v49, %v2909_v52  ;;  %6321 = vmatmul.msk.f32.gmra.mxu3 %vm3203_vm3, %v8455_v5  ;;  %9863 = vst [vmem:[#allocation59_spill] sm:$0xff] %v8513_v47  ;;  %v8530_v24 = vld [vmem:[#allocation3 + $0xf0] sm:$0xff]  ;;  %v8565_v5 = vld [vmem:[#allocation3 + $0x108] sm:$0xff] }
 0x35e   : > { %v8510_v59 = vpop.f32.mrf.mxu2  ;;  %9864 = vst [vmem:[#allocation63_spill] sm:$0xff] %v8515_v21 }
 0x35f   : > { %v2981_v22 = vadd.f32 %v6623_v37, %v2945_v30  ;;  %v4202_v51 = vpop.f32.mrf.mxu1  ;;  %9865 = vst [vmem:[#allocation67_spill] sm:$0xff] %v8530_v24 }
 0x360   : > { %v3681_v42 = vpop.f32.mrf.mxu3  ;;  %v3927_v43 = vpop.f32.mrf.mxu0  ;;  %9869 = vst [vmem:[#allocation4_spill] sm:$0xff] %v8565_v5 }
 0x361   : > { %v3013_v29 = vmax.f32 %v2981_v22, 0.0  ;;  %v3682_v17 = vadd.f32 %v3681_v42, %v8153_v39 }
 0x362   : > { %6388 = vmatmul.msk.f32.gmra.mxu1 %vm3203_vm3, %v8513_v47 }
 0x363   : > { %3291 = vst.msk [vmem:[#allocation3 + $0x189] sm:$0xff] %vm3203_vm3, %v3013_v29  ;;  %v4020_v49 = vadd.f32 %v3924_v27, %v3682_v17  ;;  %6355 = vmatmul.msk.f32.gmra.mxu0 %vm3203_vm3, %v8515_v21  ;;  %v4328_v29 = vld [vmem:[#allocation3 + $0x21] sm:$0xff] }
 0x364   : > { %6404 = vmatmul.msk.f32.vlgmr.msrb.gmra.mxu2 %vm3203_vm3, %v4327_v35  ;;  %v8532_v27 = vld [vmem:[#allocation3 + $0xda] sm:$0xff] }
 0x365   : > { %6322 = vmatmul.msk.f32.gmra.mxu3 %vm3203_vm3, %v8476_v19  ;;  %v8525_v39 = vadd.f32 %v4199_v12, %v4020_v49  ;;  %9866 = vst [vmem:[#allocation20_spill] sm:$0xff] %v8532_v27  ;;  %v8546_v19 = vld [vmem:[#allocation3 + $0xf8] sm:$0xff] }
 0x366   : > { %v8527_v37 = vpop.f32.mrf.mxu2  ;;  %9867 = vst [vmem:[#allocation16_spill] sm:$0xff] %v8546_v19 }
 0x367   : > { %v4205_v52 = vpop.f32.mrf.mxu1 }
 0x368   : > { %v3684_v30 = vpop.f32.mrf.mxu3  ;;  %v3930_v22 = vpop.f32.mrf.mxu0 }
 0x369   : > { %v3685_v42 = vadd.f32 %v3684_v30, %v8178_v4 }
 0x36a   : > { %6389 = vmatmul.msk.f32.gmra.mxu1 %vm3203_vm3, %v8530_v24 }
 0x36b   : > { %v4021_v17 = vadd.f32 %v3927_v43, %v3685_v42  ;;  %6356 = vmatmul.msk.f32.gmra.mxu0 %vm3203_vm3, %v8532_v27  ;;  %v8548_v43 = vld [vmem:[#allocation3 + $0x31] sm:$0xff]  ;;  %v8550_v42 = vld [vmem:[#allocation3 + $0xe2] sm:$0xff] }
 0x36c   : > { %6405 = vmatmul.msk.f32.gmra.mxu2 %vm3203_vm3, %v4328_v29  ;;  %9868 = vst [vmem:[#allocation5_spill] sm:$0xff] %v8550_v42 }
 0x36d   : > { %6323 = vmatmul.msk.f32.gmra.mxu3 %vm3203_vm3, %v8495_v25  ;;  %v8541_v12 = vadd.f32 %v4202_v51, %v4021_v17 }
 0x36e   : > { %v8543_v4 = vpop.f32.mrf.mxu2 }
 0x36f   : > { %v4208_v35 = vpop.f32.mrf.mxu1 }
 0x370   : > { %v3687_v49 = vpop.f32.mrf.mxu3  ;;  %v3933_v30 = vpop.f32.mrf.mxu0 }
 0x371   : > { %v3688_v21 = vadd.f32 %v3687_v49, %v8202_v45 }
 0x372   : > { %6390 = vmatmul.msk.f32.gmra.mxu1 %vm3203_vm3, %v8546_v19 }
 0x373   : > { %v4022_v29 = vadd.f32 %v3930_v22, %v3688_v21  ;;  %6357 = vmatmul.msk.f32.gmra.mxu0 %vm3203_vm3, %v8550_v42  ;;  %v8567_v21 = vld [vmem:[#allocation3 + $0x39] sm:$0xff] }
 0x374   : > { %6406 = vmatmul.msk.f32.gmra.mxu2 %vm3203_vm3, %v8548_v43  ;;  %v8569_v22 = vld [vmem:[#allocation3 + $0xf2] sm:$0xff] }
 0x375   : > { %6324 = vmatmul.msk.f32.gmra.mxu3 %vm3203_vm3, %v8513_v47  ;;  %v8560_v45 = vadd.f32 %v4205_v52, %v4022_v29  ;;  %9870 = vst [vmem:[#allocation15_spill] sm:$0xff] %v8569_v22 }
 0x376   : > { %v8562_v51 = vpop.f32.mrf.mxu2 }
 0x377   : > { %v4211_v17 = vpop.f32.mrf.mxu1 }
 0x378   : > { %v3690_v49 = vpop.f32.mrf.mxu3  ;;  %v3936_v27 = vpop.f32.mrf.mxu0 }
 0x379   : > { %v3691_v25 = vadd.f32 %v3690_v49, %v8225_v9 }
 0x37a   : > { %6391 = vmatmul.msk.f32.gmra.mxu1 %vm3203_vm3, %v8565_v5 }
 0x37b   : > { %v4023_v42 = vadd.f32 %v3933_v30, %v3691_v25  ;;  %6358 = vmatmul.msk.f32.gmra.mxu0 %vm3203_vm3, %v8569_v22  ;;  %v8586_v25 = vld [vmem:[#allocation3 + $0x49] sm:$0xff]  ;;  %v8588_v30 = vld [vmem:[#allocation3 + $0xfa] sm:$0xff] }
 0x37c   : > { %6407 = vmatmul.msk.f32.gmra.mxu2 %vm3203_vm3, %v8567_v21  ;;  %9872 = vst [vmem:[#allocation69_spill] sm:$0xff] %v8588_v30 }
 0x37d   : > { %6325 = vmatmul.msk.f32.gmra.mxu3 %vm3203_vm3, %v8530_v24  ;;  %v8579_v9 = vadd.f32 %v4208_v35, %v4023_v42 }
 0x37e   : > { %v8581_v52 = vpop.f32.mrf.mxu2 }
 0x37f   : > { %v4214_v29 = vpop.f32.mrf.mxu1 }
 0x380   : > { %v3693_v49 = vpop.f32.mrf.mxu3  ;;  %v3939_v47 = vpop.f32.mrf.mxu0 }
 0x381   : > { %v3694_v10 = vadd.f32 %v3693_v49, %v8248_v63 }
 0x382   : > { %6392 = vmatmul.msk.f32.gmra.mxu1 %vm3203_vm3, %v8584_v1 }
 0x383   : > { %v4024_v22 = vadd.f32 %v3936_v27, %v3694_v10  ;;  %6359 = vmatmul.msk.f32.gmra.mxu0 %vm3203_vm3, %v8588_v30  ;;  %v8605_v10 = vld [vmem:[#allocation3 + $0x51] sm:$0xff] }
 0x384   : > { %6408 = vmatmul.msk.f32.gmra.mxu2 %vm3203_vm3, %v8586_v25  ;;  %v8607_v27 = vld [vmem:[#allocation3 + $0x10a] sm:$0xff] }
 0x385   : > { %6326 = vmatmul.msk.f32.gmra.mxu3 %vm3203_vm3, %v8546_v19  ;;  %v8598_v63 = vadd.f32 %v4211_v17, %v4024_v22  ;;  %9874 = vst [vmem:[#allocation71_spill] sm:$0xff] %v8607_v27 }
 0x386   : > { %v8600_v35 = vpop.f32.mrf.mxu2 }
 0x387   : > { %v4217_v42 = vpop.f32.mrf.mxu1 }
 0x388   : > { %v3696_v49 = vpop.f32.mrf.mxu3  ;;  %v3942_v24 = vpop.f32.mrf.mxu0 }
 0x389   : > { %v3697_v61 = vadd.f32 %v3696_v49, %v8271_v50 }
 0x38a   : > { %6393 = vmatmul.msk.f32.gmra.mxu1 %vm3203_vm3, %v8603_v7 }
 0x38b   : > { %v4025_v30 = vadd.f32 %v3939_v47, %v3697_v61  ;;  %6360 = vmatmul.msk.f32.gmra.mxu0 %vm3203_vm3, %v8607_v27  ;;  %v8624_v61 = vld [vmem:[#allocation3 + $0x61] sm:$0xff]  ;;  %v8626_v47 = vld [vmem:[#allocation3 + $0x112] sm:$0xff] }
 0x38c   : > { %6409 = vmatmul.msk.f32.gmra.mxu2 %vm3203_vm3, %v8605_v10  ;;  %9876 = vst [vmem:[#allocation73_spill] sm:$0xff] %v8626_v47 }
 0x38d   : > { %6327 = vmatmul.msk.f32.gmra.mxu3 %vm3203_vm3, %v8565_v5  ;;  %v8617_v50 = vadd.f32 %v4214_v29, %v4025_v30 }
 0x38e   : > { %v8619_v17 = vpop.f32.mrf.mxu2 }
 0x38f   : > { %v4220_v22 = vpop.f32.mrf.mxu1 }
 0x390   : > { %v3699_v49 = vpop.f32.mrf.mxu3  ;;  %v3945_v19 = vpop.f32.mrf.mxu0 }
 0x391   : > { %v3700_v33 = vadd.f32 %v3699_v49, %v8294_v58 }
 0x392   : > { %6394 = vmatmul.msk.f32.gmra.mxu1 %vm3203_vm3, %v8622_v36 }
 0x393   : > { %v4026_v27 = vadd.f32 %v3942_v24, %v3700_v33  ;;  %6361 = vmatmul.msk.f32.gmra.mxu0 %vm3203_vm3, %v8626_v47  ;;  %v8643_v33 = vld [vmem:[#allocation3 + $0x69] sm:$0xff] }
 0x394   : > { %6410 = vmatmul.msk.f32.gmra.mxu2 %vm3203_vm3, %v8624_v61  ;;  %v8645_v24 = vld [vmem:[#allocation3 + $0x122] sm:$0xff] }
 0x395   : > { %6328 = vmatmul.msk.f32.gmra.mxu3 %vm3203_vm3, %v8584_v1  ;;  %v8636_v58 = vadd.f32 %v4217_v42, %v4026_v27  ;;  %9880 = vst [vmem:[#allocation77_spill] sm:$0xff] %v8645_v24 }
 0x396   : > { %v8638_v29 = vpop.f32.mrf.mxu2 }
 0x397   : > { %9877 = vst [vmem:[#allocation74_spill] sm:$0xff] %v8636_v58  ;;  %v4223_v30 = vpop.f32.mrf.mxu1 }
 0x398   : > { %9878 = vst [vmem:[#allocation75_spill] sm:$0xff] %v8638_v29  ;;  %v3702_v49 = vpop.f32.mrf.mxu3  ;;  %v3948_v5 = vpop.f32.mrf.mxu0  ;;  %v8660_v29 = vld [vmem:[#allocation3 + $0x140] sm:$0xff] }
 0x399   : > { %v3703_v56 = vadd.f32 %v3702_v49, %v8317_v0  ;;  %9883 = vst [vmem:[#allocation80_spill] sm:$0xff] %v8660_v29 }
 0x39a   : > { %6395 = vmatmul.msk.f32.gmra.mxu1 %vm3203_vm3, %v8641_v55 }
 0x39b   : > { %v4027_v47 = vadd.f32 %v3945_v19, %v3703_v56  ;;  %6362 = vmatmul.msk.f32.gmra.mxu0 %vm3203_vm3, %v8645_v24  ;;  %v8662_v56 = vld [vmem:[#allocation3 + $0x79] sm:$0xff]  ;;  %v8664_v19 = vld [vmem:[#allocation3 + $0x12a] sm:$0xff] }
 0x39c   : > { %6411 = vmatmul.msk.f32.gmra.mxu2 %vm3203_vm3, %v8643_v33  ;;  %9884 = vst [vmem:[#allocation81_spill] sm:$0xff] %v8664_v19 }
 0x39d   : > { %6329 = vmatmul.msk.f32.gmra.mxu3 %vm3203_vm3, %v8603_v7  ;;  %v8655_v0 = vadd.f32 %v4220_v22, %v4027_v47 }
 0x39e   : > { %v8657_v42 = vpop.f32.mrf.mxu2 }
 0x39f   : > { %9881 = vst [vmem:[#allocation78_spill] sm:$0xff] %v8655_v0  ;;  %v4226_v27 = vpop.f32.mrf.mxu1 }
 0x3a0   : > { %9882 = vst [vmem:[#allocation79_spill] sm:$0xff] %v8657_v42  ;;  %v3705_v49 = vpop.f32.mrf.mxu3  ;;  %v3951_v1 = vpop.f32.mrf.mxu0  ;;  %v8679_v42 = vld [vmem:[#allocation3 + $0x150] sm:$0xff] }
 0x3a1   : > { %v3706_v58 = vadd.f32 %v3705_v49, %v8340_v16  ;;  %9887 = vst [vmem:[#allocation84_spill] sm:$0xff] %v8679_v42 }
 0x3a2   : > { %6396 = vmatmul.msk.f32.gmra.mxu1 %vm3203_vm3, %v8660_v29 }
 0x3a3   : > { %v4028_v24 = vadd.f32 %v3948_v5, %v3706_v58  ;;  %6363 = vmatmul.msk.f32.gmra.mxu0 %vm3203_vm3, %v8664_v19  ;;  %v8681_v5 = vld [vmem:[#allocation3 + $0x81] sm:$0xff] }
 0x3a4   : > { %6412 = vmatmul.msk.f32.gmra.mxu2 %vm3203_vm3, %v8662_v56  ;;  %v8683_v58 = vld [vmem:[#allocation3 + $0x13a] sm:$0xff] }
 0x3a5   : > { %6330 = vmatmul.msk.f32.gmra.mxu3 %vm3203_vm3, %v8622_v36  ;;  %v8674_v16 = vadd.f32 %v4223_v30, %v4028_v24  ;;  %9888 = vst [vmem:[#allocation85_spill] sm:$0xff] %v8683_v58 }
 0x3a6   : > { %v8676_v22 = vpop.f32.mrf.mxu2 }
 0x3a7   : > { %9885 = vst [vmem:[#allocation82_spill] sm:$0xff] %v8674_v16  ;;  %v4229_v47 = vpop.f32.mrf.mxu1 }
 0x3a8   : > { %9886 = vst [vmem:[#allocation83_spill] sm:$0xff] %v8676_v22  ;;  %v3708_v49 = vpop.f32.mrf.mxu3  ;;  %v3954_v7 = vpop.f32.mrf.mxu0  ;;  %v8698_v22 = vld [vmem:[#allocation3 + $0x158] sm:$0xff] }
 0x3a9   : > { %v3709_v0 = vadd.f32 %v3708_v49, %v8363_v3  ;;  %9891 = vst [vmem:[#allocation88_spill] sm:$0xff] %v8698_v22 }
 0x3aa   : > { %6397 = vmatmul.msk.f32.gmra.mxu1 %vm3203_vm3, %v8679_v42 }
 0x3ab   : > { %v4029_v19 = vadd.f32 %v3951_v1, %v3709_v0  ;;  %6364 = vmatmul.msk.f32.gmra.mxu0 %vm3203_vm3, %v8683_v58  ;;  %v8700_v1 = vld [vmem:[#allocation3 + $0x91] sm:$0xff]  ;;  %v8702_v0 = vld [vmem:[#allocation3 + $0x142] sm:$0xff] }
 0x3ac   : > { %6413 = vmatmul.msk.f32.gmra.mxu2 %vm3203_vm3, %v8681_v5  ;;  %9892 = vst [vmem:[#allocation89_spill] sm:$0xff] %v8702_v0 }
 0x3ad   : > { %6331 = vmatmul.msk.f32.gmra.mxu3 %vm3203_vm3, %v8641_v55  ;;  %v8693_v3 = vadd.f32 %v4226_v27, %v4029_v19 }
 0x3af   : > { %9889 = vst [vmem:[#allocation86_spill] sm:$0xff] %v8693_v3  ;;  %v8695_v30 = vpop.f32.mrf.mxu2  ;;  %v4232_v24 = vpop.f32.mrf.mxu1 }
 0x3b0   : > { %9890 = vst [vmem:[#allocation87_spill] sm:$0xff] %v8695_v30  ;;  %v3711_v49 = vpop.f32.mrf.mxu3  ;;  %v3957_v36 = vpop.f32.mrf.mxu0  ;;  %v8717_v30 = vld [vmem:[#allocation3 + $0x168] sm:$0xff] }
 0x3b1   : > { %v3712_v16 = vadd.f32 %v3711_v49, %v8386_v13  ;;  %9895 = vst [vmem:[#allocation92_spill] sm:$0xff] %v8717_v30 }
 0x3b2   : > { %6398 = vmatmul.msk.f32.gmra.mxu1 %vm3203_vm3, %v8698_v22 }
 0x3b3   : > { %v4030_v58 = vadd.f32 %v3954_v7, %v3712_v16  ;;  %6365 = vmatmul.msk.f32.gmra.mxu0 %vm3203_vm3, %v8702_v0  ;;  %v8719_v7 = vld [vmem:[#allocation3 + $0x99] sm:$0xff] }
 0x3b4   : > { %6414 = vmatmul.msk.f32.gmra.mxu2 %vm3203_vm3, %v8700_v1  ;;  %v8721_v16 = vld [vmem:[#allocation3 + $0x152] sm:$0xff] }
 0x3b5   : > { %6332 = vmatmul.msk.f32.gmra.mxu3 %vm3203_vm3, %v8660_v29  ;;  %v8712_v13 = vadd.f32 %v4229_v47, %v4030_v58  ;;  %9896 = vst [vmem:[#allocation93_spill] sm:$0xff] %v8721_v16 }
 0x3b7   : > { %9893 = vst [vmem:[#allocation90_spill] sm:$0xff] %v8712_v13  ;;  %v8714_v27 = vpop.f32.mrf.mxu2  ;;  %v4235_v19 = vpop.f32.mrf.mxu1 }
 0x3b8   : > { %9894 = vst [vmem:[#allocation91_spill] sm:$0xff] %v8714_v27  ;;  %v3714_v49 = vpop.f32.mrf.mxu3  ;;  %v3960_v55 = vpop.f32.mrf.mxu0  ;;  %v8736_v27 = vld [vmem:[#allocation3 + $0x170] sm:$0xff] }
 0x3b9   : > { %v3715_v3 = vadd.f32 %v3714_v49, %v8409_v53 }
 0x3ba   : > { %6399 = vmatmul.msk.f32.gmra.mxu1 %vm3203_vm3, %v8717_v30 }
 0x3bb   : > { %v4031_v0 = vadd.f32 %v3957_v36, %v3715_v3  ;;  %6366 = vmatmul.msk.f32.gmra.mxu0 %vm3203_vm3, %v8721_v16  ;;  %v8738_v36 = vld [vmem:[#allocation3 + $0xa9] sm:$0xff]  ;;  %v8740_v3 = vld [vmem:[#allocation3 + $0x15a] sm:$0xff] }
 0x3bc   : > { %6415 = vmatmul.msk.f32.gmra.mxu2 %vm3203_vm3, %v8719_v7  ;;  %9899 = vst [vmem:[#allocation96_spill] sm:$0xff] %v8740_v3 }
 0x3bd   : > { %6333 = vmatmul.msk.f32.gmra.mxu3 %vm3203_vm3, %v8679_v42  ;;  %v8731_v53 = vadd.f32 %v4232_v24, %v4031_v0 }
 0x3bf   : > { %9897 = vst [vmem:[#allocation94_spill] sm:$0xff] %v8731_v53  ;;  %v8733_v47 = vpop.f32.mrf.mxu2  ;;  %v4238_v58 = vpop.f32.mrf.mxu1 }
 0x3c0   : > { %9898 = vst [vmem:[#allocation95_spill] sm:$0xff] %v8733_v47  ;;  %v3717_v49 = vpop.f32.mrf.mxu3  ;;  %v3963_v29 = vpop.f32.mrf.mxu0  ;;  %v8755_v47 = vld [vmem:[#allocation3 + $0x180] sm:$0xff] }
 0x3c1   : > { %v3718_v13 = vadd.f32 %v3717_v49, %v8443_v28  ;;  %9901 = vst [vmem:[#allocation98_spill] sm:$0xff] %v8755_v47 }
 0x3c2   : > { %6400 = vmatmul.msk.f32.gmra.mxu1 %vm3203_vm3, %v8736_v27 }
 0x3c3   : > { %v4032_v16 = vadd.f32 %v3960_v55, %v3718_v13  ;;  %6367 = vmatmul.msk.f32.gmra.mxu0 %vm3203_vm3, %v8740_v3  ;;  %v8757_v55 = vld [vmem:[#allocation3 + $0xb1] sm:$0xff] }
 0x3c4   : > { %6416 = vmatmul.msk.f32.gmra.mxu2 %vm3203_vm3, %v8738_v36  ;;  %v8759_v13 = vld [vmem:[#allocation3 + $0x16a] sm:$0xff] }
 0x3c5   : > { %6334 = vmatmul.msk.f32.gmra.mxu3 %vm3203_vm3, %v8698_v22  ;;  %v8750_v28 = vadd.f32 %v4235_v19, %v4032_v16  ;;  %9902 = vst [vmem:[#allocation99_spill] sm:$0xff] %v8759_v13 }
 0x3c7   : > { %9900 = vst [vmem:[#allocation97_spill] sm:$0xff] %v8750_v28  ;;  %v8752_v24 = vpop.f32.mrf.mxu2  ;;  %v4241_v0 = vpop.f32.mrf.mxu1 }
 0x3c8   : > { %v3720_v49 = vpop.f32.mrf.mxu3  ;;  %v3966_v42 = vpop.f32.mrf.mxu0 }
 0x3c9   : > { %v3721_v53 = vadd.f32 %v3720_v49, %v8470_v54 }
 0x3ca   : > { %6401 = vmatmul.msk.f32.gmra.mxu1 %vm3203_vm3, %v8755_v47  ;;  %v8774_v47 = vld [vmem:[#allocation3 + $0x188] sm:$0xff] }
 0x3cb   : > { %v4033_v3 = vadd.f32 %v3963_v29, %v3721_v53  ;;  %6368 = vmatmul.msk.f32.gmra.mxu0 %vm3203_vm3, %v8759_v13  ;;  %v8776_v29 = vld [vmem:[#allocation3 + $0xc1] sm:$0xff]  ;;  %v8778_v53 = vld [vmem:[#allocation3 + $0x172] sm:$0xff] }
 0x3cc   : > { %6417 = vmatmul.msk.f32.gmra.mxu2 %vm3203_vm3, %v8757_v55  ;;  %9904 = vst [vmem:[#allocation101_spill] sm:$0xff] %v8778_v53 }
 0x3cd   : > { %6335 = vmatmul.msk.f32.gmra.mxu3 %vm3203_vm3, %v8717_v30  ;;  %v8769_v54 = vadd.f32 %v4238_v58, %v4033_v3 }
 0x3cf   : > { %9903 = vst [vmem:[#allocation100_spill] sm:$0xff] %v8769_v54  ;;  %v8771_v19 = vpop.f32.mrf.mxu2  ;;  %v4244_v16 = vpop.f32.mrf.mxu1 }
 0x3d0   : > { %v3723_v49 = vpop.f32.mrf.mxu3  ;;  %v3969_v22 = vpop.f32.mrf.mxu0 }
 0x3d1   : > { %v3724_v28 = vadd.f32 %v3723_v49, %v8491_v38 }
 0x3d2   : > { %6402 = vmatmul.msk.f32.gmra.mxu1 %vm3203_vm3, %v8774_v47 }
 0x3d3   : > { %v4034_v13 = vadd.f32 %v3966_v42, %v3724_v28  ;;  %6369 = vmatmul.msk.f32.gmra.mxu0 %vm3203_vm3, %v8778_v53 }
 0x3d4   : > { %6418 = vmatmul.msk.f32.gmra.mxu2 %vm3203_vm3, %v8776_v29 }
 0x3d5   : > { %6336 = vmatmul.msk.f32.gmra.mxu3 %vm3203_vm3, %v8736_v27  ;;  %v8788_v38 = vadd.f32 %v4241_v0, %v4034_v13 }
 0x3d7   : > { %v8790_v58 = vpop.f32.mrf.mxu2  ;;  %v4247_v3 = vpop.f32.mrf.mxu1 }
 0x3d8   : > { %v3726_v49 = vpop.f32.mrf.mxu3  ;;  %v3972_v30 = vpop.f32.mrf.mxu0 }
 0x3d9   : > { %v3727_v54 = vadd.f32 %v3726_v49, %v8510_v59 }
 0x3da   : > { %6503 = vmatmul.msk.f32.vlgmr.msra.gmra.mxu1 %vm3203_vm3, %v8548_v43 }
 0x3db   : > { %v4035_v42 = vadd.f32 %v3969_v22, %v3727_v54  ;;  %6470 = vmatmul.msk.f32.vlgmr.msra.gmra.mxu0 %vm3203_vm3, %v8165_v18 }
 0x3dc   : > { %6419 = vmatmul.msk.f32.gmra.mxu2 %vm3203_vm3, %v8167_v32 }
 0x3dd   : > { %6437 = vmatmul.msk.f32.vlgmr.msra.gmra.mxu3 %vm3203_vm3, %v8169_v11  ;;  %v8801_v28 = vadd.f32 %v4244_v16, %v4035_v42 }
 0x3df   : > { %v8803_v0 = vpop.f32.mrf.mxu2  ;;  %v4250_v13 = vpop.f32.mrf.mxu1 }
 0x3e0   : > { %v3729_v53 = vpop.f32.mrf.mxu3  ;;  %v3975_v59 = vpop.f32.mrf.mxu0 }
 0x3e1   : > { %v3730_v49 = vadd.f32 %v3729_v53, %v8527_v37 }
 0x3e2   : > { %6504 = vmatmul.msk.f32.gmra.mxu1 %vm3203_vm3, %v8567_v21 }
 0x3e3   : > { %v4036_v43 = vadd.f32 %v3972_v30, %v3730_v49  ;;  %6471 = vmatmul.msk.f32.gmra.mxu0 %vm3203_vm3, %v8187_v62 }
 0x3e4   : > { %6420 = vmatmul.msk.f32.gmra.mxu2 %vm3203_vm3, %v8189_v57 }
 0x3e5   : > { %6438 = vmatmul.msk.f32.gmra.mxu3 %vm3203_vm3, %v8191_v14  ;;  %v8814_v18 = vadd.f32 %v4247_v3, %v4036_v43 }
 0x3e7   : > { %v4474_v32 = vpop.f32.mrf.mxu2  ;;  %v4253_v37 = vpop.f32.mrf.mxu1 }
 0x3e8   : > { %v8817_v11 = vadd.f32 %v4474_v32, %v8525_v39  ;;  %v3732_v22 = vpop.f32.mrf.mxu3  ;;  %v3978_v54 = vpop.f32.mrf.mxu0 }
 0x3e9   : > { %v3733_v21 = vadd.f32 %v3732_v22, %v8543_v4  ;;  %v9906_v22 = vld [vmem:[#allocation6_spill] sm:$0xff] }
 0x3ea   : > { %6505 = vmatmul.msk.f32.gmra.mxu1 %vm3203_vm3, %v8586_v25 }
 0x3eb   : > { %v4037_v57 = vadd.f32 %v3975_v59, %v3733_v21  ;;  %6472 = vmatmul.msk.f32.gmra.mxu0 %vm3203_vm3, %v8209_v34  ;;  %v9909_v21 = vld [vmem:[#allocation74_spill] sm:$0xff] }
 0x3ec   : > { %6421 = vmatmul.msk.f32.gmra.mxu2 %vm3203_vm3, %v8211_v31 }
 0x3ed   : > { %6439 = vmatmul.msk.f32.gmra.mxu3 %vm3203_vm3, %v8213_v20  ;;  %v8828_v14 = vadd.f32 %v4250_v13, %v4037_v57 }
 0x3ef   : > { %v4477_v62 = vpop.f32.mrf.mxu2  ;;  %v4256_v4 = vpop.f32.mrf.mxu1 }
 0x3f0   : > { %v8831_v39 = vadd.f32 %v4477_v62, %v8541_v12  ;;  %v3735_v30 = vpop.f32.mrf.mxu3  ;;  %v3981_v16 = vpop.f32.mrf.mxu0 }
 0x3f1   : > { %v3736_v25 = vadd.f32 %v3735_v30, %v8562_v51 }
 0x3f2   : > { %6506 = vmatmul.msk.f32.gmra.mxu1 %vm3203_vm3, %v8605_v10 }
 0x3f3   : > { %v4038_v31 = vadd.f32 %v3978_v54, %v3736_v25  ;;  %6473 = vmatmul.msk.f32.gmra.mxu0 %vm3203_vm3, %v8232_v23 }
 0x3f4   : > { %6422 = vmatmul.msk.f32.gmra.mxu2 %vm3203_vm3, %v8234_v48 }
 0x3f5   : > { %6440 = vmatmul.msk.f32.gmra.mxu3 %vm3203_vm3, %v8236_v26  ;;  %v8842_v34 = vadd.f32 %v4253_v37, %v4038_v31  ;;  %v9911_v31 = vld [vmem:[#allocation11_spill] sm:$0xff] }
 0x3f7   : > { %v4480_v20 = vpop.f32.mrf.mxu2  ;;  %v4259_v51 = vpop.f32.mrf.mxu1 }
 0x3f8   : > { %v8845_v12 = vadd.f32 %v4480_v20, %v8560_v45  ;;  %v3738_v53 = vpop.f32.mrf.mxu3  ;;  %v3984_v3 = vpop.f32.mrf.mxu0  ;;  %v9912_v20 = vld [vmem:[#allocation45_spill] sm:$0xff] }
 0x3f9   : > { %v3739_v10 = vadd.f32 %v3738_v53, %v8581_v52 }
 0x3fa   : > { %6507 = vmatmul.msk.f32.gmra.mxu1 %vm3203_vm3, %v8624_v61 }
 0x3fb   : > { %v4039_v48 = vadd.f32 %v3981_v16, %v3739_v10  ;;  %6474 = vmatmul.msk.f32.gmra.mxu0 %vm3203_vm3, %v8255_v41  ;;  %v9914_v10 = vld [vmem:[#allocation78_spill] sm:$0xff] }
 0x3fc   : > { %6423 = vmatmul.msk.f32.gmra.mxu2 %vm3203_vm3, %v8257_v60 }
 0x3fd   : > { %6441 = vmatmul.msk.f32.gmra.mxu3 %vm3203_vm3, %v8259_v8  ;;  %v8856_v23 = vadd.f32 %v4256_v4, %v4039_v48 }
 0x3ff   : > { %v4483_v26 = vpop.f32.mrf.mxu2  ;;  %v4262_v52 = vpop.f32.mrf.mxu1 }
 0x400   : > { %v8859_v45 = vadd.f32 %v4483_v26, %v8579_v9  ;;  %v3741_v42 = vpop.f32.mrf.mxu3  ;;  %v3987_v13 = vpop.f32.mrf.mxu0 }
 0x401   : > { %v3742_v61 = vadd.f32 %v3741_v42, %v8600_v35 }
 0x402   : > { %6508 = vmatmul.msk.f32.gmra.mxu1 %vm3203_vm3, %v8643_v33 }
 0x403   : > { %v4040_v60 = vadd.f32 %v3984_v3, %v3742_v61  ;;  %6475 = vmatmul.msk.f32.gmra.mxu0 %vm3203_vm3, %v8278_v46 }
 0x404   : > { %6424 = vmatmul.msk.f32.gmra.mxu2 %vm3203_vm3, %v8280_v40 }
 0x405   : > { %6442 = vmatmul.msk.f32.gmra.mxu3 %vm3203_vm3, %v8282_v15  ;;  %v8870_v41 = vadd.f32 %v4259_v51, %v4040_v60  ;;  %v9913_v51 = vld [vmem:[#allocation47_spill] sm:$0xff]  ;;  %v9916_v60 = vld [vmem:[#allocation17_spill] sm:$0xff] }
 0x407   : > { %v4486_v8 = vpop.f32.mrf.mxu2  ;;  %v4265_v35 = vpop.f32.mrf.mxu1 }
 0x408   : > { %v8873_v9 = vadd.f32 %v4486_v8, %v8598_v63  ;;  %v3744_v59 = vpop.f32.mrf.mxu3  ;;  %v3990_v49 = vpop.f32.mrf.mxu0  ;;  %v9917_v8 = vld [vmem:[#allocation50_spill] sm:$0xff] }
 0x409   : > { %v3745_v33 = vadd.f32 %v3744_v59, %v8619_v17 }
 0x40a   : > { %6509 = vmatmul.msk.f32.gmra.mxu1 %vm3203_vm3, %v8662_v56  ;;  %v9905_v56 = vld [vmem:[#allocation75_spill] sm:$0xff] }
 0x40b   : > { %v4041_v40 = vadd.f32 %v3987_v13, %v3745_v33  ;;  %6476 = vmatmul.msk.f32.gmra.mxu0 %vm3203_vm3, %v8301_v44  ;;  %v9907_v44 = vld [vmem:[#allocation39_spill] sm:$0xff]  ;;  %v9919_v33 = vld [vmem:[#allocation82_spill] sm:$0xff] }
 0x40c   : > { %6425 = vmatmul.msk.f32.gmra.mxu2 %vm3203_vm3, %v8303_v6 }
 0x40d   : > { %6443 = vmatmul.msk.f32.gmra.mxu3 %vm3203_vm3, %v8305_v2  ;;  %v8884_v46 = vadd.f32 %v4262_v52, %v4041_v40  ;;  %v9908_v2 = vld [vmem:[#allocation42_spill] sm:$0xff] }
 0x40f   : > { %v4489_v15 = vpop.f32.mrf.mxu2  ;;  %v4268_v17 = vpop.f32.mrf.mxu1 }
 0x410   : > { %v8887_v63 = vadd.f32 %v4489_v15, %v8617_v50  ;;  %v3747_v43 = vpop.f32.mrf.mxu3  ;;  %v3993_v32 = vpop.f32.mrf.mxu0 }
 0x411   : > { %v3748_v37 = vadd.f32 %v3747_v43, %v9905_v56 }
 0x412   : > { %6510 = vmatmul.msk.f32.gmra.mxu1 %vm3203_vm3, %v8681_v5  ;;  %v9910_v5 = vld [vmem:[#allocation79_spill] sm:$0xff] }
 0x413   : > { %v4042_v6 = vadd.f32 %v3990_v49, %v3748_v37  ;;  %6477 = vmatmul.msk.f32.gmra.mxu0 %vm3203_vm3, %v9907_v44  ;;  %v9921_v37 = vld [vmem:[#allocation53_spill] sm:$0xff] }
 0x414   : > { %6426 = vmatmul.msk.f32.gmra.mxu2 %vm3203_vm3, %v9906_v22  ;;  %v9923_v22 = vld [vmem:[#allocation31_spill] sm:$0xff] }
 0x415   : > { %6444 = vmatmul.msk.f32.gmra.mxu3 %vm3203_vm3, %v9908_v2  ;;  %v8898_v50 = vadd.f32 %v4265_v35, %v4042_v6  ;;  %v9918_v35 = vld [vmem:[#allocation52_spill] sm:$0xff] }
 0x416   : > { %v9922_v6 = vld [vmem:[#allocation24_spill] sm:$0xff] }
 0x417   : > { %v4492_v54 = vpop.f32.mrf.mxu2  ;;  %v4271_v62 = vpop.f32.mrf.mxu1 }
 0x418   : > { %v8901_v57 = vadd.f32 %v4492_v54, %v9909_v21  ;;  %v3750_v4 = vpop.f32.mrf.mxu3  ;;  %v3996_v30 = vpop.f32.mrf.mxu0  ;;  %v9924_v54 = vld [vmem:[#allocation86_spill] sm:$0xff] }
 0x419   : > { %v3751_v16 = vadd.f32 %v3750_v4, %v9910_v5 }
 0x41a   : > { %6511 = vmatmul.msk.f32.gmra.mxu1 %vm3203_vm3, %v8700_v1  ;;  %v9915_v1 = vld [vmem:[#allocation83_spill] sm:$0xff] }
 0x41b   : > { %v4043_v25 = vadd.f32 %v3993_v32, %v3751_v16  ;;  %6478 = vmatmul.msk.f32.gmra.mxu0 %vm3203_vm3, %v9912_v20  ;;  %v9928_v20 = vld [vmem:[#allocation58_spill] sm:$0xff] }
 0x41c   : > { %6427 = vmatmul.msk.f32.gmra.mxu2 %vm3203_vm3, %v9911_v31  ;;  %v9927_v31 = vld [vmem:[#allocation44_spill] sm:$0xff] }
 0x41d   : > { %6445 = vmatmul.msk.f32.gmra.mxu3 %vm3203_vm3, %v9913_v51  ;;  %v8912_v53 = vadd.f32 %v4268_v17, %v4043_v25  ;;  %v9926_v25 = vld [vmem:[#allocation49_spill] sm:$0xff] }
 0x41f   : > { %v4495_v3 = vpop.f32.mrf.mxu2  ;;  %v4274_v26 = vpop.f32.mrf.mxu1 }
 0x420   : > { %v8915_v48 = vadd.f32 %v4495_v3, %v9914_v10  ;;  %v3753_v52 = vpop.f32.mrf.mxu3  ;;  %v3999_v42 = vpop.f32.mrf.mxu0  ;;  %v9929_v10 = vld [vmem:[#allocation90_spill] sm:$0xff] }
 0x421   : > { %v3754_v13 = vadd.f32 %v3753_v52, %v9915_v1 }
 0x422   : > { %6512 = vmatmul.msk.f32.gmra.mxu1 %vm3203_vm3, %v8719_v7  ;;  %v9920_v7 = vld [vmem:[#allocation87_spill] sm:$0xff] }
 0x423   : > { %v4044_v61 = vadd.f32 %v3996_v30, %v3754_v13  ;;  %6479 = vmatmul.msk.f32.gmra.mxu0 %vm3203_vm3, %v9917_v8  ;;  %v9932_v8 = vld [vmem:[#allocation62_spill] sm:$0xff] }
 0x424   : > { %6428 = vmatmul.msk.f32.gmra.mxu2 %vm3203_vm3, %v9916_v60  ;;  %v9931_v60 = vld [vmem:[#allocation61_spill] sm:$0xff] }
 0x425   : > { %6446 = vmatmul.msk.f32.gmra.mxu3 %vm3203_vm3, %v9918_v35  ;;  %v8926_v59 = vadd.f32 %v4271_v62, %v4044_v61  ;;  %v9933_v35 = vld [vmem:[#allocation64_spill] sm:$0xff] }
 0x427   : > { %v4498_v49 = vpop.f32.mrf.mxu2  ;;  %v4277_v15 = vpop.f32.mrf.mxu1 }
 0x428   : > { %v8929_v40 = vadd.f32 %v4498_v49, %v9919_v33  ;;  %v3756_v17 = vpop.f32.mrf.mxu3  ;;  %v4002_v43 = vpop.f32.mrf.mxu0 }
 0x429   : > { %v3757_v32 = vadd.f32 %v3756_v17, %v9920_v7 }
 0x42a   : > { %6513 = vmatmul.msk.f32.gmra.mxu1 %vm3203_vm3, %v8738_v36  ;;  %v9925_v36 = vld [vmem:[#allocation91_spill] sm:$0xff] }
 0x42b   : > { %v4045_v56 = vadd.f32 %v3999_v42, %v3757_v32  ;;  %6480 = vmatmul.msk.f32.gmra.mxu0 %vm3203_vm3, %v9922_v6  ;;  %v9935_v6 = vld [vmem:[#allocation10_spill] sm:$0xff] }
 0x42c   : > { %6429 = vmatmul.msk.f32.gmra.mxu2 %vm3203_vm3, %v9921_v37 }
 0x42d   : > { %6447 = vmatmul.msk.f32.gmra.mxu3 %vm3203_vm3, %v9923_v22  ;;  %v8940_v44 = vadd.f32 %v4274_v26, %v4045_v56  ;;  %v5166_v56 = vld [vmem:[#allocation3 + $0xc9] sm:$0xff]  ;;  %v9936_v22 = vld [vmem:[#allocation65_spill] sm:$0xff] }
 0x42f   : > { %v4501_v2 = vpop.f32.mrf.mxu2  ;;  %v4280_v62 = vpop.f32.mrf.mxu1 }
 0x430   : > { %v8943_v21 = vadd.f32 %v4501_v2, %v9924_v54  ;;  %v3759_v4 = vpop.f32.mrf.mxu3  ;;  %v4005_v30 = vpop.f32.mrf.mxu0  ;;  %v9937_v2 = vld [vmem:[#allocation54_spill] sm:$0xff] }
 0x431   : > { %v3760_v5 = vadd.f32 %v3759_v4, %v9925_v36  ;;  %v9938_v4 = vld [vmem:[#allocation97_spill] sm:$0xff] }
 0x432   : > { %6514 = vmatmul.msk.f32.gmra.mxu1 %vm3203_vm3, %v8757_v55  ;;  %v9930_v55 = vld [vmem:[#allocation95_spill] sm:$0xff] }
 0x433   : > { %v4046_v16 = vadd.f32 %v4002_v43, %v3760_v5  ;;  %6481 = vmatmul.msk.f32.gmra.mxu0 %vm3203_vm3, %v9927_v31 }
 0x434   : > { %6430 = vmatmul.msk.f32.gmra.mxu2 %vm3203_vm3, %v9926_v25  ;;  %v5167_v25 = vld [vmem:[#allocation3 + $0xd9] sm:$0xff] }
 0x435   : > { %6448 = vmatmul.msk.f32.gmra.mxu3 %vm3203_vm3, %v9928_v20  ;;  %v8954_v51 = vadd.f32 %v4277_v15, %v4046_v16  ;;  %v9934_v15 = vld [vmem:[#allocation94_spill] sm:$0xff]  ;;  %v9939_v20 = vld [vmem:[#allocation56_spill] sm:$0xff] }
 0x437   : > { %v4504_v3 = vpop.f32.mrf.mxu2  ;;  %v4283_v52 = vpop.f32.mrf.mxu1 }
 0x438   : > { %v8957_v26 = vadd.f32 %v4504_v3, %v9929_v10  ;;  %v3762_v42 = vpop.f32.mrf.mxu3  ;;  %v4008_v1 = vpop.f32.mrf.mxu0  ;;  %v9940_v3 = vld [vmem:[#allocation55_spill] sm:$0xff]  ;;  %v9941_v10 = vld [vmem:[#allocation57_spill] sm:$0xff] }
 0x439   : > { %v3763_v13 = vadd.f32 %v3762_v42, %v9930_v55 }
 0x43a   : > { %6515 = vmatmul.msk.f32.gmra.mxu1 %vm3203_vm3, %v8776_v29 }
 0x43b   : > { %v4047_v61 = vadd.f32 %v4005_v30, %v3763_v13  ;;  %6482 = vmatmul.msk.f32.gmra.mxu0 %vm3203_vm3, %v9932_v8  ;;  %v5168_v8 = vld [vmem:[#allocation3 + $0xe1] sm:$0xff] }
 0x43c   : > { %6431 = vmatmul.msk.f32.gmra.mxu2 %vm3203_vm3, %v9931_v60 }
 0x43d   : > { %6449 = vmatmul.msk.f32.gmra.mxu3 %vm3203_vm3, %v9933_v35  ;;  %v8968_v49 = vadd.f32 %v4280_v62, %v4047_v61  ;;  %v9000_v35 = vld [vmem:[#allocation3 + $0x181] sm:$0xff] }
 0x43f   : > { %v4507_v33 = vpop.f32.mrf.mxu2  ;;  %v4286_v43 = vpop.f32.mrf.mxu1 }
 0x440   : > { %v8971_v17 = vadd.f32 %v4507_v33, %v9934_v15  ;;  %v3765_v7 = vpop.f32.mrf.mxu3  ;;  %v4011_v32 = vpop.f32.mrf.mxu0  ;;  %v9943_v15 = vld [vmem:[#allocation59_spill] sm:$0xff] }
 0x441   : > { %v3766_v29 = vadd.f32 %v3765_v7, %v8752_v24 }
 0x442   : > { %6516 = vmatmul.msk.f32.gmra.mxu1 %vm3203_vm3, %v5166_v56 }
 0x443   : > { %v4048_v37 = vadd.f32 %v4008_v1, %v3766_v29  ;;  %6483 = vmatmul.msk.f32.gmra.mxu0 %vm3203_vm3, %v9936_v22  ;;  %v9942_v1 = vld [vmem:[#allocation100_spill] sm:$0xff] }
 0x444   : > { %6432 = vmatmul.msk.f32.gmra.mxu2 %vm3203_vm3, %v9935_v6  ;;  %v5169_v22 = vld [vmem:[#allocation3 + $0xf1] sm:$0xff] }
 0x445   : > { %6450 = vmatmul.msk.f32.gmra.mxu3 %vm3203_vm3, %v9937_v2  ;;  %v8981_v54 = vadd.f32 %v4283_v52, %v4048_v37  ;;  %v9015_v2 = vld [vmem:[#allocation3 + $0x189] sm:$0xff] }
 0x447   : > { %v4510_v62 = vpop.f32.mrf.mxu2  ;;  %v4289_v24 = vpop.f32.mrf.mxu1 }
 0x448   : > { %v8984_v30 = vadd.f32 %v4510_v62, %v9938_v4  ;;  %v3768_v36 = vpop.f32.mrf.mxu3  ;;  %v4014_v5 = vpop.f32.mrf.mxu0  ;;  %v9945_v4 = vld [vmem:[#allocation67_spill] sm:$0xff] }
 0x449   : > { %v3769_v16 = vadd.f32 %v3768_v36, %v8771_v19 }
 0x44a   : > { %6517 = vmatmul.msk.f32.gmra.mxu1 %vm3203_vm3, %v5167_v25 }
 0x44b   : > { %v4049_v31 = vadd.f32 %v4011_v32, %v3769_v16  ;;  %6484 = vmatmul.msk.f32.gmra.mxu0 %vm3203_vm3, %v9940_v3  ;;  %v5428_v3 = vld [vmem:[#allocation3 + $0x32] sm:$0xff] }
 0x44c   : > { %6433 = vmatmul.msk.f32.gmra.mxu2 %vm3203_vm3, %v9939_v20  ;;  %v5170_v20 = vld [vmem:[#allocation3 + $0xf9] sm:$0xff] }
 0x44d   : > { %6451 = vmatmul.msk.f32.gmra.mxu3 %vm3203_vm3, %v9941_v10  ;;  %v8994_v52 = vadd.f32 %v4286_v43, %v4049_v31  ;;  %v9944_v43 = vld [vmem:[#allocation63_spill] sm:$0xff] }
 0x44f   : > { %v4513_v42 = vpop.f32.mrf.mxu2  ;;  %v4292_v19 = vpop.f32.mrf.mxu1 }
 0x450   : > { %v8997_v55 = vadd.f32 %v4513_v42, %v9942_v1  ;;  %v3771_v13 = vpop.f32.mrf.mxu3  ;;  %v4017_v61 = vpop.f32.mrf.mxu0  ;;  %v9947_v42 = vld [vmem:[#allocation16_spill] sm:$0xff]  ;;  %v9948_v1 = vld [vmem:[#allocation5_spill] sm:$0xff] }
 0x451   : > { %v3772_v60 = vadd.f32 %v3771_v13, %v8790_v58 }
 0x452   : > { %6518 = vmatmul.msk.f32.gmra.mxu1 %vm3203_vm3, %v5168_v8  ;;  %v5171_v8 = vld [vmem:[#allocation3 + $0x109] sm:$0xff] }
 0x453   : > { %v4050_v33 = vadd.f32 %v4014_v5, %v3772_v60  ;;  %6485 = vmatmul.msk.f32.gmra.mxu0 %vm3203_vm3, %v9943_v15  ;;  %v5429_v15 = vld [vmem:[#allocation3 + $0x3a] sm:$0xff] }
 0x454   : > { %6434 = vmatmul.msk.f32.gmra.mxu2 %vm3203_vm3, %v9000_v35 }
 0x455   : > { %6452 = vmatmul.msk.f32.gmra.mxu3 %vm3203_vm3, %v9944_v43  ;;  %v9009_v7 = vadd.f32 %v4289_v24, %v4050_v33  ;;  %v9946_v24 = vld [vmem:[#allocation20_spill] sm:$0xff] }
 0x457   : > { %v4516_v32 = vpop.f32.mrf.mxu2  ;;  %v5300_v29 = vpop.f32.mrf.mxu1 }
 0x458   : > { %v9012_v58 = vadd.f32 %v4516_v32, %v8788_v38  ;;  %v3774_v56 = vpop.f32.mrf.mxu3  ;;  %v5025_v37 = vpop.f32.mrf.mxu0  ;;  %v9949_v32 = vld [vmem:[#allocation4_spill] sm:$0xff] }
 0x459   : > { %v3775_v6 = vadd.f32 %v3774_v56, %v8803_v0 }
 0x45a   : > { %6519 = vmatmul.msk.f32.gmra.mxu1 %vm3203_vm3, %v5169_v22  ;;  %v5172_v22 = vld [vmem:[#allocation3 + $0x111] sm:$0xff] }
 0x45b   : > { %v4051_v62 = vadd.f32 %v4017_v61, %v3775_v6  ;;  %6486 = vmatmul.msk.f32.gmra.mxu0 %vm3203_vm3, %v9945_v4  ;;  %v5430_v4 = vld [vmem:[#allocation3 + $0x4a] sm:$0xff] }
 0x45c   : > { %6435 = vmatmul.msk.f32.gmra.mxu2 %vm3203_vm3, %v9015_v2 }
 0x45d   : > { %6453 = vmatmul.msk.f32.gmra.mxu3 %vm3203_vm3, %v9946_v24  ;;  %v9024_v38 = vadd.f32 %v4292_v19, %v4051_v62 }
 0x45f   : > { %v4519_v36 = vpop.f32.mrf.mxu2  ;;  %v5303_v5 = vpop.f32.mrf.mxu1 }
 0x460   : > { %v9027_v0 = vadd.f32 %v4519_v36, %v8801_v28  ;;  %v4749_v16 = vpop.f32.mrf.mxu3  ;;  %v5028_v25 = vpop.f32.mrf.mxu0  ;;  %v9951_v36 = vld [vmem:[#allocation68_spill] sm:$0xff] }
 0x461   : > { %v4845_v31 = vadd.f32 %v4749_v16, %v8817_v11  ;;  %v9952_v16 = vld [vmem:[#allocation69_spill] sm:$0xff] }
 0x462   : > { %6520 = vmatmul.msk.f32.gmra.mxu1 %vm3203_vm3, %v5170_v20 }
 0x463   : > { %v5121_v10 = vadd.f32 %v5025_v37, %v4845_v31  ;;  %6487 = vmatmul.msk.f32.gmra.mxu0 %vm3203_vm3, %v9947_v42 }
 0x464   : > { %6536 = vmatmul.msk.f32.vlgmr.msra.gmra.mxu2 %vm3203_vm3, %v5428_v3  ;;  %v5173_v3 = vld [vmem:[#allocation3 + $0x121] sm:$0xff] }
 0x465   : > { %6454 = vmatmul.msk.f32.gmra.mxu3 %vm3203_vm3, %v9948_v1  ;;  %v9036_v28 = vadd.f32 %v5300_v29, %v5121_v10  ;;  %v9950_v29 = vld [vmem:[#allocation15_spill] sm:$0xff]  ;;  %v5431_v10 = vld [vmem:[#allocation3 + $0x52] sm:$0xff]  ;;  %v9953_v1 = vld [vmem:[#allocation70_spill] sm:$0xff] }
 0x467   : > { %v4522_v19 = vpop.f32.mrf.mxu2  ;;  %v5306_v33 = vpop.f32.mrf.mxu1 }
 0x468   : > { %v9039_v13 = vadd.f32 %v4522_v19, %v8814_v18  ;;  %v4752_v11 = vpop.f32.mrf.mxu3  ;;  %v5031_v61 = vpop.f32.mrf.mxu0 }
 0x469   : > { %v4846_v60 = vadd.f32 %v4752_v11, %v8831_v39  ;;  %v9954_v11 = vld [vmem:[#allocation71_spill] sm:$0xff] }
 0x46a   : > { %6521 = vmatmul.msk.f32.gmra.mxu1 %vm3203_vm3, %v5171_v8 }
 0x46b   : > { %v5122_v43 = vadd.f32 %v5028_v25, %v4846_v60  ;;  %6488 = vmatmul.msk.f32.gmra.mxu0 %vm3203_vm3, %v9949_v32 }
 0x46c   : > { %6537 = vmatmul.msk.f32.gmra.mxu2 %vm3203_vm3, %v5429_v15  ;;  %v5174_v15 = vld [vmem:[#allocation3 + $0x129] sm:$0xff] }
 0x46d   : > { %6455 = vmatmul.msk.f32.gmra.mxu3 %vm3203_vm3, %v9950_v29  ;;  %v9048_v18 = vadd.f32 %v5303_v5, %v5122_v43  ;;  %v5432_v43 = vld [vmem:[#allocation3 + $0x62] sm:$0xff]  ;;  %v9955_v29 = vld [vmem:[#allocation72_spill] sm:$0xff] }
 0x46f   : > { %v4525_v56 = vpop.f32.mrf.mxu2  ;;  %v5309_v5 = vpop.f32.mrf.mxu1 }
 0x470   : > { %v9051_v37 = vadd.f32 %v4525_v56, %v8828_v14  ;;  %v4755_v39 = vpop.f32.mrf.mxu3  ;;  %v5034_v62 = vpop.f32.mrf.mxu0  ;;  %v9956_v56 = vld [vmem:[#allocation73_spill] sm:$0xff] }
 0x471   : > { %v4847_v6 = vadd.f32 %v4755_v39, %v8845_v12 }
 0x472   : > { %6522 = vmatmul.msk.f32.gmra.mxu1 %vm3203_vm3, %v5172_v22 }
 0x473   : > { %v5123_v24 = vadd.f32 %v5031_v61, %v4847_v6  ;;  %6489 = vmatmul.msk.f32.gmra.mxu0 %vm3203_vm3, %v9951_v36  ;;  %v5433_v36 = vld [vmem:[#allocation3 + $0x6a] sm:$0xff] }
 0x474   : > { %6538 = vmatmul.msk.f32.gmra.mxu2 %vm3203_vm3, %v5430_v4 }
 0x475   : > { %6456 = vmatmul.msk.f32.gmra.mxu3 %vm3203_vm3, %v9952_v16  ;;  %v9060_v14 = vadd.f32 %v5306_v33, %v5123_v24  ;;  %v5175_v24 = vld [vmem:[#allocation3 + $0x139] sm:$0xff]  ;;  %v9957_v16 = vld [vmem:[#allocation76_spill] sm:$0xff] }
 0x477   : > { %v4528_v25 = vpop.f32.mrf.mxu2 }
 0x478   : > { %v9063_v12 = vadd.f32 %v4528_v25, %v8842_v34  ;;  %v4758_v31 = vpop.f32.mrf.mxu3  ;;  %v5037_v19 = vpop.f32.mrf.mxu0  ;;  %v9958_v25 = vld [vmem:[#allocation77_spill] sm:$0xff] }
 0x479   : > { %v4848_v20 = vadd.f32 %v4758_v31, %v8859_v45  ;;  %v5312_v34 = vpop.f32.mrf.mxu1 }
 0x47a   : > { %6523 = vmatmul.msk.f32.gmra.mxu1 %vm3203_vm3, %v5173_v3 }
 0x47b   : > { %v5124_v42 = vadd.f32 %v5034_v62, %v4848_v20  ;;  %6490 = vmatmul.msk.f32.gmra.mxu0 %vm3203_vm3, %v9953_v1 }
 0x47c   : > { %6539 = vmatmul.msk.f32.gmra.mxu2 %vm3203_vm3, %v5431_v10 }
 0x47d   : > { %6457 = vmatmul.msk.f32.gmra.mxu3 %vm3203_vm3, %v9954_v11  ;;  %v9072_v61 = vadd.f32 %v5309_v5, %v5124_v42  ;;  %v5176_v42 = vld [vmem:[#allocation3 + $0x141] sm:$0xff] }
 0x47f   : > { %v4531_v60 = vpop.f32.mrf.mxu2 }
 0x480   : > { %v9075_v45 = vadd.f32 %v4531_v60, %v8856_v23  ;;  %v4761_v8 = vpop.f32.mrf.mxu3  ;;  %v5040_v23 = vpop.f32.mrf.mxu0  ;;  %v9960_v60 = vld [vmem:[#allocation81_spill] sm:$0xff] }
 0x481   : > { %v4849_v33 = vadd.f32 %v4761_v8, %v8873_v9  ;;  %v5315_v9 = vpop.f32.mrf.mxu1 }
 0x482   : > { %6524 = vmatmul.msk.f32.gmra.mxu1 %vm3203_vm3, %v5174_v15 }
 0x483   : > { %v5125_v32 = vadd.f32 %v5037_v19, %v4849_v33  ;;  %6491 = vmatmul.msk.f32.gmra.mxu0 %vm3203_vm3, %v9955_v29  ;;  %v5434_v19 = vld [vmem:[#allocation3 + $0x7a] sm:$0xff]  ;;  %v5435_v29 = vld [vmem:[#allocation3 + $0x82] sm:$0xff] }
 0x484   : > { %6540 = vmatmul.msk.f32.gmra.mxu2 %vm3203_vm3, %v5432_v43  ;;  %v5177_v43 = vld [vmem:[#allocation3 + $0x151] sm:$0xff] }
 0x485   : > { %6458 = vmatmul.msk.f32.gmra.mxu3 %vm3203_vm3, %v9956_v56  ;;  %v9084_v39 = vadd.f32 %v5312_v34, %v5125_v32  ;;  %v9959_v34 = vld [vmem:[#allocation80_spill] sm:$0xff] }
 0x487   : > { %v4534_v6 = vpop.f32.mrf.mxu2 }
 0x488   : > { %v9087_v22 = vadd.f32 %v4534_v6, %v8870_v41  ;;  %v4764_v62 = vpop.f32.mrf.mxu3 }
 0x489   : > { %v4850_v4 = vadd.f32 %v4764_v62, %v8887_v63  ;;  %v5043_v63 = vpop.f32.mrf.mxu0  ;;  %v5318_v1 = vpop.f32.mrf.mxu1 }
 0x48a   : > { %6525 = vmatmul.msk.f32.gmra.mxu1 %vm3203_vm3, %v5175_v24  ;;  %v5436_v24 = vld [vmem:[#allocation3 + $0x92] sm:$0xff] }
 0x48b   : > { %v5126_v5 = vadd.f32 %v5040_v23, %v4850_v4  ;;  %6492 = vmatmul.msk.f32.gmra.mxu0 %vm3203_vm3, %v9957_v16  ;;  %v9961_v23 = vld [vmem:[#allocation84_spill] sm:$0xff]  ;;  %v5178_v4 = vld [vmem:[#allocation3 + $0x159] sm:$0xff] }
 0x48c   : > { %6541 = vmatmul.msk.f32.gmra.mxu2 %vm3203_vm3, %v5433_v36  ;;  %v9963_v36 = vld [vmem:[#allocation88_spill] sm:$0xff] }
 0x48d   : > { %6459 = vmatmul.msk.f32.gmra.mxu3 %vm3203_vm3, %v9958_v25  ;;  %v9096_v31 = vadd.f32 %v5315_v9, %v5126_v5  ;;  %v9962_v9 = vld [vmem:[#allocation85_spill] sm:$0xff] }
 0x48e   : > { %v9964_v5 = vld [vmem:[#allocation89_spill] sm:$0xff] }
 0x48f   : > { %v4537_v41 = vpop.f32.mrf.mxu2 }
 0x490   : > { %v9099_v20 = vadd.f32 %v4537_v41, %v8884_v46  ;;  %v4767_v3 = vpop.f32.mrf.mxu3  ;;  %v5179_v41 = vld [vmem:[#allocation3 + $0x169] sm:$0xff] }
 0x491   : > { %v4851_v10 = vadd.f32 %v4767_v3, %v8901_v57  ;;  %v5046_v32 = vpop.f32.mrf.mxu0  ;;  %v5321_v6 = vpop.f32.mrf.mxu1  ;;  %v9966_v3 = vld [vmem:[#allocation93_spill] sm:$0xff] }
 0x492   : > { %6526 = vmatmul.msk.f32.gmra.mxu1 %vm3203_vm3, %v5176_v42 }
 0x493   : > { %v5127_v11 = vadd.f32 %v5043_v63, %v4851_v10  ;;  %6493 = vmatmul.msk.f32.gmra.mxu0 %vm3203_vm3, %v9959_v34  ;;  %v5437_v63 = vld [vmem:[#allocation3 + $0x9a] sm:$0xff] }
 0x494   : > { %6542 = vmatmul.msk.f32.gmra.mxu2 %vm3203_vm3, %v5434_v19  ;;  %v5438_v19 = vld [vmem:[#allocation3 + $0xaa] sm:$0xff] }
 0x495   : > { %6460 = vmatmul.msk.f32.gmra.mxu3 %vm3203_vm3, %v9960_v60  ;;  %v9108_v46 = vadd.f32 %v5318_v1, %v5127_v11  ;;  %v5180_v1 = vld [vmem:[#allocation3 + $0x171] sm:$0xff] }
 0x496   : > { %v5439_v60 = vld [vmem:[#allocation3 + $0xb2] sm:$0xff] }
 0x497   : > { %v4540_v8 = vpop.f32.mrf.mxu2 }
 0x498   : > { %v9111_v33 = vadd.f32 %v4540_v8, %v8898_v50  ;;  %v4770_v57 = vpop.f32.mrf.mxu3  ;;  %v9969_v8 = vld [vmem:[#allocation99_spill] sm:$0xff] }
 0x499   : > { %v4852_v15 = vadd.f32 %v4770_v57, %v8915_v48 }
 0x49a   : > { %6527 = vmatmul.msk.f32.gmra.mxu1 %vm3203_vm3, %v5177_v43 }
 0x49b   : > { %v5128_v56 = vadd.f32 %v5046_v32, %v4852_v15  ;;  %6494 = vmatmul.msk.f32.gmra.mxu0 %vm3203_vm3, %v9961_v23  ;;  %v5440_v15 = vld [vmem:[#allocation3 + $0xc2] sm:$0xff]  ;;  %v5183_v32 = vld [vmem:[#allocation3 + $0x199] sm:$0xff] }
 0x49c   : > { %6543 = vmatmul.msk.f32.gmra.mxu2 %vm3203_vm3, %v5435_v29  ;;  %v4908_v29 = vld [vmem:[#allocation3 + $0x198] sm:$0xff]  ;;  %v4909_v23 = vld [vmem:[#allocation3 + $0x1a0] sm:$0xff] }
 0x49d   : > { %6461 = vmatmul.msk.f32.gmra.mxu3 %vm3203_vm3, %v9962_v9  ;;  %v9120_v50 = vadd.f32 %v5321_v6, %v5128_v56  ;;  %v5442_v6 = vld [vmem:[#allocation3 + $0xda] sm:$0xff]  ;;  %v9185_v9 = vld [vmem:[#allocation3 + $0x18a] sm:$0xff] }
 0x49f   : > { %v4543_v62 = vpop.f32.mrf.mxu2 }
 0x4a0   : > { %v9123_v48 = vadd.f32 %v4543_v62, %v8912_v53  ;;  %v9965_v53 = vld [vmem:[#allocation92_spill] sm:$0xff] }
 0x4a2   : > { %6528 = vmatmul.msk.f32.gmra.mxu1 %vm3203_vm3, %v5178_v4 }
 0x4a3   : > { %6495 = vmatmul.msk.f32.gmra.mxu0 %vm3203_vm3, %v9963_v36 }
 0x4a4   : > { %6544 = vmatmul.msk.f32.gmra.mxu2 %vm3203_vm3, %v5436_v24 }
 0x4a5   : > { %6462 = vmatmul.msk.f32.gmra.mxu3 %vm3203_vm3, %v9964_v5  ;;  %v5444_v5 = vld [vmem:[#allocation3 + $0xf2] sm:$0xff] }
 0x4a7   : > { %v4546_v16 = vpop.f32.mrf.mxu2 }
 0x4a8   : > { %v9132_v25 = vadd.f32 %v4546_v16, %v8926_v59  ;;  %v9967_v59 = vld [vmem:[#allocation96_spill] sm:$0xff] }
 0x4a9   : > { %v9199_v16 = vld [vmem:[%s9585_s8] ss:$0 sm:$0xff] }
 0x4aa   : > { %6529 = vmatmul.msk.f32.gmra.mxu1 %vm3203_vm3, %v5179_v41 }
 0x4ab   : > { %6496 = vmatmul.msk.f32.gmra.mxu0 %vm3203_vm3, %v9965_v53 }
 0x4ac   : > { %6545 = vmatmul.msk.f32.gmra.mxu2 %vm3203_vm3, %v5437_v63  ;;  %v9971_v63 = vld [vmem:[#allocation27_spill] sm:$0xff] }
 0x4ad   : > { %6463 = vmatmul.msk.f32.gmra.mxu3 %vm3203_vm3, %v9966_v3  ;;  %v3135_v53 = vmul.f32 %v9199_v16, %v9971_v63  ;;  %v5447_v63 = vld [vmem:[#allocation3 + $0x112] sm:$0xff] }
 0x4af   : > { %v4549_v10 = vpop.f32.mrf.mxu2 }
 0x4b0   : > { %v9141_v42 = vadd.f32 %v4549_v10, %v8940_v44  ;;  %v9968_v44 = vld [vmem:[#allocation98_spill] sm:$0xff]  ;;  %v9218_v10 = vld [vmem:[%s9583_s6] ss:$0 sm:$0xff] }
 0x4b2   : > { %6530 = vmatmul.msk.f32.gmra.mxu1 %vm3203_vm3, %v5180_v1 }
 0x4b3   : > { %6497 = vmatmul.msk.f32.gmra.mxu0 %vm3203_vm3, %v8736_v27 }
 0x4b4   : > { %6546 = vmatmul.msk.f32.gmra.mxu2 %vm3203_vm3, %v5438_v19  ;;  %v5445_v19 = vld [vmem:[#allocation3 + $0xfa] sm:$0xff] }
 0x4b5   : > { %6464 = vmatmul.msk.f32.gmra.mxu3 %vm3203_vm3, %v9967_v59 }
 0x4b7   : > { %v4552_v11 = vpop.f32.mrf.mxu2 }
 0x4b8   : > { %v9150_v34 = vadd.f32 %v4552_v11, %v8954_v51  ;;  %v9970_v51 = vld [vmem:[#allocation101_spill] sm:$0xff] }
 0x4ba   : > { %6531 = vmatmul.msk.f32.gmra.mxu1 %vm3203_vm3, %v9000_v35 }
 0x4bb   : > { %6498 = vmatmul.msk.f32.gmra.mxu0 %vm3203_vm3, %v9968_v44 }
 0x4bc   : > { %6547 = vmatmul.msk.f32.gmra.mxu2 %vm3203_vm3, %v5439_v60  ;;  %v9225_v60 = vpop.f32.mrf.mxu3 }
 0x4bd   : > { %6465 = vmatmul.msk.f32.gmra.mxu3 %vm3203_vm3, %v9969_v8  ;;  %v9972_v8 = vld [vmem:[#allocation7_spill] sm:$0xff] }
 0x4bf   : > { %v4555_v27 = vpop.f32.mrf.mxu2 }
 0x4c0   : > { %v9160_v57 = vadd.f32 %v4555_v27, %v8968_v49  ;;  %v5441_v49 = vld [vmem:[#allocation3 + $0xca] sm:$0xff]  ;;  %v3136_v27 = vmul.f32 %v9199_v16, %v9972_v8 }
 0x4c2   : > { %6532 = vmatmul.msk.f32.gmra.mxu1 %vm3203_vm3, %v9015_v2  ;;  %v9175_v2 = vld [vmem:[#allocation3 + $0x182] sm:$0xff] }
 0x4c3   : > { %6499 = vmatmul.msk.f32.gmra.mxu0 %vm3203_vm3, %v8774_v47 }
 0x4c4   : > { %6548 = vmatmul.msk.f32.gmra.mxu2 %vm3203_vm3, %v5440_v15 }
 0x4c5   : > { %6466 = vmatmul.msk.f32.gmra.mxu3 %vm3203_vm3, %v9970_v51 }
 0x4c7   : > { %v4558_v35 = vpop.f32.mrf.mxu2 }
 0x4c8   : > { %v9170_v43 = vadd.f32 %v4558_v35, %v8981_v54  ;;  %v5184_v54 = vld [vmem:[#allocation3 + $0x1a1] sm:$0xff] }
 0x4ca   : > { %6533 = vmatmul.msk.f32.gmra.mxu1 %vm3203_vm3, %v5183_v32  ;;  %v9238_v32 = vpop.f32.mrf.mxu0 }
 0x4cb   : > { %6500 = vmatmul.msk.f32.gmra.mxu0 %vm3203_vm3, %v4908_v29  ;;  %v5446_v29 = vld [vmem:[#allocation3 + $0x10a] sm:$0xff] }
 0x4cc   : > { %6549 = vmatmul.msk.f32.gmra.mxu2 %vm3203_vm3, %v5441_v49 }
 0x4cd   : > { %6467 = vmatmul.msk.f32.gmra.mxu3 %vm3203_vm3, %v9175_v2 }
 0x4cf   : > { %v4561_v47 = vpop.f32.mrf.mxu2 }
 0x4d0   : > { %v9180_v56 = vadd.f32 %v4561_v47, %v8994_v52  ;;  %v5443_v52 = vld [vmem:[#allocation3 + $0xe2] sm:$0xff] }
 0x4d2   : > { %6534 = vmatmul.msk.f32.gmra.mxu1 %vm3203_vm3, %v5184_v54  ;;  %v9243_v54 = vpop.f32.mrf.mxu1 }
 0x4d3   : > { %6501 = vmatmul.msk.f32.gmra.mxu0 %vm3203_vm3, %v4909_v23 }
 0x4d4   : > { %6550 = vmatmul.msk.f32.gmra.mxu2 %vm3203_vm3, %v5442_v6  ;;  %v9245_v6 = vpop.f32.mrf.mxu3 }
 0x4d5   : > { %6468 = vmatmul.msk.f32.gmra.mxu3 %vm3203_vm3, %v9185_v9 }
 0x4d7   : > { %v4564_v62 = vpop.f32.mrf.mxu2 }
 0x4d8   : > { %v9190_v4 = vadd.f32 %v4564_v62, %v9009_v7  ;;  %v9205_v7 = vld [vmem:[%s9582_s5] ss:$0 sm:$0xff] }
 0x4dc   : > { %6551 = vmatmul.msk.f32.gmra.mxu2 %vm3203_vm3, %v5443_v52 }
 0x4df   : > { %v4567_v24 = vpop.f32.mrf.mxu2 }
 0x4e0   : > { %v9194_v36 = vadd.f32 %v4567_v24, %v9024_v38  ;;  %v9212_v38 = vld [vmem:[%s9586_s9] ss:$0 sm:$0xff] }
 0x4e1   : > { %v3171_v59 = vadd.f32 %v9212_v38, %v3135_v53  ;;  %v3172_v49 = vadd.f32 %v9212_v38, %v3136_v27  ;;  %v9263_v27 = vpop.f32.mrf.mxu3 }
 0x4e4   : > { %6552 = vmatmul.msk.f32.gmra.mxu2 %vm3203_vm3, %v5444_v5 }
 0x4e7   : > { %v5575_v41 = vpop.f32.mrf.mxu2 }
 0x4e8   : > { %v5671_v3 = vadd.f32 %v5575_v41, %v9036_v28 }
 0x4ea   : > { %v5707_v1 = vmul.f32 %v9205_v7, %v5671_v3 }
 0x4ec   : > { %v5743_v11 = vadd.f32 %v9218_v10, %v5707_v1  ;;  %6553 = vmatmul.msk.f32.gmra.mxu2 %vm3203_vm3, %v5445_v19  ;;  %v9256_v1 = vpop.f32.mrf.mxu0 }
 0x4ee   : > { %v5775_v44 = vadd.f32 %v5743_v11, %v3171_v59  ;;  %v9974_v11 = vld [vmem:[#allocation9_spill] sm:$0xff] }
 0x4ef   : > { %v5578_v28 = vpop.f32.mrf.mxu2 }
 0x4f0   : > { %v5807_v15 = vmax.f32 %v5775_v44, 0.0  ;;  %v5672_v51 = vadd.f32 %v5578_v28, %v9048_v18  ;;  %v9973_v18 = vld [vmem:[#allocation23_spill] sm:$0xff]  ;;  %v3138_v44 = vmul.f32 %v9199_v16, %v9974_v11  ;;  %v9260_v28 = vpop.f32.mrf.mxu1  ;;  %v9976_v11 = vld [vmem:[#allocation22_spill] sm:$0xff] }
 0x4f1   : > { %v3137_v52 = vmul.f32 %v9199_v16, %v9973_v18 }
 0x4f2   : > { %5839 = vst.msk [vmem:[%s9230_s22] sm:$0xff] %vm3203_vm3, %v5807_v15  ;;  %v5708_v35 = vmul.f32 %v9205_v7, %v5672_v51  ;;  %v5448_v51 = vld [vmem:[#allocation3 + $0x122] sm:$0xff] }
 0x4f3   : > { %v3173_v53 = vadd.f32 %v9212_v38, %v3137_v52 }
 0x4f4   : > { %v5744_v47 = vadd.f32 %v9218_v10, %v5708_v35  ;;  %6554 = vmatmul.msk.f32.gmra.mxu2 %vm3203_vm3, %v5446_v29  ;;  %v3174_v35 = vadd.f32 %v9212_v38, %v3138_v44 }
 0x4f6   : > { %v5776_v23 = vadd.f32 %v5744_v47, %v3172_v49  ;;  %v9271_v47 = vpop.f32.mrf.mxu0 }
 0x4f7   : > { %v5581_v62 = vpop.f32.mrf.mxu2 }
 0x4f8   : > { %v5808_v24 = vmax.f32 %v5776_v23, 0.0  ;;  %v5673_v5 = vadd.f32 %v5581_v62, %v9060_v14  ;;  %v9975_v62 = vld [vmem:[#allocation8_spill] sm:$0xff] }
 0x4fa   : > { %5840 = vst.msk [vmem:[%s9230_s22 + $0x8] sm:$0xff] %vm3203_vm3, %v5808_v24  ;;  %v5709_v41 = vmul.f32 %v9205_v7, %v5673_v5  ;;  %v9276_v24 = vpop.f32.mrf.mxu1 }
 0x4fc   : > { %v5745_v3 = vadd.f32 %v9218_v10, %v5709_v41  ;;  %6555 = vmatmul.msk.f32.gmra.mxu2 %vm3203_vm3, %v5447_v63  ;;  %v9281_v41 = vpop.f32.mrf.mxu3  ;;  %v5449_v63 = vld [vmem:[#allocation3 + $0x12a] sm:$0xff] }
 0x4fe   : > { %v5777_v19 = vadd.f32 %v5745_v3, %v3173_v53 }
 0x4ff   : > { %v5584_v59 = vpop.f32.mrf.mxu2 }
 0x500   : > { %v5809_v14 = vmax.f32 %v5777_v19, 0.0  ;;  %v5674_v8 = vadd.f32 %v5584_v59, %v9072_v61  ;;  %v3139_v61 = vmul.f32 %v9199_v16, %v9975_v62 }
 0x502   : > { %5841 = vst.msk [vmem:[%s9230_s22 + $0x10] sm:$0xff] %vm3203_vm3, %v5809_v14  ;;  %v5710_v15 = vmul.f32 %v9205_v7, %v5674_v8  ;;  %v3175_v53 = vadd.f32 %v9212_v38, %v3139_v61  ;;  %v9289_v8 = vpop.f32.mrf.mxu0 }
 0x504   : > { %v5746_v29 = vadd.f32 %v9218_v10, %v5710_v15  ;;  %6556 = vmatmul.msk.f32.gmra.mxu2 %vm3203_vm3, %v5448_v51  ;;  %v5450_v51 = vld [vmem:[#allocation3 + $0x13a] sm:$0xff] }
 0x506   : > { %v5778_v49 = vadd.f32 %v5746_v29, %v3174_v35  ;;  %v9295_v29 = vpop.f32.mrf.mxu1 }
 0x507   : > { %v5587_v23 = vpop.f32.mrf.mxu2 }
 0x508   : > { %v5810_v18 = vmax.f32 %v5778_v49, 0.0  ;;  %v5675_v52 = vadd.f32 %v5587_v23, %v9084_v39  ;;  %v3140_v39 = vmul.f32 %v9199_v16, %v9976_v11  ;;  %v9299_v23 = vpop.f32.mrf.mxu3  ;;  %v4853_v11 = vadd.f32 %v9225_v60, %v8929_v40  ;;  %v5452_v40 = vld [vmem:[#allocation3 + $0x152] sm:$0xff] }
 0x50a   : > { %5842 = vst.msk [vmem:[%s9230_s22 + $0x18] sm:$0xff] %vm3203_vm3, %v5810_v18  ;;  %v5711_v5 = vmul.f32 %v9205_v7, %v5675_v52  ;;  %v3176_v35 = vadd.f32 %v9212_v38, %v3140_v39 }
 0x50c   : > { %v5747_v3 = vadd.f32 %v9218_v10, %v5711_v5  ;;  %6557 = vmatmul.msk.f32.gmra.mxu2 %vm3203_vm3, %v5449_v63 }
 0x50e   : > { %v5779_v19 = vadd.f32 %v5747_v3, %v3175_v53  ;;  %v9307_v53 = vpop.f32.mrf.mxu0  ;;  %v5451_v3 = vld [vmem:[#allocation3 + $0x142] sm:$0xff]  ;;  %v9314_v39 = vpop.f32.mrf.mxu1 }
 0x50f   : > { %v5590_v59 = vpop.f32.mrf.mxu2 }
 0x510   : > { %v5811_v44 = vmax.f32 %v5779_v19, 0.0  ;;  %v5676_v14 = vadd.f32 %v5590_v59, %v9096_v31  ;;  %v9977_v31 = vld [vmem:[#allocation34_spill] sm:$0xff] }
 0x511   : > { %v3141_v18 = vmul.f32 %v9199_v16, %v9977_v31 }
 0x512   : > { %5843 = vst.msk [vmem:[%s9230_s22 + $0x20] sm:$0xff] %vm3203_vm3, %v5811_v44  ;;  %v5712_v15 = vmul.f32 %v9205_v7, %v5676_v14  ;;  %v9316_v44 = vpop.f32.mrf.mxu3 }
 0x513   : > { %v3177_v19 = vadd.f32 %v9212_v38, %v3141_v18 }
 0x514   : > { %v5748_v49 = vadd.f32 %v9218_v10, %v5712_v15  ;;  %6558 = vmatmul.msk.f32.gmra.mxu2 %vm3203_vm3, %v5450_v51  ;;  %v9978_v15 = vld [vmem:[#allocation12_spill] sm:$0xff] }
 0x515   : > { %v3142_v51 = vmul.f32 %v9199_v16, %v9978_v15 }
 0x516   : > { %v5780_v62 = vadd.f32 %v5748_v49, %v3176_v35  ;;  %v9328_v18 = vpop.f32.mrf.mxu0 }
 0x517   : > { %v5593_v61 = vpop.f32.mrf.mxu2  ;;  %v3178_v60 = vadd.f32 %v9212_v38, %v3142_v51  ;;  %v4855_v51 = vadd.f32 %v9263_v27, %v8957_v26 }
 0x518   : > { %v5812_v52 = vmax.f32 %v5780_v62, 0.0  ;;  %v5677_v5 = vadd.f32 %v5593_v61, %v9108_v46  ;;  %v5129_v62 = vadd.f32 %v9238_v32, %v4853_v11 }
 0x51a   : > { %5844 = vst.msk [vmem:[%s9230_s22 + $0x28] sm:$0xff] %vm3203_vm3, %v5812_v52  ;;  %v5713_v63 = vmul.f32 %v9205_v7, %v5677_v5  ;;  %v4854_v52 = vadd.f32 %v9245_v6, %v8943_v21  ;;  %v5404_v32 = vadd.f32 %v9243_v54, %v5129_v62  ;;  %v5453_v6 = vld [vmem:[#allocation3 + $0x15a] sm:$0xff] }
 0x51c   : > { %v5749_v59 = vadd.f32 %v9218_v10, %v5713_v63  ;;  %6559 = vmatmul.msk.f32.gmra.mxu2 %vm3203_vm3, %v5451_v3  ;;  %v9979_v63 = vld [vmem:[#allocation30_spill] sm:$0xff] }
 0x51d   : > { %v3143_v3 = vmul.f32 %v9199_v16, %v9979_v63  ;;  %v4856_v63 = vadd.f32 %v9281_v41, %v8971_v17 }
 0x51e   : > { %v5781_v46 = vadd.f32 %v5749_v59, %v3177_v19  ;;  %v9335_v19 = vpop.f32.mrf.mxu1  ;;  %v9349_v62 = vpop.f32.mrf.mxu0 }
 0x51f   : > { %v5596_v14 = vpop.f32.mrf.mxu2  ;;  %v3179_v54 = vadd.f32 %v9212_v38, %v3143_v3 }
 0x520   : > { %v5813_v35 = vmax.f32 %v5781_v46, 0.0  ;;  %v5678_v49 = vadd.f32 %v5596_v14, %v9120_v50  ;;  %v9337_v46 = vpop.f32.mrf.mxu3  ;;  %v5130_v14 = vadd.f32 %v9256_v1, %v4854_v52  ;;  %v5131_v52 = vadd.f32 %v9271_v47, %v4855_v51 }
 0x522   : > { %5845 = vst.msk [vmem:[%s9230_s22 + $0x30] sm:$0xff] %vm3203_vm3, %v5813_v35  ;;  %v5714_v61 = vmul.f32 %v9205_v7, %v5678_v49  ;;  %v5405_v49 = vadd.f32 %v9260_v28, %v5130_v14  ;;  %v5454_v28 = vld [vmem:[#allocation3 + $0x16a] sm:$0xff]  ;;  %v5406_v3 = vadd.f32 %v9276_v24, %v5131_v52 }
 0x524   : > { %v5750_v31 = vadd.f32 %v9218_v10, %v5714_v61  ;;  %6560 = vmatmul.msk.f32.gmra.mxu2 %vm3203_vm3, %v5452_v40  ;;  %v9980_v61 = vld [vmem:[#allocation14_spill] sm:$0xff] }
 0x525   : > { %v3144_v40 = vmul.f32 %v9199_v16, %v9980_v61 }
 0x526   : > { %v5782_v50 = vadd.f32 %v5750_v31, %v3178_v60 }
 0x527   : > { %v5599_v5 = vpop.f32.mrf.mxu2 }
 0x528   : > { %v5814_v59 = vmax.f32 %v5782_v50, 0.0  ;;  %v5679_v11 = vadd.f32 %v5599_v5, %v5404_v32  ;;  %v9354_v50 = vpop.f32.mrf.mxu1  ;;  %v9359_v27 = vpop.f32.mrf.mxu3  ;;  %v3180_v32 = vadd.f32 %v9212_v38, %v3144_v40 }
 0x52a   : > { %5846 = vst.msk [vmem:[%s9230_s22 + $0x38] sm:$0xff] %vm3203_vm3, %v5814_v59  ;;  %v5715_v21 = vmul.f32 %v9205_v7, %v5679_v11  ;;  %v9981_v11 = vld [vmem:[#allocation13_spill] sm:$0xff] }
 0x52b   : > { %v3145_v14 = vmul.f32 %v9199_v16, %v9981_v11  ;;  %v9983_v11 = vld [vmem:[#allocation41_spill] sm:$0xff] }
 0x52c   : > { %v5751_v15 = vadd.f32 %v9218_v10, %v5715_v21  ;;  %6561 = vmatmul.msk.f32.gmra.mxu2 %vm3203_vm3, %v5453_v6 }
 0x52d   : > { %v3181_v17 = vadd.f32 %v9212_v38, %v3145_v14  ;;  %v3147_v14 = vmul.f32 %v9199_v16, %v9983_v11 }
 0x52e   : > { %v5783_v35 = vadd.f32 %v5751_v15, %v3179_v54  ;;  %v9369_v54 = vpop.f32.mrf.mxu0  ;;  %v5132_v15 = vadd.f32 %v9289_v8, %v4856_v63 }
 0x52f   : > { %v5602_v1 = vpop.f32.mrf.mxu2 }
 0x530   : > { %v5815_v60 = vmax.f32 %v5783_v35, 0.0  ;;  %v5680_v31 = vadd.f32 %v5602_v1, %v5405_v49  ;;  %v5455_v35 = vld [vmem:[#allocation3 + $0x172] sm:$0xff]  ;;  %v9376_v41 = vpop.f32.mrf.mxu1  ;;  %v9380_v49 = vpop.f32.mrf.mxu3  ;;  %v4857_v1 = vadd.f32 %v9299_v23, %v8984_v30  ;;  %v5407_v61 = vadd.f32 %v9295_v29, %v5132_v15 }
 0x531   : > { %v4858_v29 = vadd.f32 %v9316_v44, %v8997_v55  ;;  %v3183_v55 = vadd.f32 %v9212_v38, %v3147_v14 }
 0x532   : > { %5847 = vst.msk [vmem:[%s9230_s22 + $0x40] sm:$0xff] %vm3203_vm3, %v5815_v60  ;;  %v5716_v26 = vmul.f32 %v9205_v7, %v5680_v31  ;;  %v9982_v60 = vld [vmem:[#allocation29_spill] sm:$0xff] }
 0x533   : > { %v3146_v31 = vmul.f32 %v9199_v16, %v9982_v60  ;;  %v5134_v15 = vadd.f32 %v9328_v18, %v4858_v29 }
 0x534   : > { %v5752_v5 = vadd.f32 %v9218_v10, %v5716_v26  ;;  %6562 = vmatmul.msk.f32.gmra.mxu2 %vm3203_vm3, %v5454_v28  ;;  %v5133_v28 = vadd.f32 %v9307_v53, %v4857_v1 }
 0x535   : > { %v3182_v63 = vadd.f32 %v9212_v38, %v3146_v31  ;;  %v5458_v31 = vld [vmem:[#allocation3 + $0x19a] sm:$0xff] }
 0x536   : > { %v5784_v47 = vadd.f32 %v5752_v5, %v3180_v32  ;;  %v5073_v5 = vpop.f32.mrf.mxu0  ;;  %v5408_v53 = vadd.f32 %v9314_v39, %v5133_v28 }
 0x537   : > { %v5605_v59 = vpop.f32.mrf.mxu2 }
 0x538   : > { %v5816_v21 = vmax.f32 %v5784_v47, 0.0  ;;  %v5681_v6 = vadd.f32 %v5605_v59, %v5406_v3  ;;  %v9397_v23 = vpop.f32.mrf.mxu1  ;;  %v4800_v3 = vpop.f32.mrf.mxu3 }
 0x53a   : > { %5848 = vst.msk [vmem:[%s9230_s22 + $0x48] sm:$0xff] %vm3203_vm3, %v5816_v21  ;;  %v5717_v51 = vmul.f32 %v9205_v7, %v5681_v6 }
 0x53c   : > { %v5753_v24 = vadd.f32 %v9218_v10, %v5717_v51  ;;  %6563 = vmatmul.msk.f32.gmra.mxu2 %vm3203_vm3, %v5455_v35  ;;  %v4859_v51 = vadd.f32 %v9337_v46, %v9012_v58  ;;  %v4860_v46 = vadd.f32 %v9359_v27, %v9027_v0 }
 0x53e   : > { %v5785_v8 = vadd.f32 %v5753_v24, %v3181_v17  ;;  %v5076_v39 = vpop.f32.mrf.mxu0  ;;  %v5409_v17 = vadd.f32 %v9335_v19, %v5134_v15  ;;  %v9984_v24 = vld [vmem:[#allocation18_spill] sm:$0xff] }
 0x53f   : > { %v5608_v40 = vpop.f32.mrf.mxu2  ;;  %v3148_v1 = vmul.f32 %v9199_v16, %v9984_v24 }
 0x540   : > { %v5817_v52 = vmax.f32 %v5785_v8, 0.0  ;;  %v5682_v26 = vadd.f32 %v5608_v40, %v5407_v61  ;;  %v5351_v8 = vpop.f32.mrf.mxu1  ;;  %v4803_v60 = vpop.f32.mrf.mxu3 }
 0x541   : > { %v3184_v58 = vadd.f32 %v9212_v38, %v3148_v1 }
 0x542   : > { %5849 = vst.msk [vmem:[%s9230_s22 + $0x50] sm:$0xff] %vm3203_vm3, %v5817_v52  ;;  %v5718_v32 = vmul.f32 %v9205_v7, %v5682_v26  ;;  %v5135_v52 = vadd.f32 %v9349_v62, %v4859_v51  ;;  %v9985_v62 = vld [vmem:[#allocation37_spill] sm:$0xff] }
 0x544   : > { %v5754_v30 = vadd.f32 %v9218_v10, %v5718_v32  ;;  %6564 = vmatmul.msk.f32.gmra.mxu2 %vm3203_vm3, %v9175_v2  ;;  %v5410_v28 = vadd.f32 %v9354_v50, %v5135_v52  ;;  %v9987_v52 = vld [vmem:[#allocation19_spill] sm:$0xff] }
 0x546   : > { %v5786_v47 = vadd.f32 %v5754_v30, %v3182_v63  ;;  %v5079_v32 = vpop.f32.mrf.mxu0  ;;  %v3149_v30 = vmul.f32 %v9199_v16, %v9985_v62 }
 0x547   : > { %v5611_v59 = vpop.f32.mrf.mxu2 }
 0x548   : > { %v5818_v21 = vmax.f32 %v5786_v47, 0.0  ;;  %v5683_v6 = vadd.f32 %v5611_v59, %v5408_v53  ;;  %v5459_v53 = vld [vmem:[#allocation3 + $0x1a2] sm:$0xff]  ;;  %v5136_v59 = vadd.f32 %v9369_v54, %v4860_v46  ;;  %v5354_v11 = vpop.f32.mrf.mxu1  ;;  %v4806_v0 = vpop.f32.mrf.mxu3  ;;  %v3185_v27 = vadd.f32 %v9212_v38, %v3149_v30 }
 0x54a   : > { %5850 = vst.msk [vmem:[%s9230_s22 + $0x58] sm:$0xff] %vm3203_vm3, %v5818_v21  ;;  %v5719_v2 = vmul.f32 %v9205_v7, %v5683_v6  ;;  %v4861_v21 = vadd.f32 %v9380_v49, %v9039_v13  ;;  %v5411_v15 = vadd.f32 %v9376_v41, %v5136_v59  ;;  %v4862_v41 = vadd.f32 %v4800_v3, %v9051_v37 }
 0x54b   : > { %v4863_v3 = vadd.f32 %v4803_v60, %v9063_v12 }
 0x54c   : > { %v5755_v44 = vadd.f32 %v9218_v10, %v5719_v2  ;;  %6565 = vmatmul.msk.f32.gmra.mxu2 %vm3203_vm3, %v9185_v9  ;;  %v9986_v2 = vld [vmem:[#allocation21_spill] sm:$0xff] }
 0x54e   : > { %v5787_v35 = vadd.f32 %v5755_v44, %v3183_v55  ;;  %v3150_v55 = vmul.f32 %v9199_v16, %v9986_v2 }
 0x54f   : > { %v5614_v18 = vpop.f32.mrf.mxu2 }
 0x550   : > { %v5819_v61 = vmax.f32 %v5787_v35, 0.0  ;;  %v5684_v40 = vadd.f32 %v5614_v18, %v5409_v17  ;;  %v5082_v35 = vpop.f32.mrf.mxu0  ;;  %v5137_v17 = vadd.f32 %v5073_v5, %v4861_v21  ;;  %v3186_v24 = vadd.f32 %v9212_v38, %v3150_v55  ;;  %v5357_v1 = vpop.f32.mrf.mxu1 }
 0x551   : > { %v4809_v49 = vpop.f32.mrf.mxu3 }
 0x552   : > { %5851 = vst.msk [vmem:[%s9230_s22 + $0x60] sm:$0xff] %vm3203_vm3, %v5819_v61  ;;  %v5720_v9 = vmul.f32 %v9205_v7, %v5684_v40  ;;  %v5412_v40 = vadd.f32 %v9397_v23, %v5137_v17 }
 0x554   : > { %v5756_v19 = vadd.f32 %v9218_v10, %v5720_v9  ;;  %6566 = vmatmul.msk.f32.gmra.mxu2 %vm3203_vm3, %v5458_v31  ;;  %v3151_v9 = vmul.f32 %v9199_v16, %v9987_v52 }
 0x556   : > { %v5788_v26 = vadd.f32 %v5756_v19, %v3184_v58  ;;  %v5138_v19 = vadd.f32 %v5076_v39, %v4862_v41 }
 0x557   : > { %v5617_v63 = vpop.f32.mrf.mxu2 }
 0x558   : > { %v5820_v29 = vmax.f32 %v5788_v26, 0.0  ;;  %v5685_v47 = vadd.f32 %v5617_v63, %v5410_v28  ;;  %v5085_v26 = vpop.f32.mrf.mxu0  ;;  %v3187_v28 = vadd.f32 %v9212_v38, %v3151_v9  ;;  %v5360_v23 = vpop.f32.mrf.mxu1  ;;  %v5413_v62 = vadd.f32 %v5351_v8, %v5138_v19 }
 0x559   : > { %v4812_v30 = vpop.f32.mrf.mxu3  ;;  %v4864_v8 = vadd.f32 %v4806_v0, %v9075_v45 }
 0x55a   : > { %5852 = vst.msk [vmem:[%s9230_s22 + $0x68] sm:$0xff] %vm3203_vm3, %v5820_v29  ;;  %v5721_v14 = vmul.f32 %v9205_v7, %v5685_v47  ;;  %v9988_v47 = vld [vmem:[#allocation36_spill] sm:$0xff] }
 0x55b   : > { %v3152_v39 = vmul.f32 %v9199_v16, %v9988_v47  ;;  %v5140_v17 = vadd.f32 %v5082_v35, %v4864_v8 }
 0x55c   : > { %v5757_v50 = vadd.f32 %v9218_v10, %v5721_v14  ;;  %6567 = vmatmul.msk.f32.gmra.mxu2 %vm3203_vm3, %v5459_v53  ;;  %v5139_v14 = vadd.f32 %v5079_v32, %v4863_v3  ;;  %v9991_v3 = vld [vmem:[#allocation26_spill] sm:$0xff] }
 0x55e   : > { %v5789_v6 = vadd.f32 %v5757_v50, %v3185_v27  ;;  %v3188_v50 = vadd.f32 %v9212_v38, %v3152_v39 }
 0x55f   : > { %v5620_v54 = vpop.f32.mrf.mxu2 }
 0x560   : > { %v5821_v44 = vmax.f32 %v5789_v6, 0.0  ;;  %v5686_v51 = vadd.f32 %v5620_v54, %v5411_v15  ;;  %v5088_v60 = vpop.f32.mrf.mxu0  ;;  %v5414_v6 = vadd.f32 %v5354_v11, %v5139_v14  ;;  %v9989_v54 = vld [vmem:[#allocation25_spill] sm:$0xff]  ;;  %v5363_v55 = vpop.f32.mrf.mxu1  ;;  %v4865_v11 = vadd.f32 %v4809_v49, %v9087_v22 }
 0x561   : > { %v3153_v2 = vmul.f32 %v9199_v16, %v9989_v54 }
 0x562   : > { %5853 = vst.msk [vmem:[%s9230_s22 + $0x70] sm:$0xff] %vm3203_vm3, %v5821_v44  ;;  %v5722_v18 = vmul.f32 %v9205_v7, %v5686_v51  ;;  %v4815_v51 = vpop.f32.mrf.mxu3  ;;  %v5141_v35 = vadd.f32 %v5085_v26, %v4865_v11 }
 0x564   : > { %v5758_v13 = vadd.f32 %v9218_v10, %v5722_v18 }
 0x566   : > { %v5790_v61 = vadd.f32 %v5758_v13, %v3186_v24  ;;  %v3189_v24 = vadd.f32 %v9212_v38, %v3153_v2  ;;  %v5415_v13 = vadd.f32 %v5357_v1, %v5140_v17  ;;  %v4866_v1 = vadd.f32 %v4812_v30, %v9099_v20 }
 0x567   : > { %v5623_v31 = vpop.f32.mrf.mxu2 }
 0x568   : > { %v5822_v5 = vmax.f32 %v5790_v61, 0.0  ;;  %v5687_v58 = vadd.f32 %v5623_v31, %v5412_v40  ;;  %v5091_v41 = vpop.f32.mrf.mxu0  ;;  %v9990_v40 = vld [vmem:[#allocation28_spill] sm:$0xff]  ;;  %v5142_v47 = vadd.f32 %v5088_v60, %v4866_v1 }
 0x569   : > { %v3154_v31 = vmul.f32 %v9199_v16, %v9990_v40 }
 0x56a   : > { %5854 = vst.msk [vmem:[%s9230_s22 + $0x78] sm:$0xff] %vm3203_vm3, %v5822_v5  ;;  %v5723_v46 = vmul.f32 %v9205_v7, %v5687_v58  ;;  %v5366_v5 = vpop.f32.mrf.mxu1  ;;  %v4818_v19 = vpop.f32.mrf.mxu3 }
 0x56c   : > { %v5759_v37 = vadd.f32 %v9218_v10, %v5723_v46  ;;  %v3190_v46 = vadd.f32 %v9212_v38, %v3154_v31 }
 0x56e   : > { %v5791_v63 = vadd.f32 %v5759_v37, %v3187_v28  ;;  %v5416_v28 = vadd.f32 %v5360_v23, %v5141_v35  ;;  %v4867_v23 = vadd.f32 %v4815_v51, %v9111_v33  ;;  %v4868_v33 = vadd.f32 %v4818_v19, %v9123_v48 }
 0x56f   : > { %v5626_v29 = vpop.f32.mrf.mxu2 }
 0x570   : > { %v5823_v53 = vmax.f32 %v5791_v63, 0.0  ;;  %v5688_v59 = vadd.f32 %v5626_v29, %v5413_v62  ;;  %v3155_v63 = vmul.f32 %v9199_v16, %v9991_v3  ;;  %v5094_v29 = vpop.f32.mrf.mxu0 }
 0x572   : > { %5855 = vst.msk [vmem:[%s9230_s22 + $0x80] sm:$0xff] %vm3203_vm3, %v5823_v53  ;;  %v5724_v27 = vmul.f32 %v9205_v7, %v5688_v59  ;;  %v3191_v53 = vadd.f32 %v9212_v38, %v3155_v63  ;;  %v5369_v59 = vpop.f32.mrf.mxu1  ;;  %v4821_v30 = vpop.f32.mrf.mxu3 }
 0x573   : > { %v4869_v31 = vadd.f32 %v4821_v30, %v9132_v25 }
 0x574   : > { %v5760_v12 = vadd.f32 %v9218_v10, %v5724_v27  ;;  %v5417_v27 = vadd.f32 %v5363_v55, %v5142_v47  ;;  %v9995_v47 = vld [vmem:[#allocation33_spill] sm:$0xff] }
 0x576   : > { %v5792_v21 = vadd.f32 %v5760_v12, %v3188_v50  ;;  %v9992_v12 = vld [vmem:[#allocation43_spill] sm:$0xff] }
 0x577   : > { %v5629_v15 = vpop.f32.mrf.mxu2  ;;  %v3156_v8 = vmul.f32 %v9199_v16, %v9992_v12 }
 0x578   : > { %v5824_v32 = vmax.f32 %v5792_v21, 0.0  ;;  %v5689_v44 = vadd.f32 %v5629_v15, %v5414_v6  ;;  %v5143_v6 = vadd.f32 %v5091_v41, %v4867_v23  ;;  %v5097_v54 = vpop.f32.mrf.mxu0 }
 0x579   : > { %v3192_v2 = vadd.f32 %v9212_v38, %v3156_v8 }
 0x57a   : > { %5856 = vst.msk [vmem:[%s9230_s22 + $0x88] sm:$0xff] %vm3203_vm3, %v5824_v32  ;;  %v5725_v18 = vmul.f32 %v9205_v7, %v5689_v44  ;;  %v5372_v55 = vpop.f32.mrf.mxu1  ;;  %v5418_v51 = vadd.f32 %v5366_v5, %v5143_v6  ;;  %v4824_v17 = vpop.f32.mrf.mxu3  ;;  %v9994_v5 = vld [vmem:[#allocation35_spill] sm:$0xff] }
 0x57b   : > { %v4870_v3 = vadd.f32 %v4824_v17, %v9141_v42 }
 0x57c   : > { %v5761_v45 = vadd.f32 %v9218_v10, %v5725_v18 }
 0x57e   : > { %v5793_v0 = vadd.f32 %v5761_v45, %v3189_v24  ;;  %v9993_v24 = vld [vmem:[#allocation32_spill] sm:$0xff] }
 0x57f   : > { %v5632_v61 = vpop.f32.mrf.mxu2  ;;  %v3157_v45 = vmul.f32 %v9199_v16, %v9993_v24 }
 0x580   : > { %v5825_v52 = vmax.f32 %v5793_v0, 0.0  ;;  %v5690_v9 = vadd.f32 %v5632_v61, %v5415_v13  ;;  %v5144_v13 = vadd.f32 %v5094_v29, %v4868_v33  ;;  %v5100_v40 = vpop.f32.mrf.mxu0 }
 0x581   : > { %v3193_v61 = vadd.f32 %v9212_v38, %v3157_v45 }
 0x582   : > { %5857 = vst.msk [vmem:[%s9230_s22 + $0x90] sm:$0xff] %vm3203_vm3, %v5825_v52  ;;  %v5726_v58 = vmul.f32 %v9205_v7, %v5690_v9  ;;  %v5419_v9 = vadd.f32 %v5369_v59, %v5144_v13  ;;  %v5375_v19 = vpop.f32.mrf.mxu1  ;;  %v4827_v1 = vpop.f32.mrf.mxu3 }
 0x584   : > { %v5762_v22 = vadd.f32 %v9218_v10, %v5726_v58  ;;  %v3158_v58 = vmul.f32 %v9199_v16, %v9994_v5 }
 0x586   : > { %v5794_v49 = vadd.f32 %v5762_v22, %v3190_v46 }
 0x587   : > { %v5635_v37 = vpop.f32.mrf.mxu2 }
 0x588   : > { %v5826_v26 = vmax.f32 %v5794_v49, 0.0  ;;  %v5691_v62 = vadd.f32 %v5635_v37, %v5416_v28  ;;  %v5145_v49 = vadd.f32 %v5097_v54, %v4869_v31  ;;  %v3194_v37 = vadd.f32 %v9212_v38, %v3158_v58 }
 0x58a   : > { %5858 = vst.msk [vmem:[%s9230_s22 + $0x98] sm:$0xff] %vm3203_vm3, %v5826_v26  ;;  %v5727_v39 = vmul.f32 %v9205_v7, %v5691_v62  ;;  %v5420_v26 = vadd.f32 %v5372_v55, %v5145_v49  ;;  %v5103_v62 = vpop.f32.mrf.mxu0  ;;  %v5378_v30 = vpop.f32.mrf.mxu1 }
 0x58c   : > { %v5763_v20 = vadd.f32 %v9218_v10, %v5727_v39  ;;  %v3159_v39 = vmul.f32 %v9199_v16, %v9995_v47  ;;  %v9999_v47 = vld [vmem:[#allocation51_spill] sm:$0xff] }
 0x58e   : > { %v5795_v14 = vadd.f32 %v5763_v20, %v3191_v53  ;;  %v5146_v20 = vadd.f32 %v5100_v40, %v4870_v3 }
 0x58f   : > { %v5638_v50 = vpop.f32.mrf.mxu2 }
 0x590   : > { %v5827_v21 = vmax.f32 %v5795_v14, 0.0  ;;  %v5692_v60 = vadd.f32 %v5638_v50, %v5417_v27  ;;  %v4830_v14 = vpop.f32.mrf.mxu3  ;;  %v3195_v27 = vadd.f32 %v9212_v38, %v3159_v39  ;;  %v4871_v50 = vadd.f32 %v4827_v1, %v9150_v34 }
 0x591   : > { %v5421_v8 = vadd.f32 %v5375_v19, %v5146_v20  ;;  %v4872_v17 = vadd.f32 %v4830_v14, %v9160_v57  ;;  %v3163_v39 = vmul.f32 %v9199_v16, %v9999_v47 }
 0x592   : > { %5859 = vst.msk [vmem:[%s9230_s22 + $0xa0] sm:$0xff] %vm3203_vm3, %v5827_v21  ;;  %v5728_v15 = vmul.f32 %v9205_v7, %v5692_v60  ;;  %v9996_v60 = vld [vmem:[#allocation48_spill] sm:$0xff] }
 0x593   : > { %v3160_v6 = vmul.f32 %v9199_v16, %v9996_v60  ;;  %v10000_v60 = vld [vmem:[#allocation38_spill] sm:$0xff] }
 0x594   : > { %v5764_v32 = vadd.f32 %v9218_v10, %v5728_v15 }
 0x595   : > { %v3196_v55 = vadd.f32 %v9212_v38, %v3160_v6  ;;  %v3164_v6 = vmul.f32 %v9199_v16, %v10000_v60 }
 0x596   : > { %v5796_v44 = vadd.f32 %v5764_v32, %v3192_v2  ;;  %v5106_v2 = vpop.f32.mrf.mxu0  ;;  %v5147_v32 = vadd.f32 %v5103_v62, %v4871_v50 }
 0x597   : > { %v5641_v18 = vpop.f32.mrf.mxu2 }
 0x598   : > { %v5828_v11 = vmax.f32 %v5796_v44, 0.0  ;;  %v5693_v0 = vadd.f32 %v5641_v18, %v5418_v51  ;;  %v5381_v44 = vpop.f32.mrf.mxu1  ;;  %v4833_v51 = vpop.f32.mrf.mxu3  ;;  %v5422_v24 = vadd.f32 %v5378_v30, %v5147_v32 }
 0x59a   : > { %5860 = vst.msk [vmem:[%s9230_s22 + $0xa8] sm:$0xff] %vm3203_vm3, %v5828_v11  ;;  %v5729_v41 = vmul.f32 %v9205_v7, %v5693_v0  ;;  %v9997_v11 = vld [vmem:[#allocation40_spill] sm:$0xff] }
 0x59b   : > { %v3161_v0 = vmul.f32 %v9199_v16, %v9997_v11 }
 0x59c   : > { %v5765_v48 = vadd.f32 %v9218_v10, %v5729_v41 }
 0x59d   : > { %v3197_v31 = vadd.f32 %v9212_v38, %v3161_v0 }
 0x59e   : > { %v5797_v52 = vadd.f32 %v5765_v48, %v3193_v61  ;;  %v5148_v61 = vadd.f32 %v5106_v2, %v4872_v17  ;;  %v5109_v40 = vpop.f32.mrf.mxu0 }
 0x59f   : > { %v5644_v35 = vpop.f32.mrf.mxu2 }
 0x5a0   : > { %v5829_v46 = vmax.f32 %v5797_v52, 0.0  ;;  %v5694_v22 = vadd.f32 %v5644_v35, %v5419_v9  ;;  %v5384_v57 = vpop.f32.mrf.mxu1  ;;  %v4873_v9 = vadd.f32 %v4833_v51, %v9170_v43  ;;  %v5423_v5 = vadd.f32 %v5381_v44, %v5148_v61  ;;  %v4836_v58 = vpop.f32.mrf.mxu3 }
 0x5a1   : > { %v3200_v44 = vadd.f32 %v9212_v38, %v3164_v6 }
 0x5a2   : > { %5861 = vst.msk [vmem:[%s9230_s22 + $0xb0] sm:$0xff] %vm3203_vm3, %v5829_v46  ;;  %v5730_v28 = vmul.f32 %v9205_v7, %v5694_v22  ;;  %v9998_v46 = vld [vmem:[#allocation46_spill] sm:$0xff] }
 0x5a3   : > { %v3162_v22 = vmul.f32 %v9199_v16, %v9998_v46 }
 0x5a4   : > { %v5766_v25 = vadd.f32 %v9218_v10, %v5730_v28  ;;  %v5149_v28 = vadd.f32 %v5109_v40, %v4873_v9  ;;  %v10002_v9 = vld [vmem:[#allocation66_spill] sm:$0xff] }
 0x5a6   : > { %v5798_v63 = vadd.f32 %v5766_v25, %v3194_v37  ;;  %v3198_v25 = vadd.f32 %v9212_v38, %v3162_v22  ;;  %v5112_v43 = vpop.f32.mrf.mxu0  ;;  %v5424_v62 = vadd.f32 %v5384_v57, %v5149_v28 }
 0x5a7   : > { %v5647_v29 = vpop.f32.mrf.mxu2 }
 0x5a8   : > { %v5830_v53 = vmax.f32 %v5798_v63, 0.0  ;;  %v5695_v59 = vadd.f32 %v5647_v29, %v5420_v26  ;;  %v4874_v63 = vadd.f32 %v4836_v58, %v9180_v56  ;;  %v5387_v20 = vpop.f32.mrf.mxu1  ;;  %v4839_v30 = vpop.f32.mrf.mxu3 }
 0x5a9   : > { %v4875_v50 = vadd.f32 %v4839_v30, %v9190_v4 }
 0x5aa   : > { %5862 = vst.msk [vmem:[%s9230_s22 + $0xb8] sm:$0xff] %vm3203_vm3, %v5830_v53  ;;  %v5731_v23 = vmul.f32 %v9205_v7, %v5695_v59 }
 0x5ac   : > { %v5767_v42 = vadd.f32 %v9218_v10, %v5731_v23  ;;  %v5150_v23 = vadd.f32 %v5112_v43, %v4874_v63 }
 0x5ae   : > { %v5799_v12 = vadd.f32 %v5767_v42, %v3195_v27  ;;  %v3199_v27 = vadd.f32 %v9212_v38, %v3163_v39  ;;  %v5115_v42 = vpop.f32.mrf.mxu0 }
 0x5af   : > { %v5650_v21 = vpop.f32.mrf.mxu2  ;;  %v5151_v32 = vadd.f32 %v5115_v42, %v4875_v50 }
 0x5b0   : > { %v5831_v15 = vmax.f32 %v5799_v12, 0.0  ;;  %v5696_v54 = vadd.f32 %v5650_v21, %v5421_v8  ;;  %v5425_v8 = vadd.f32 %v5387_v20, %v5150_v23  ;;  %v5390_v2 = vpop.f32.mrf.mxu1 }
 0x5b2   : > { %5863 = vst.msk [vmem:[%s9230_s22 + $0xc0] sm:$0xff] %vm3203_vm3, %v5831_v15  ;;  %v5732_v33 = vmul.f32 %v9205_v7, %v5696_v54 }
 0x5b4   : > { %v5768_v34 = vadd.f32 %v9218_v10, %v5732_v33 }
 0x5b6   : > { %v5800_v18 = vadd.f32 %v5768_v34, %v3196_v55  ;;  %v4842_v55 = vpop.f32.mrf.mxu3  ;;  %v5426_v34 = vadd.f32 %v5390_v2, %v5151_v32 }
 0x5b7   : > { %v5653_v45 = vpop.f32.mrf.mxu2  ;;  %v4876_v51 = vadd.f32 %v4842_v55, %v9194_v36 }
 0x5b8   : > { %v5832_v13 = vmax.f32 %v5800_v18, 0.0  ;;  %v5697_v41 = vadd.f32 %v5653_v45, %v5422_v24  ;;  %v5118_v18 = vpop.f32.mrf.mxu0  ;;  %v10001_v45 = vld [vmem:[#allocation60_spill] sm:$0xff] }
 0x5b9   : > { %v3165_v11 = vmul.f32 %v9199_v16, %v10001_v45 }
 0x5ba   : > { %5864 = vst.msk [vmem:[%s9230_s22 + $0xc8] sm:$0xff] %vm3203_vm3, %v5832_v13  ;;  %v5733_v48 = vmul.f32 %v9205_v7, %v5697_v41  ;;  %v5152_v41 = vadd.f32 %v5118_v18, %v4876_v51 }
 0x5bb   : > { %v3201_v40 = vadd.f32 %v9212_v38, %v3165_v11 }
 0x5bc   : > { %v5769_v52 = vadd.f32 %v9218_v10, %v5733_v48  ;;  %v5393_v48 = vpop.f32.mrf.mxu1 }
 0x5be   : > { %v5801_v35 = vadd.f32 %v5769_v52, %v3197_v31  ;;  %v5427_v31 = vadd.f32 %v5393_v48, %v5152_v41 }
 0x5bf   : > { %v5656_v19 = vpop.f32.mrf.mxu2 }
 0x5c0   : > { %v5833_v1 = vmax.f32 %v5801_v35, 0.0  ;;  %v5698_v49 = vadd.f32 %v5656_v19, %v5423_v5  ;;  %v3166_v35 = vmul.f32 %v9199_v16, %v10002_v9 }
 0x5c2   : > { %5865 = vst.msk [vmem:[%s9230_s22 + $0xd0] sm:$0xff] %vm3203_vm3, %v5833_v1  ;;  %v5734_v37 = vmul.f32 %v9205_v7, %v5698_v49  ;;  %v3202_v46 = vadd.f32 %v9212_v38, %v3166_v35 }
 0x5c4   : > { %v5770_v3 = vadd.f32 %v9218_v10, %v5734_v37 }
 0x5c6   : > { %v5802_v26 = vadd.f32 %v5770_v3, %v3198_v25 }
 0x5c7   : > { %v5659_v29 = vpop.f32.mrf.mxu2 }
 0x5c8   : > { %v5834_v53 = vmax.f32 %v5802_v26, 0.0  ;;  %v5699_v59 = vadd.f32 %v5659_v29, %v5424_v62 }
 0x5ca   : > { %5866 = vst.msk [vmem:[%s9230_s22 + $0xd8] sm:$0xff] %vm3203_vm3, %v5834_v53  ;;  %v5735_v14 = vmul.f32 %v9205_v7, %v5699_v59 }
 0x5cc   : > { %v5771_v56 = vadd.f32 %v9218_v10, %v5735_v14 }
 0x5ce   : > { %v5803_v12 = vadd.f32 %v5771_v56, %v3199_v27 }
 0x5cf   : > { %v5662_v21 = vpop.f32.mrf.mxu2 }
 0x5d0   : > { %v5835_v15 = vmax.f32 %v5803_v12, 0.0  ;;  %v5700_v54 = vadd.f32 %v5662_v21, %v5425_v8 }
 0x5d2   : > { %5867 = vst.msk [vmem:[%s9230_s22 + $0xe0] sm:$0xff] %vm3203_vm3, %v5835_v15  ;;  %v5736_v33 = vmul.f32 %v9205_v7, %v5700_v54 }
 0x5d4   : > { %v5772_v4 = vadd.f32 %v9218_v10, %v5736_v33 }
 0x5d6   : > { %v5804_v17 = vadd.f32 %v5772_v4, %v3200_v44 }
 0x5d7   : > { %v5665_v24 = vpop.f32.mrf.mxu2 }
 0x5d8   : > { %v5836_v0 = vmax.f32 %v5804_v17, 0.0  ;;  %v5701_v13 = vadd.f32 %v5665_v24, %v5426_v34 }
 0x5da   : > { %5868 = vst.msk [vmem:[%s9230_s22 + $0xe8] sm:$0xff] %vm3203_vm3, %v5836_v0  ;;  %v5737_v61 = vmul.f32 %v9205_v7, %v5701_v13 }
 0x5dc   : > { %v5773_v36 = vadd.f32 %v9218_v10, %v5737_v61 }
 0x5de   : > { %v5805_v52 = vadd.f32 %v5773_v36, %v3201_v40 }
 0x5df   : > { %v5668_v57 = vpop.f32.mrf.mxu2 }
 0x5e0   : > { %v5837_v5 = vmax.f32 %v5805_v52, 0.0  ;;  %v5702_v58 = vadd.f32 %v5668_v57, %v5427_v31 }
 0x5e2   : > { %5869 = vst.msk [vmem:[%s9230_s22 + $0xf0] sm:$0xff] %vm3203_vm3, %v5837_v5  ;;  %v5738_v19 = vmul.f32 %v9205_v7, %v5702_v58 }
 0x5e4   : > { %v5774_v22 = vadd.f32 %v9218_v10, %v5738_v19 }
 0x5e6   : > { %v5806_v1 = vadd.f32 %v5774_v22, %v3202_v46 }
 0x5e8   : > { %v5838_v49 = vmax.f32 %v5806_v1, 0.0 }
 0x5ea   : > { %5870 = vst.msk [vmem:[%s9230_s22 + $0xf8] sm:$0xff] %vm3203_vm3, %v5838_v49 }
 0x5eb PF: > { %s20_s13 = sadd.s32 1, %s6630_s13  }
 0x5ec   : > { %p17_p4 = scmp.ge.s32.totalorder %s20_s13, 4  }
 0x5ee   :  { %19 = sbr.rel (!%p17_p4) target bundleno = 1 (0x1), region = 110 }

</bundles_post_ra>
